<compile_context>
chip_gen: v7x
topology: tpu7x:2x2x1
jax: 0.10.0
libtpu: 0.0.40
codegen_flags: <defaults>
</compile_context>

<pallas_src>
import functools

import jax
import jax.numpy as jnp
from jax import lax
from jax.experimental import pallas as pl
from jax.experimental.pallas import tpu as pltpu


def _round_up(x, m):
    return (x + m - 1) // m * m


def _conv_stats_kernel(mask_ref, x_ref, w_ref, b_ref, gamma_ref, beta_ref,
                       y_ref, ab_ref, sum_ref, sqs_ref,
                       *, outc, TD, M, CHUNK, lead, Wp, G, cpg, eps, count):
    """Grid step = (sample n, depth tile dt): computes TD output depth planes.

    mask_ref:  (1, TD*M)   f32   1.0 on valid interior columns, 0.0 on junk/border
    x_ref:     (1, 1, C, Lt) bf16 padded-input window (planes dt*TD .. dt*TD+TD+1)
    w_ref:     (27, outc, C) bf16 per-tap conv weights (transposed conv folded)
    b/gamma/beta: (outc, 1) f32
    y_ref:     (1, outc, TD*M) bf16 pre-norm conv output (M-padded plane slots)
    ab_ref:    (1, outc, 2)  f32  fused per-channel scale/shift (written at last dt)
    sum/sqs:   (outc, 1)     f32  running per-channel stats across depth tiles
    """
    dt = pl.program_id(1)

    @pl.when(dt == 0)
    def _():
        sum_ref[...] = jnp.zeros_like(sum_ref)
        sqs_ref[...] = jnp.zeros_like(sqs_ref)

    bias = b_ref[...]                                    # (outc, 1) f32
    n_chunks = (TD * M) // CHUNK
    for ci in range(n_chunks):
        col0 = ci * CHUNK
        acc = jnp.zeros((outc, CHUNK), jnp.float32)
        # 27 taps: each is a statically shifted lane slice of the resident window
        # fed straight to the MXU (no im2col patch, no masked assembly stores).
        for kd in range(3):
            for kh in range(3):
                for kw in range(3):
                    tap = (kd * 3 + kh) * 3 + kw
                    s = (kh - 1) * Wp + (kw - 1)
                    src = lead + kd * M + s + col0       # static, in-bounds by construction
                    rhs = x_ref[0, 0, :, src:src + CHUNK]            # (C, CHUNK) bf16
                    acc = acc + jnp.dot(w_ref[tap], rhs,
                                        preferred_element_type=jnp.float32)
        acc = acc + bias                                  # (outc, CHUNK) f32
        # Dense (128-multiple) lane store of the pre-norm output.
        y_ref[0, :, col0:col0 + CHUNK] = acc.astype(y_ref.dtype)
        # f32 statistics over valid interior columns only.
        m = mask_ref[0:1, col0:col0 + CHUNK]              # (1, CHUNK)
        am = acc * m
        sum_ref[...] += jnp.sum(am, axis=1, keepdims=True)
        sqs_ref[...] += jnp.sum(am * acc, axis=1, keepdims=True)

    # Last depth tile of this sample: fold group stats + GroupNorm affine into
    # a per-channel scale/shift  z = a * y + b.
    @pl.when(dt == pl.num_programs(1) - 1)
    def _():
        g_sum = jnp.sum(sum_ref[...].reshape(G, cpg), axis=1, keepdims=True)   # (G, 1)
        g_sqs = jnp.sum(sqs_ref[...].reshape(G, cpg), axis=1, keepdims=True)   # (G, 1)
        mean_g = g_sum / count
        var_g = jnp.maximum(g_sqs / count - mean_g * mean_g, 0.0)   # clamp: no NaN via rsqrt
        inv_g = lax.rsqrt(var_g + eps)
        mean_c = jnp.broadcast_to(mean_g, (G, cpg)).reshape(outc, 1)
        inv_c = jnp.broadcast_to(inv_g, (G, cpg)).reshape(outc, 1)
        a = gamma_ref[...] * inv_c
        b = beta_ref[...] - mean_c * a
        ab_ref[0, :, 0:1] = a
        ab_ref[0, :, 1:2] = b


def _norm_silu_kernel(y_ref, ab_ref, o_ref):
    """Elementwise GroupNorm-apply + SiLU on the compact (outc, TD2*HW) block."""
    a = ab_ref[0, :, 0:1]                                 # (outc, 1)
    b = ab_ref[0, :, 1:2]                                 # (outc, 1)
    z = y_ref[0].astype(jnp.float32) * a + b              # (outc, TD2*HW)
    o_ref[0] = z * jax.nn.sigmoid(z)


def basic_deconvolution_block(x, w_pt, b, gamma, beta, *, num_groups=32, eps=1e-5):
    """Forward of BasicDeconvolutionBlock with ks=3, stride=1, dilation=1, padding=1.

    x:    (N, inc, D, H, W)    float32 (NCDHW)
    w_pt: (inc, outc, 3, 3, 3) ConvTranspose3d weight (PyTorch layout)
    b:    (outc,)              ConvTranspose3d bias
    gamma, beta: (outc,)       GroupNorm affine params
    returns (N, outc, D, H, W) float32
    """
    N, C, D, H, W = x.shape
    outc = w_pt.shape[1]
    assert outc % num_groups == 0
    G = num_groups
    cpg = outc // G

    # Pad channels to a multiple of 8 (cheap; friendlier MXU contraction / loads).
    Cp = _round_up(C, 8)
    if Cp != C:
        x = jnp.pad(x, ((0, 0), (0, Cp - C), (0, 0), (0, 0), (0, 0)))
        w_pt = jnp.pad(w_pt, ((0, Cp - C), (0, 0), (0, 0), (0, 0), (0, 0)))
        C = Cp

    Hp, Wp = H + 2, W + 2
    hw = Hp * Wp
    HW = H * W
    s_max = Wp + 1                      # max lane shift of a (kh, kw) tap
    M = _round_up(hw, 128)              # 128-aligned per-plane lane slot

    # ---- depth tile for kernel 1: largest divisor of D that fits a VMEM budget ----
    budget = 24 * 1024 * 1024
    TD = 1
    for t in range(D, 0, -1):
        if D % t:
            continue
        lt = _round_up(s_max + (t + 2) * M + s_max, 128)
        footprint = (2 * C * lt * 2            # input window (double buffered, bf16)
                     + 2 * outc * t * M * 2    # y block (double buffered, bf16)
                     + 2 * t * M * 4           # mask
                     + 27 * outc * 128 * 2     # weights (lane-padded)
                     + outc * 512 * 4)         # in-flight f32 chunk headroom
        if footprint <= budget:
            TD = t
            break
    nT = D // TD
    lead = s_max
    Lt = _round_up(lead + (TD + 2) * M + s_max, 128)

    # Lane chunk processed per inner step (multiple of 128, sized for vregs).
    CHUNK = 512 if outc <= 32 else 256
    while CHUNK > 128 and (TD * M) % CHUNK:
        CHUNK //= 2

    # ---- glue: zero-padded input, plane-major lanes, overlapping depth windows ----
    xpad = jnp.pad(x, ((0, 0), (0, 0), (1, 1), (1, 1), (1, 1)))        # (N, C, D+2, Hp, Wp)
    planes = xpad.reshape(N, C, D + 2, hw)
    planes = jnp.pad(planes, ((0, 0), (0, 0), (0, 0), (0, M - hw)))    # (N, C, D+2, M)
    wins = jnp.stack([planes[:, :, i * TD:i * TD + TD + 2, :] for i in range(nT)],
                     axis=1)                                            # (N, nT, C, TD+2, M)
    wins = wins.reshape(N, nT, C, (TD + 2) * M)
    x_tiles = jnp.pad(wins, ((0, 0), (0, 0), (0, 0),
                             (lead, Lt - lead - (TD + 2) * M))).astype(jnp.bfloat16)

    # ConvTranspose3d(ks=3, stride=1, pad=1) == conv3d with flipped kernel, pad=1.
    w_flip = jnp.flip(w_pt, axis=(2, 3, 4))                             # (C, outc, 3,3,3)
    w_taps = w_flip.transpose(2, 3, 4, 1, 0).reshape(27, outc, C).astype(jnp.bfloat16)

    b2 = b.reshape(outc, 1).astype(jnp.float32)
    g2 = gamma.reshape(outc, 1).astype(jnp.float32)
    be2 = beta.reshape(outc, 1).astype(jnp.float32)

    # 0/1 mask of the valid interior columns within one M-wide plane slot.
    jm = jnp.arange(M)
    row = jm // Wp
    col = jm % Wp
    valid = (jm < hw) & (row >= 1) & (row <= H) & (col >= 1) & (col <= W)
    mask = jnp.tile(valid.astype(jnp.float32), TD).reshape(1, TD * M)

    kernel1 = functools.partial(
        _conv_stats_kernel, outc=outc, TD=TD, M=M, CHUNK=CHUNK, lead=lead,
        Wp=Wp, G=G, cpg=cpg, eps=float(eps), count=float(D * H * W * cpg))

    flops1 = 2 * N * D * M * 27 * C * outc
    bytes1 = (x_tiles.size * 2 + w_taps.size * 2 + mask.size * 4
              + N * outc * D * M * 2 + N * outc * 2 * 4)

    y_pre, ab = pl.pallas_call(
        kernel1,
        out_shape=(jax.ShapeDtypeStruct((N, outc, D * M), jnp.bfloat16),
                   jax.ShapeDtypeStruct((N, outc, 2), jnp.float32)),
        grid=(N, nT),
        in_specs=[
            pl.BlockSpec((1, TD * M), lambda n, dt: (0, 0)),
            pl.BlockSpec((1, 1, C, Lt), lambda n, dt: (n, dt, 0, 0)),
            pl.BlockSpec((27, outc, C), lambda n, dt: (0, 0, 0)),
            pl.BlockSpec((outc, 1), lambda n, dt: (0, 0)),
            pl.BlockSpec((outc, 1), lambda n, dt: (0, 0)),
            pl.BlockSpec((outc, 1), lambda n, dt: (0, 0)),
        ],
        out_specs=(
            pl.BlockSpec((1, outc, TD * M), lambda n, dt: (n, 0, dt)),
            pl.BlockSpec((1, outc, 2), lambda n, dt: (n, 0, 0)),
        ),
        scratch_shapes=[
            pltpu.VMEM((outc, 1), jnp.float32),
            pltpu.VMEM((outc, 1), jnp.float32),
        ],
        compiler_params=pltpu.CompilerParams(
            dimension_semantics=("parallel", "arbitrary"),
            vmem_limit_bytes=48 * 1024 * 1024),
        cost_estimate=pl.CostEstimate(flops=int(flops1), transcendentals=0,
                                      bytes_accessed=int(bytes1)),
    )(mask, x_tiles, w_taps, b2, g2, be2)

    # Small bf16 border-drop slice between kernels (fuses into one XLA copy under jit).
    y_c = (y_pre.reshape(N, outc, D, M)[:, :, :, :hw]
           .reshape(N, outc, D, Hp, Wp)[:, :, :, 1:H + 1, 1:W + 1]
           .reshape(N, outc, D * HW))

    # ---- depth tile for kernel 2 ----
    TD2 = D
    for t in range(D, 0, -1):
        if D % t:
            continue
        if (t * HW) % 128 and t != D:
            continue
        if outc * t * HW * (2 * 2 + 2 * 4) <= budget:
            TD2 = t
            break
    nT2 = D // TD2

    flops2 = 4 * N * outc * D * HW
    bytes2 = y_c.size * 2 + N * outc * 2 * 4 + N * outc * D * HW * 4

    out = pl.pallas_call(
        _norm_silu_kernel,
        out_shape=jax.ShapeDtypeStruct((N, outc, D * HW), jnp.float32),
        grid=(N, nT2),
        in_specs=[
            pl.BlockSpec((1, outc, TD2 * HW), lambda n, dt: (n, 0, dt)),
            pl.BlockSpec((1, outc, 2), lambda n, dt: (n, 0, 0)),
        ],
        out_specs=pl.BlockSpec((1, outc, TD2 * HW), lambda n, dt: (n, 0, dt)),
        compiler_params=pltpu.CompilerParams(
            dimension_semantics=("parallel", "parallel"),
            vmem_limit_bytes=32 * 1024 * 1024),
        cost_estimate=pl.CostEstimate(flops=int(flops2),
                                      transcendentals=int(N * outc * D * HW),
                                      bytes_accessed=int(bytes2)),
    )(y_c, ab)

    # (N, outc, D*H*W) -> NCDHW is a free reshape (no transpose left for XLA).
    return out.reshape(N, outc, D, H, W)


def reference(x, w_pt, b, gamma, beta, num_groups=32, eps=1e-5):
    """Pure-JAX reference: direct scatter form of ConvTranspose3d + GroupNorm + SiLU."""
    N, C, D, H, W = x.shape
    outc = w_pt.shape[1]
    ks = 3
    y_full = jnp.zeros((N, outc, D + 2, H + 2, W + 2), jnp.float32)
    for kd in range(ks):
        for kh in range(ks):
            for kw in range(ks):
                wk = w_pt[:, :, kd, kh, kw]                     # (C, outc)
                contrib = jnp.einsum('ncdhw,co->nodhw', x, wk)
                y_full = y_full.at[:, :, kd:kd + D, kh:kh + H, kw:kw + W].add(contrib)
    y = y_full[:, :, 1:1 + D, 1:1 + H, 1:1 + W] + b.reshape(1, outc, 1, 1, 1)
    cpg = outc // num_groups
    yg = y.reshape(N, num_groups, cpg, D, H, W)
    mean = yg.mean(axis=(2, 3, 4, 5), keepdims=True)
    var = yg.var(axis=(2, 3, 4, 5), keepdims=True)
    yn = ((yg - mean) / jnp.sqrt(var + eps)).reshape(N, outc, D, H, W)
    yn = yn * gamma.reshape(1, outc, 1, 1, 1) + beta.reshape(1, outc, 1, 1, 1)
    return yn * jax.nn.sigmoid(yn)


if __name__ == "__main__":
    key = jax.random.PRNGKey(0)
    k1, k2, k3, k4, k5 = jax.random.split(key, 5)

    # small shapes consistent with the module (outc divisible by 32 for GroupNorm(32, outc))
    N, inc, outc = 2, 4, 32
    D = H = W = 8

    x = jax.random.normal(k1, (N, inc, D, H, W), jnp.float32)
    w_pt = 0.1 * jax.random.normal(k2, (inc, outc, 3, 3, 3), jnp.float32)
    bias = 0.1 * jax.random.normal(k3, (outc,), jnp.float32)
    gamma = 1.0 + 0.1 * jax.random.normal(k4, (outc,), jnp.float32)
    beta = 0.1 * jax.random.normal(k5, (outc,), jnp.float32)

    fn = jax.jit(basic_deconvolution_block)
    out = fn(x, w_pt, bias, gamma, beta)
    out = jax.block_until_ready(out)

    ref = reference(x, w_pt, bias, gamma, beta)
    assert out.shape == ref.shape == (N, outc, D, H, W)
    max_err = float(jnp.max(jnp.abs(out - ref)))
    # bf16 conv inputs + bf16 pre-norm intermediate -> relaxed (but still tight) tolerance.
    assert jnp.allclose(out, ref, atol=2e-2, rtol=2e-2), f"max_err={max_err}"

    print("KERNEL_OK")
</pallas_src>

<mosaic_0001>
module attributes {stable_mosaic.version = 11 : i64} {
  func.func @_conv_stats_kernel(%arg0: i32, %arg1: i32, %arg2: memref<1x1024xf32, #tpu.memory_space<vmem>>, %arg3: memref<1x1x8x1408xbf16, #tpu.memory_space<vmem>>, %arg4: memref<27x32x8xbf16, #tpu.memory_space<vmem>>, %arg5: memref<32x1xf32, #tpu.memory_space<vmem>>, %arg6: memref<32x1xf32, #tpu.memory_space<vmem>>, %arg7: memref<32x1xf32, #tpu.memory_space<vmem>>, %arg8: memref<1x32x1024xbf16, #tpu.memory_space<vmem>>, %arg9: memref<1x32x2xf32, #tpu.memory_space<vmem>>, %arg10: memref<32x1xf32, #tpu.memory_space<vmem>>, %arg11: memref<32x1xf32, #tpu.memory_space<vmem>>) attributes {dimension_semantics = [#tpu.dimension_semantics<parallel>, #tpu.dimension_semantics<arbitrary>], iteration_bounds = array<i64: 2, 1>, scalar_prefetch = 0 : i64, scratch_operands = 2 : i64, tpu.core_type = #tpu.core_type<tc>, window_params = [{pipeline_mode = #tpu.pipeline_mode<synchronous>, transform_indices = @transform_0, window_bounds = array<i64: 1, 1024>}, {transform_indices = @transform_1, window_bounds = array<i64: 1, 1, 8, 1408>}, {pipeline_mode = #tpu.pipeline_mode<synchronous>, transform_indices = @transform_2, window_bounds = array<i64: 27, 32, 8>}, {pipeline_mode = #tpu.pipeline_mode<synchronous>, transform_indices = @transform_3, window_bounds = array<i64: 32, 1>}, {pipeline_mode = #tpu.pipeline_mode<synchronous>, transform_indices = @transform_4, window_bounds = array<i64: 32, 1>}, {pipeline_mode = #tpu.pipeline_mode<synchronous>, transform_indices = @transform_5, window_bounds = array<i64: 32, 1>}, {transform_indices = @transform_6, window_bounds = array<i64: 1, 32, 1024>}, {transform_indices = @transform_7, window_bounds = array<i64: 1, 32, 2>}]} {
    %c0_i32 = arith.constant 0 : i32
    %0 = arith.cmpi eq, %arg1, %c0_i32 : i32
    %1 = arith.extui %0 : i1 to i32
    %c0_i32_0 = arith.constant 0 : i32
    %2 = arith.cmpi ne, %1, %c0_i32_0 : i32
    scf.if %2 {
      %cst_396 = arith.constant 0.000000e+00 : f32
      %373 = vector.broadcast %cst_396 : f32 to vector<32x1xf32>
      %c0_397 = arith.constant 0 : index
      %c0_398 = arith.constant 0 : index
      %374 = vector.load %arg10[%c0_397, %c0_398] : memref<32x1xf32, #tpu.memory_space<vmem>>, vector<32x1xf32>
      tpu.vector_store %arg10[%c0_397, %c0_398], %373 {strides = array<i32>} : memref<32x1xf32, #tpu.memory_space<vmem>>, vector<32x1xf32>,
      %cst_399 = arith.constant 0.000000e+00 : f32
      %375 = vector.broadcast %cst_399 : f32 to vector<32x1xf32>
      %c0_400 = arith.constant 0 : index
      %c0_401 = arith.constant 0 : index
      %376 = vector.load %arg11[%c0_400, %c0_401] : memref<32x1xf32, #tpu.memory_space<vmem>>, vector<32x1xf32>
      tpu.vector_store %arg11[%c0_400, %c0_401], %375 {strides = array<i32>} : memref<32x1xf32, #tpu.memory_space<vmem>>, vector<32x1xf32>,
    } else {
    }
    %c0 = arith.constant 0 : index
    %c0_1 = arith.constant 0 : index
    %3 = vector.load %arg5[%c0, %c0_1] : memref<32x1xf32, #tpu.memory_space<vmem>>, vector<32x1xf32>
    %cst = arith.constant 0.000000e+00 : f32
    %4 = vector.broadcast %cst : f32 to vector<32x512xf32>
    %c0_2 = arith.constant 0 : index
    %c0_3 = arith.constant 0 : index
    %c0_4 = arith.constant 0 : index
    %c0_5 = arith.constant 0 : index
    %5 = vector.load %arg3[%c0_2, %c0_3, %c0_4, %c0_5] : memref<1x1x8x1408xbf16, #tpu.memory_space<vmem>>, vector<1x1x8x512xbf16>
    %6 = vector.shape_cast %5 : vector<1x1x8x512xbf16> to vector<8x512xbf16>
    %c0_6 = arith.constant 0 : index
    %c0_7 = arith.constant 0 : index
    %c0_8 = arith.constant 0 : index
    %7 = vector.load %arg4[%c0_6, %c0_7, %c0_8] : memref<27x32x8xbf16, #tpu.memory_space<vmem>>, vector<1x32x8xbf16>
    %8 = vector.shape_cast %7 : vector<1x32x8xbf16> to vector<32x8xbf16>
    %cst_9 = arith.constant dense<0.000000e+00> : vector<32x512xf32>
    %9 = tpu.matmul %8, %6, %cst_9 {dimension_numbers = #tpu.dot_dimension_numbers<[1], [0], [0], [1], [0, 0, 1, 1], [], []>} : vector<32x8xbf16>, vector<8x512xbf16>, vector<32x512xf32> -> vector<32x512xf32>
    %10 = arith.addf %4, %9 : vector<32x512xf32>
    %c0_10 = arith.constant 0 : index
    %c0_11 = arith.constant 0 : index
    %c0_12 = arith.constant 0 : index
    %c1 = arith.constant 1 : index
    %11 = vector.load %arg3[%c0_10, %c0_11, %c0_12, %c1] : memref<1x1x8x1408xbf16, #tpu.memory_space<vmem>>, vector<1x1x8x512xbf16>
    %12 = vector.shape_cast %11 : vector<1x1x8x512xbf16> to vector<8x512xbf16>
    %c1_13 = arith.constant 1 : index
    %c0_14 = arith.constant 0 : index
    %c0_15 = arith.constant 0 : index
    %13 = vector.load %arg4[%c1_13, %c0_14, %c0_15] : memref<27x32x8xbf16, #tpu.memory_space<vmem>>, vector<1x32x8xbf16>
    %14 = vector.shape_cast %13 : vector<1x32x8xbf16> to vector<32x8xbf16>
    %cst_16 = arith.constant dense<0.000000e+00> : vector<32x512xf32>
    %15 = tpu.matmul %14, %12, %cst_16 {dimension_numbers = #tpu.dot_dimension_numbers<[1], [0], [0], [1], [0, 0, 1, 1], [], []>} : vector<32x8xbf16>, vector<8x512xbf16>, vector<32x512xf32> -> vector<32x512xf32>
    %16 = arith.addf %10, %15 : vector<32x512xf32>
    %c0_17 = arith.constant 0 : index
    %c0_18 = arith.constant 0 : index
    %c0_19 = arith.constant 0 : index
    %c2 = arith.constant 2 : index
    %17 = vector.load %arg3[%c0_17, %c0_18, %c0_19, %c2] : memref<1x1x8x1408xbf16, #tpu.memory_space<vmem>>, vector<1x1x8x512xbf16>
    %18 = vector.shape_cast %17 : vector<1x1x8x512xbf16> to vector<8x512xbf16>
    %c2_20 = arith.constant 2 : index
    %c0_21 = arith.constant 0 : index
    %c0_22 = arith.constant 0 : index
    %19 = vector.load %arg4[%c2_20, %c0_21, %c0_22] : memref<27x32x8xbf16, #tpu.memory_space<vmem>>, vector<1x32x8xbf16>
    %20 = vector.shape_cast %19 : vector<1x32x8xbf16> to vector<32x8xbf16>
    %cst_23 = arith.constant dense<0.000000e+00> : vector<32x512xf32>
    %21 = tpu.matmul %20, %18, %cst_23 {dimension_numbers = #tpu.dot_dimension_numbers<[1], [0], [0], [1], [0, 0, 1, 1], [], []>} : vector<32x8xbf16>, vector<8x512xbf16>, vector<32x512xf32> -> vector<32x512xf32>
    %22 = arith.addf %16, %21 : vector<32x512xf32>
    %c0_24 = arith.constant 0 : index
    %c0_25 = arith.constant 0 : index
    %c0_26 = arith.constant 0 : index
    %c10 = arith.constant 10 : index
    %23 = vector.load %arg3[%c0_24, %c0_25, %c0_26, %c10] : memref<1x1x8x1408xbf16, #tpu.memory_space<vmem>>, vector<1x1x8x512xbf16>
    %24 = vector.shape_cast %23 : vector<1x1x8x512xbf16> to vector<8x512xbf16>
    %c3 = arith.constant 3 : index
    %c0_27 = arith.constant 0 : index
    %c0_28 = arith.constant 0 : index
    %25 = vector.load %arg4[%c3, %c0_27, %c0_28] : memref<27x32x8xbf16, #tpu.memory_space<vmem>>, vector<1x32x8xbf16>
    %26 = vector.shape_cast %25 : vector<1x32x8xbf16> to vector<32x8xbf16>
    %cst_29 = arith.constant dense<0.000000e+00> : vector<32x512xf32>
    %27 = tpu.matmul %26, %24, %cst_29 {dimension_numbers = #tpu.dot_dimension_numbers<[1], [0], [0], [1], [0, 0, 1, 1], [], []>} : vector<32x8xbf16>, vector<8x512xbf16>, vector<32x512xf32> -> vector<32x512xf32>
    %28 = arith.addf %22, %27 : vector<32x512xf32>
    %c0_30 = arith.constant 0 : index
    %c0_31 = arith.constant 0 : index
    %c0_32 = arith.constant 0 : index
    %c11 = arith.constant 11 : index
    %29 = vector.load %arg3[%c0_30, %c0_31, %c0_32, %c11] : memref<1x1x8x1408xbf16, #tpu.memory_space<vmem>>, vector<1x1x8x512xbf16>
    %30 = vector.shape_cast %29 : vector<1x1x8x512xbf16> to vector<8x512xbf16>
    %c4 = arith.constant 4 : index
    %c0_33 = arith.constant 0 : index
    %c0_34 = arith.constant 0 : index
    %31 = vector.load %arg4[%c4, %c0_33, %c0_34] : memref<27x32x8xbf16, #tpu.memory_space<vmem>>, vector<1x32x8xbf16>
    %32 = vector.shape_cast %31 : vector<1x32x8xbf16> to vector<32x8xbf16>
    %cst_35 = arith.constant dense<0.000000e+00> : vector<32x512xf32>
    %33 = tpu.matmul %32, %30, %cst_35 {dimension_numbers = #tpu.dot_dimension_numbers<[1], [0], [0], [1], [0, 0, 1, 1], [], []>} : vector<32x8xbf16>, vector<8x512xbf16>, vector<32x512xf32> -> vector<32x512xf32>
    %34 = arith.addf %28, %33 : vector<32x512xf32>
    %c0_36 = arith.constant 0 : index
    %c0_37 = arith.constant 0 : index
    %c0_38 = arith.constant 0 : index
    %c12 = arith.constant 12 : index
    %35 = vector.load %arg3[%c0_36, %c0_37, %c0_38, %c12] : memref<1x1x8x1408xbf16, #tpu.memory_space<vmem>>, vector<1x1x8x512xbf16>
    %36 = vector.shape_cast %35 : vector<1x1x8x512xbf16> to vector<8x512xbf16>
    %c5 = arith.constant 5 : index
    %c0_39 = arith.constant 0 : index
    %c0_40 = arith.constant 0 : index
    %37 = vector.load %arg4[%c5, %c0_39, %c0_40] : memref<27x32x8xbf16, #tpu.memory_space<vmem>>, vector<1x32x8xbf16>
    %38 = vector.shape_cast %37 : vector<1x32x8xbf16> to vector<32x8xbf16>
    %cst_41 = arith.constant dense<0.000000e+00> : vector<32x512xf32>
    %39 = tpu.matmul %38, %36, %cst_41 {dimension_numbers = #tpu.dot_dimension_numbers<[1], [0], [0], [1], [0, 0, 1, 1], [], []>} : vector<32x8xbf16>, vector<8x512xbf16>, vector<32x512xf32> -> vector<32x512xf32>
    %40 = arith.addf %34, %39 : vector<32x512xf32>
    %c0_42 = arith.constant 0 : index
    %c0_43 = arith.constant 0 : index
    %c0_44 = arith.constant 0 : index
    %c20 = arith.constant 20 : index
    %41 = vector.load %arg3[%c0_42, %c0_43, %c0_44, %c20] : memref<1x1x8x1408xbf16, #tpu.memory_space<vmem>>, vector<1x1x8x512xbf16>
    %42 = vector.shape_cast %41 : vector<1x1x8x512xbf16> to vector<8x512xbf16>
    %c6 = arith.constant 6 : index
    %c0_45 = arith.constant 0 : index
    %c0_46 = arith.constant 0 : index
    %43 = vector.load %arg4[%c6, %c0_45, %c0_46] : memref<27x32x8xbf16, #tpu.memory_space<vmem>>, vector<1x32x8xbf16>
    %44 = vector.shape_cast %43 : vector<1x32x8xbf16> to vector<32x8xbf16>
    %cst_47 = arith.constant dense<0.000000e+00> : vector<32x512xf32>
    %45 = tpu.matmul %44, %42, %cst_47 {dimension_numbers = #tpu.dot_dimension_numbers<[1], [0], [0], [1], [0, 0, 1, 1], [], []>} : vector<32x8xbf16>, vector<8x512xbf16>, vector<32x512xf32> -> vector<32x512xf32>
    %46 = arith.addf %40, %45 : vector<32x512xf32>
    %c0_48 = arith.constant 0 : index
    %c0_49 = arith.constant 0 : index
    %c0_50 = arith.constant 0 : index
    %c21 = arith.constant 21 : index
    %47 = vector.load %arg3[%c0_48, %c0_49, %c0_50, %c21] : memref<1x1x8x1408xbf16, #tpu.memory_space<vmem>>, vector<1x1x8x512xbf16>
    %48 = vector.shape_cast %47 : vector<1x1x8x512xbf16> to vector<8x512xbf16>
    %c7 = arith.constant 7 : index
    %c0_51 = arith.constant 0 : index
    %c0_52 = arith.constant 0 : index
    %49 = vector.load %arg4[%c7, %c0_51, %c0_52] : memref<27x32x8xbf16, #tpu.memory_space<vmem>>, vector<1x32x8xbf16>
    %50 = vector.shape_cast %49 : vector<1x32x8xbf16> to vector<32x8xbf16>
    %cst_53 = arith.constant dense<0.000000e+00> : vector<32x512xf32>
    %51 = tpu.matmul %50, %48, %cst_53 {dimension_numbers = #tpu.dot_dimension_numbers<[1], [0], [0], [1], [0, 0, 1, 1], [], []>} : vector<32x8xbf16>, vector<8x512xbf16>, vector<32x512xf32> -> vector<32x512xf32>
    %52 = arith.addf %46, %51 : vector<32x512xf32>
    %c0_54 = arith.constant 0 : index
    %c0_55 = arith.constant 0 : index
    %c0_56 = arith.constant 0 : index
    %c22 = arith.constant 22 : index
    %53 = vector.load %arg3[%c0_54, %c0_55, %c0_56, %c22] : memref<1x1x8x1408xbf16, #tpu.memory_space<vmem>>, vector<1x1x8x512xbf16>
    %54 = vector.shape_cast %53 : vector<1x1x8x512xbf16> to vector<8x512xbf16>
    %c8 = arith.constant 8 : index
    %c0_57 = arith.constant 0 : index
    %c0_58 = arith.constant 0 : index
    %55 = vector.load %arg4[%c8, %c0_57, %c0_58] : memref<27x32x8xbf16, #tpu.memory_space<vmem>>, vector<1x32x8xbf16>
    %56 = vector.shape_cast %55 : vector<1x32x8xbf16> to vector<32x8xbf16>
    %cst_59 = arith.constant dense<0.000000e+00> : vector<32x512xf32>
    %57 = tpu.matmul %56, %54, %cst_59 {dimension_numbers = #tpu.dot_dimension_numbers<[1], [0], [0], [1], [0, 0, 1, 1], [], []>} : vector<32x8xbf16>, vector<8x512xbf16>, vector<32x512xf32> -> vector<32x512xf32>
    %58 = arith.addf %52, %57 : vector<32x512xf32>
    %c0_60 = arith.constant 0 : index
    %c0_61 = arith.constant 0 : index
    %c0_62 = arith.constant 0 : index
    %c128 = arith.constant 128 : index
    %59 = vector.load %arg3[%c0_60, %c0_61, %c0_62, %c128] : memref<1x1x8x1408xbf16, #tpu.memory_space<vmem>>, vector<1x1x8x512xbf16>
    %60 = vector.shape_cast %59 : vector<1x1x8x512xbf16> to vector<8x512xbf16>
    %c9 = arith.constant 9 : index
    %c0_63 = arith.constant 0 : index
    %c0_64 = arith.constant 0 : index
    %61 = vector.load %arg4[%c9, %c0_63, %c0_64] : memref<27x32x8xbf16, #tpu.memory_space<vmem>>, vector<1x32x8xbf16>
    %62 = vector.shape_cast %61 : vector<1x32x8xbf16> to vector<32x8xbf16>
    %cst_65 = arith.constant dense<0.000000e+00> : vector<32x512xf32>
    %63 = tpu.matmul %62, %60, %cst_65 {dimension_numbers = #tpu.dot_dimension_numbers<[1], [0], [0], [1], [0, 0, 1, 1], [], []>} : vector<32x8xbf16>, vector<8x512xbf16>, vector<32x512xf32> -> vector<32x512xf32>
    %64 = arith.addf %58, %63 : vector<32x512xf32>
    %c0_66 = arith.constant 0 : index
    %c0_67 = arith.constant 0 : index
    %c0_68 = arith.constant 0 : index
    %c129 = arith.constant 129 : index
    %65 = vector.load %arg3[%c0_66, %c0_67, %c0_68, %c129] : memref<1x1x8x1408xbf16, #tpu.memory_space<vmem>>, vector<1x1x8x512xbf16>
    %66 = vector.shape_cast %65 : vector<1x1x8x512xbf16> to vector<8x512xbf16>
    %c10_69 = arith.constant 10 : index
    %c0_70 = arith.constant 0 : index
    %c0_71 = arith.constant 0 : index
    %67 = vector.load %arg4[%c10_69, %c0_70, %c0_71] : memref<27x32x8xbf16, #tpu.memory_space<vmem>>, vector<1x32x8xbf16>
    %68 = vector.shape_cast %67 : vector<1x32x8xbf16> to vector<32x8xbf16>
    %cst_72 = arith.constant dense<0.000000e+00> : vector<32x512xf32>
    %69 = tpu.matmul %68, %66, %cst_72 {dimension_numbers = #tpu.dot_dimension_numbers<[1], [0], [0], [1], [0, 0, 1, 1], [], []>} : vector<32x8xbf16>, vector<8x512xbf16>, vector<32x512xf32> -> vector<32x512xf32>
    %70 = arith.addf %64, %69 : vector<32x512xf32>
    %c0_73 = arith.constant 0 : index
    %c0_74 = arith.constant 0 : index
    %c0_75 = arith.constant 0 : index
    %c130 = arith.constant 130 : index
    %71 = vector.load %arg3[%c0_73, %c0_74, %c0_75, %c130] : memref<1x1x8x1408xbf16, #tpu.memory_space<vmem>>, vector<1x1x8x512xbf16>
    %72 = vector.shape_cast %71 : vector<1x1x8x512xbf16> to vector<8x512xbf16>
    %c11_76 = arith.constant 11 : index
    %c0_77 = arith.constant 0 : index
    %c0_78 = arith.constant 0 : index
    %73 = vector.load %arg4[%c11_76, %c0_77, %c0_78] : memref<27x32x8xbf16, #tpu.memory_space<vmem>>, vector<1x32x8xbf16>
    %74 = vector.shape_cast %73 : vector<1x32x8xbf16> to vector<32x8xbf16>
    %cst_79 = arith.constant dense<0.000000e+00> : vector<32x512xf32>
    %75 = tpu.matmul %74, %72, %cst_79 {dimension_numbers = #tpu.dot_dimension_numbers<[1], [0], [0], [1], [0, 0, 1, 1], [], []>} : vector<32x8xbf16>, vector<8x512xbf16>, vector<32x512xf32> -> vector<32x512xf32>
    %76 = arith.addf %70, %75 : vector<32x512xf32>
    %c0_80 = arith.constant 0 : index
    %c0_81 = arith.constant 0 : index
    %c0_82 = arith.constant 0 : index
    %c138 = arith.constant 138 : index
    %77 = vector.load %arg3[%c0_80, %c0_81, %c0_82, %c138] : memref<1x1x8x1408xbf16, #tpu.memory_space<vmem>>, vector<1x1x8x512xbf16>
    %78 = vector.shape_cast %77 : vector<1x1x8x512xbf16> to vector<8x512xbf16>
    %c12_83 = arith.constant 12 : index
    %c0_84 = arith.constant 0 : index
    %c0_85 = arith.constant 0 : index
    %79 = vector.load %arg4[%c12_83, %c0_84, %c0_85] : memref<27x32x8xbf16, #tpu.memory_space<vmem>>, vector<1x32x8xbf16>
    %80 = vector.shape_cast %79 : vector<1x32x8xbf16> to vector<32x8xbf16>
    %cst_86 = arith.constant dense<0.000000e+00> : vector<32x512xf32>
    %81 = tpu.matmul %80, %78, %cst_86 {dimension_numbers = #tpu.dot_dimension_numbers<[1], [0], [0], [1], [0, 0, 1, 1], [], []>} : vector<32x8xbf16>, vector<8x512xbf16>, vector<32x512xf32> -> vector<32x512xf32>
    %82 = arith.addf %76, %81 : vector<32x512xf32>
    %c0_87 = arith.constant 0 : index
    %c0_88 = arith.constant 0 : index
    %c0_89 = arith.constant 0 : index
    %c139 = arith.constant 139 : index
    %83 = vector.load %arg3[%c0_87, %c0_88, %c0_89, %c139] : memref<1x1x8x1408xbf16, #tpu.memory_space<vmem>>, vector<1x1x8x512xbf16>
    %84 = vector.shape_cast %83 : vector<1x1x8x512xbf16> to vector<8x512xbf16>
    %c13 = arith.constant 13 : index
    %c0_90 = arith.constant 0 : index
    %c0_91 = arith.constant 0 : index
    %85 = vector.load %arg4[%c13, %c0_90, %c0_91] : memref<27x32x8xbf16, #tpu.memory_space<vmem>>, vector<1x32x8xbf16>
    %86 = vector.shape_cast %85 : vector<1x32x8xbf16> to vector<32x8xbf16>
    %cst_92 = arith.constant dense<0.000000e+00> : vector<32x512xf32>
    %87 = tpu.matmul %86, %84, %cst_92 {dimension_numbers = #tpu.dot_dimension_numbers<[1], [0], [0], [1], [0, 0, 1, 1], [], []>} : vector<32x8xbf16>, vector<8x512xbf16>, vector<32x512xf32> -> vector<32x512xf32>
    %88 = arith.addf %82, %87 : vector<32x512xf32>
    %c0_93 = arith.constant 0 : index
    %c0_94 = arith.constant 0 : index
    %c0_95 = arith.constant 0 : index
    %c140 = arith.constant 140 : index
    %89 = vector.load %arg3[%c0_93, %c0_94, %c0_95, %c140] : memref<1x1x8x1408xbf16, #tpu.memory_space<vmem>>, vector<1x1x8x512xbf16>
    %90 = vector.shape_cast %89 : vector<1x1x8x512xbf16> to vector<8x512xbf16>
    %c14 = arith.constant 14 : index
    %c0_96 = arith.constant 0 : index
    %c0_97 = arith.constant 0 : index
    %91 = vector.load %arg4[%c14, %c0_96, %c0_97] : memref<27x32x8xbf16, #tpu.memory_space<vmem>>, vector<1x32x8xbf16>
    %92 = vector.shape_cast %91 : vector<1x32x8xbf16> to vector<32x8xbf16>
    %cst_98 = arith.constant dense<0.000000e+00> : vector<32x512xf32>
    %93 = tpu.matmul %92, %90, %cst_98 {dimension_numbers = #tpu.dot_dimension_numbers<[1], [0], [0], [1], [0, 0, 1, 1], [], []>} : vector<32x8xbf16>, vector<8x512xbf16>, vector<32x512xf32> -> vector<32x512xf32>
    %94 = arith.addf %88, %93 : vector<32x512xf32>
    %c0_99 = arith.constant 0 : index
    %c0_100 = arith.constant 0 : index
    %c0_101 = arith.constant 0 : index
    %c148 = arith.constant 148 : index
    %95 = vector.load %arg3[%c0_99, %c0_100, %c0_101, %c148] : memref<1x1x8x1408xbf16, #tpu.memory_space<vmem>>, vector<1x1x8x512xbf16>
    %96 = vector.shape_cast %95 : vector<1x1x8x512xbf16> to vector<8x512xbf16>
    %c15 = arith.constant 15 : index
    %c0_102 = arith.constant 0 : index
    %c0_103 = arith.constant 0 : index
    %97 = vector.load %arg4[%c15, %c0_102, %c0_103] : memref<27x32x8xbf16, #tpu.memory_space<vmem>>, vector<1x32x8xbf16>
    %98 = vector.shape_cast %97 : vector<1x32x8xbf16> to vector<32x8xbf16>
    %cst_104 = arith.constant dense<0.000000e+00> : vector<32x512xf32>
    %99 = tpu.matmul %98, %96, %cst_104 {dimension_numbers = #tpu.dot_dimension_numbers<[1], [0], [0], [1], [0, 0, 1, 1], [], []>} : vector<32x8xbf16>, vector<8x512xbf16>, vector<32x512xf32> -> vector<32x512xf32>
    %100 = arith.addf %94, %99 : vector<32x512xf32>
    %c0_105 = arith.constant 0 : index
    %c0_106 = arith.constant 0 : index
    %c0_107 = arith.constant 0 : index
    %c149 = arith.constant 149 : index
    %101 = vector.load %arg3[%c0_105, %c0_106, %c0_107, %c149] : memref<1x1x8x1408xbf16, #tpu.memory_space<vmem>>, vector<1x1x8x512xbf16>
    %102 = vector.shape_cast %101 : vector<1x1x8x512xbf16> to vector<8x512xbf16>
    %c16 = arith.constant 16 : index
    %c0_108 = arith.constant 0 : index
    %c0_109 = arith.constant 0 : index
    %103 = vector.load %arg4[%c16, %c0_108, %c0_109] : memref<27x32x8xbf16, #tpu.memory_space<vmem>>, vector<1x32x8xbf16>
    %104 = vector.shape_cast %103 : vector<1x32x8xbf16> to vector<32x8xbf16>
    %cst_110 = arith.constant dense<0.000000e+00> : vector<32x512xf32>
    %105 = tpu.matmul %104, %102, %cst_110 {dimension_numbers = #tpu.dot_dimension_numbers<[1], [0], [0], [1], [0, 0, 1, 1], [], []>} : vector<32x8xbf16>, vector<8x512xbf16>, vector<32x512xf32> -> vector<32x512xf32>
    %106 = arith.addf %100, %105 : vector<32x512xf32>
    %c0_111 = arith.constant 0 : index
    %c0_112 = arith.constant 0 : index
    %c0_113 = arith.constant 0 : index
    %c150 = arith.constant 150 : index
    %107 = vector.load %arg3[%c0_111, %c0_112, %c0_113, %c150] : memref<1x1x8x1408xbf16, #tpu.memory_space<vmem>>, vector<1x1x8x512xbf16>
    %108 = vector.shape_cast %107 : vector<1x1x8x512xbf16> to vector<8x512xbf16>
    %c17 = arith.constant 17 : index
    %c0_114 = arith.constant 0 : index
    %c0_115 = arith.constant 0 : index
    %109 = vector.load %arg4[%c17, %c0_114, %c0_115] : memref<27x32x8xbf16, #tpu.memory_space<vmem>>, vector<1x32x8xbf16>
    %110 = vector.shape_cast %109 : vector<1x32x8xbf16> to vector<32x8xbf16>
    %cst_116 = arith.constant dense<0.000000e+00> : vector<32x512xf32>
    %111 = tpu.matmul %110, %108, %cst_116 {dimension_numbers = #tpu.dot_dimension_numbers<[1], [0], [0], [1], [0, 0, 1, 1], [], []>} : vector<32x8xbf16>, vector<8x512xbf16>, vector<32x512xf32> -> vector<32x512xf32>
    %112 = arith.addf %106, %111 : vector<32x512xf32>
    %c0_117 = arith.constant 0 : index
    %c0_118 = arith.constant 0 : index
    %c0_119 = arith.constant 0 : index
    %c256 = arith.constant 256 : index
    %113 = vector.load %arg3[%c0_117, %c0_118, %c0_119, %c256] : memref<1x1x8x1408xbf16, #tpu.memory_space<vmem>>, vector<1x1x8x512xbf16>
    %114 = vector.shape_cast %113 : vector<1x1x8x512xbf16> to vector<8x512xbf16>
    %c18 = arith.constant 18 : index
    %c0_120 = arith.constant 0 : index
    %c0_121 = arith.constant 0 : index
    %115 = vector.load %arg4[%c18, %c0_120, %c0_121] : memref<27x32x8xbf16, #tpu.memory_space<vmem>>, vector<1x32x8xbf16>
    %116 = vector.shape_cast %115 : vector<1x32x8xbf16> to vector<32x8xbf16>
    %cst_122 = arith.constant dense<0.000000e+00> : vector<32x512xf32>
    %117 = tpu.matmul %116, %114, %cst_122 {dimension_numbers = #tpu.dot_dimension_numbers<[1], [0], [0], [1], [0, 0, 1, 1], [], []>} : vector<32x8xbf16>, vector<8x512xbf16>, vector<32x512xf32> -> vector<32x512xf32>
    %118 = arith.addf %112, %117 : vector<32x512xf32>
    %c0_123 = arith.constant 0 : index
    %c0_124 = arith.constant 0 : index
    %c0_125 = arith.constant 0 : index
    %c257 = arith.constant 257 : index
    %119 = vector.load %arg3[%c0_123, %c0_124, %c0_125, %c257] : memref<1x1x8x1408xbf16, #tpu.memory_space<vmem>>, vector<1x1x8x512xbf16>
    %120 = vector.shape_cast %119 : vector<1x1x8x512xbf16> to vector<8x512xbf16>
    %c19 = arith.constant 19 : index
    %c0_126 = arith.constant 0 : index
    %c0_127 = arith.constant 0 : index
    %121 = vector.load %arg4[%c19, %c0_126, %c0_127] : memref<27x32x8xbf16, #tpu.memory_space<vmem>>, vector<1x32x8xbf16>
    %122 = vector.shape_cast %121 : vector<1x32x8xbf16> to vector<32x8xbf16>
    %cst_128 = arith.constant dense<0.000000e+00> : vector<32x512xf32>
    %123 = tpu.matmul %122, %120, %cst_128 {dimension_numbers = #tpu.dot_dimension_numbers<[1], [0], [0], [1], [0, 0, 1, 1], [], []>} : vector<32x8xbf16>, vector<8x512xbf16>, vector<32x512xf32> -> vector<32x512xf32>
    %124 = arith.addf %118, %123 : vector<32x512xf32>
    %c0_129 = arith.constant 0 : index
    %c0_130 = arith.constant 0 : index
    %c0_131 = arith.constant 0 : index
    %c258 = arith.constant 258 : index
    %125 = vector.load %arg3[%c0_129, %c0_130, %c0_131, %c258] : memref<1x1x8x1408xbf16, #tpu.memory_space<vmem>>, vector<1x1x8x512xbf16>
    %126 = vector.shape_cast %125 : vector<1x1x8x512xbf16> to vector<8x512xbf16>
    %c20_132 = arith.constant 20 : index
    %c0_133 = arith.constant 0 : index
    %c0_134 = arith.constant 0 : index
    %127 = vector.load %arg4[%c20_132, %c0_133, %c0_134] : memref<27x32x8xbf16, #tpu.memory_space<vmem>>, vector<1x32x8xbf16>
    %128 = vector.shape_cast %127 : vector<1x32x8xbf16> to vector<32x8xbf16>
    %cst_135 = arith.constant dense<0.000000e+00> : vector<32x512xf32>
    %129 = tpu.matmul %128, %126, %cst_135 {dimension_numbers = #tpu.dot_dimension_numbers<[1], [0], [0], [1], [0, 0, 1, 1], [], []>} : vector<32x8xbf16>, vector<8x512xbf16>, vector<32x512xf32> -> vector<32x512xf32>
    %130 = arith.addf %124, %129 : vector<32x512xf32>
    %c0_136 = arith.constant 0 : index
    %c0_137 = arith.constant 0 : index
    %c0_138 = arith.constant 0 : index
    %c266 = arith.constant 266 : index
    %131 = vector.load %arg3[%c0_136, %c0_137, %c0_138, %c266] : memref<1x1x8x1408xbf16, #tpu.memory_space<vmem>>, vector<1x1x8x512xbf16>
    %132 = vector.shape_cast %131 : vector<1x1x8x512xbf16> to vector<8x512xbf16>
    %c21_139 = arith.constant 21 : index
    %c0_140 = arith.constant 0 : index
    %c0_141 = arith.constant 0 : index
    %133 = vector.load %arg4[%c21_139, %c0_140, %c0_141] : memref<27x32x8xbf16, #tpu.memory_space<vmem>>, vector<1x32x8xbf16>
    %134 = vector.shape_cast %133 : vector<1x32x8xbf16> to vector<32x8xbf16>
    %cst_142 = arith.constant dense<0.000000e+00> : vector<32x512xf32>
    %135 = tpu.matmul %134, %132, %cst_142 {dimension_numbers = #tpu.dot_dimension_numbers<[1], [0], [0], [1], [0, 0, 1, 1], [], []>} : vector<32x8xbf16>, vector<8x512xbf16>, vector<32x512xf32> -> vector<32x512xf32>
    %136 = arith.addf %130, %135 : vector<32x512xf32>
    %c0_143 = arith.constant 0 : index
    %c0_144 = arith.constant 0 : index
    %c0_145 = arith.constant 0 : index
    %c267 = arith.constant 267 : index
    %137 = vector.load %arg3[%c0_143, %c0_144, %c0_145, %c267] : memref<1x1x8x1408xbf16, #tpu.memory_space<vmem>>, vector<1x1x8x512xbf16>
    %138 = vector.shape_cast %137 : vector<1x1x8x512xbf16> to vector<8x512xbf16>
    %c22_146 = arith.constant 22 : index
    %c0_147 = arith.constant 0 : index
    %c0_148 = arith.constant 0 : index
    %139 = vector.load %arg4[%c22_146, %c0_147, %c0_148] : memref<27x32x8xbf16, #tpu.memory_space<vmem>>, vector<1x32x8xbf16>
    %140 = vector.shape_cast %139 : vector<1x32x8xbf16> to vector<32x8xbf16>
    %cst_149 = arith.constant dense<0.000000e+00> : vector<32x512xf32>
    %141 = tpu.matmul %140, %138, %cst_149 {dimension_numbers = #tpu.dot_dimension_numbers<[1], [0], [0], [1], [0, 0, 1, 1], [], []>} : vector<32x8xbf16>, vector<8x512xbf16>, vector<32x512xf32> -> vector<32x512xf32>
    %142 = arith.addf %136, %141 : vector<32x512xf32>
    %c0_150 = arith.constant 0 : index
    %c0_151 = arith.constant 0 : index
    %c0_152 = arith.constant 0 : index
    %c268 = arith.constant 268 : index
    %143 = vector.load %arg3[%c0_150, %c0_151, %c0_152, %c268] : memref<1x1x8x1408xbf16, #tpu.memory_space<vmem>>, vector<1x1x8x512xbf16>
    %144 = vector.shape_cast %143 : vector<1x1x8x512xbf16> to vector<8x512xbf16>
    %c23 = arith.constant 23 : index
    %c0_153 = arith.constant 0 : index
    %c0_154 = arith.constant 0 : index
    %145 = vector.load %arg4[%c23, %c0_153, %c0_154] : memref<27x32x8xbf16, #tpu.memory_space<vmem>>, vector<1x32x8xbf16>
    %146 = vector.shape_cast %145 : vector<1x32x8xbf16> to vector<32x8xbf16>
    %cst_155 = arith.constant dense<0.000000e+00> : vector<32x512xf32>
    %147 = tpu.matmul %146, %144, %cst_155 {dimension_numbers = #tpu.dot_dimension_numbers<[1], [0], [0], [1], [0, 0, 1, 1], [], []>} : vector<32x8xbf16>, vector<8x512xbf16>, vector<32x512xf32> -> vector<32x512xf32>
    %148 = arith.addf %142, %147 : vector<32x512xf32>
    %c0_156 = arith.constant 0 : index
    %c0_157 = arith.constant 0 : index
    %c0_158 = arith.constant 0 : index
    %c276 = arith.constant 276 : index
    %149 = vector.load %arg3[%c0_156, %c0_157, %c0_158, %c276] : memref<1x1x8x1408xbf16, #tpu.memory_space<vmem>>, vector<1x1x8x512xbf16>
    %150 = vector.shape_cast %149 : vector<1x1x8x512xbf16> to vector<8x512xbf16>
    %c24 = arith.constant 24 : index
    %c0_159 = arith.constant 0 : index
    %c0_160 = arith.constant 0 : index
    %151 = vector.load %arg4[%c24, %c0_159, %c0_160] : memref<27x32x8xbf16, #tpu.memory_space<vmem>>, vector<1x32x8xbf16>
    %152 = vector.shape_cast %151 : vector<1x32x8xbf16> to vector<32x8xbf16>
    %cst_161 = arith.constant dense<0.000000e+00> : vector<32x512xf32>
    %153 = tpu.matmul %152, %150, %cst_161 {dimension_numbers = #tpu.dot_dimension_numbers<[1], [0], [0], [1], [0, 0, 1, 1], [], []>} : vector<32x8xbf16>, vector<8x512xbf16>, vector<32x512xf32> -> vector<32x512xf32>
    %154 = arith.addf %148, %153 : vector<32x512xf32>
    %c0_162 = arith.constant 0 : index
    %c0_163 = arith.constant 0 : index
    %c0_164 = arith.constant 0 : index
    %c277 = arith.constant 277 : index
    %155 = vector.load %arg3[%c0_162, %c0_163, %c0_164, %c277] : memref<1x1x8x1408xbf16, #tpu.memory_space<vmem>>, vector<1x1x8x512xbf16>
    %156 = vector.shape_cast %155 : vector<1x1x8x512xbf16> to vector<8x512xbf16>
    %c25 = arith.constant 25 : index
    %c0_165 = arith.constant 0 : index
    %c0_166 = arith.constant 0 : index
    %157 = vector.load %arg4[%c25, %c0_165, %c0_166] : memref<27x32x8xbf16, #tpu.memory_space<vmem>>, vector<1x32x8xbf16>
    %158 = vector.shape_cast %157 : vector<1x32x8xbf16> to vector<32x8xbf16>
    %cst_167 = arith.constant dense<0.000000e+00> : vector<32x512xf32>
    %159 = tpu.matmul %158, %156, %cst_167 {dimension_numbers = #tpu.dot_dimension_numbers<[1], [0], [0], [1], [0, 0, 1, 1], [], []>} : vector<32x8xbf16>, vector<8x512xbf16>, vector<32x512xf32> -> vector<32x512xf32>
    %160 = arith.addf %154, %159 : vector<32x512xf32>
    %c0_168 = arith.constant 0 : index
    %c0_169 = arith.constant 0 : index
    %c0_170 = arith.constant 0 : index
    %c278 = arith.constant 278 : index
    %161 = vector.load %arg3[%c0_168, %c0_169, %c0_170, %c278] : memref<1x1x8x1408xbf16, #tpu.memory_space<vmem>>, vector<1x1x8x512xbf16>
    %162 = vector.shape_cast %161 : vector<1x1x8x512xbf16> to vector<8x512xbf16>
    %c26 = arith.constant 26 : index
    %c0_171 = arith.constant 0 : index
    %c0_172 = arith.constant 0 : index
    %163 = vector.load %arg4[%c26, %c0_171, %c0_172] : memref<27x32x8xbf16, #tpu.memory_space<vmem>>, vector<1x32x8xbf16>
    %164 = vector.shape_cast %163 : vector<1x32x8xbf16> to vector<32x8xbf16>
    %cst_173 = arith.constant dense<0.000000e+00> : vector<32x512xf32>
    %165 = tpu.matmul %164, %162, %cst_173 {dimension_numbers = #tpu.dot_dimension_numbers<[1], [0], [0], [1], [0, 0, 1, 1], [], []>} : vector<32x8xbf16>, vector<8x512xbf16>, vector<32x512xf32> -> vector<32x512xf32>
    %166 = arith.addf %160, %165 : vector<32x512xf32>
    %167 = vector.broadcast %3 : vector<32x1xf32> to vector<32x512xf32>
    %168 = arith.addf %166, %167 : vector<32x512xf32>
    %169 = arith.truncf %168 : vector<32x512xf32> to vector<32x512xbf16>
    %c0_174 = arith.constant 0 : index
    %c0_175 = arith.constant 0 : index
    %c0_176 = arith.constant 0 : index
    %170 = vector.load %arg8[%c0_174, %c0_175, %c0_176] : memref<1x32x1024xbf16, #tpu.memory_space<vmem>>, vector<1x32x512xbf16>
    %171 = vector.shape_cast %170 : vector<1x32x512xbf16> to vector<32x512xbf16>
    %172 = vector.shape_cast %169 : vector<32x512xbf16> to vector<1x32x512xbf16>
    tpu.vector_store %arg8[%c0_174, %c0_175, %c0_176], %172 {strides = array<i32>} : memref<1x32x1024xbf16, #tpu.memory_space<vmem>>, vector<1x32x512xbf16>,
    %c0_177 = arith.constant 0 : index
    %c0_178 = arith.constant 0 : index
    %173 = vector.load %arg2[%c0_177, %c0_178] : memref<1x1024xf32, #tpu.memory_space<vmem>>, vector<1x512xf32>
    %174 = vector.broadcast %173 : vector<1x512xf32> to vector<32x512xf32>
    %175 = arith.mulf %168, %174 : vector<32x512xf32>
    %c0_179 = arith.constant 0 : index
    %c0_180 = arith.constant 0 : index
    %176 = vector.load %arg10[%c0_179, %c0_180] : memref<32x1xf32, #tpu.memory_space<vmem>>, vector<32x1xf32>
    %cst_181 = arith.constant dense<0.000000e+00> : vector<32xf32>
    %177 = vector.multi_reduction <add>, %175, %cst_181 [1] : vector<32x512xf32> to vector<32xf32>
    %178 = vector.shape_cast %177 : vector<32xf32> to vector<32x1xf32>
    %179 = arith.addf %176, %178 : vector<32x1xf32>
    %c0_182 = arith.constant 0 : index
    %c0_183 = arith.constant 0 : index
    %180 = vector.load %arg10[%c0_182, %c0_183] : memref<32x1xf32, #tpu.memory_space<vmem>>, vector<32x1xf32>
    tpu.vector_store %arg10[%c0_182, %c0_183], %179 {strides = array<i32>} : memref<32x1xf32, #tpu.memory_space<vmem>>, vector<32x1xf32>,
    %c0_184 = arith.constant 0 : index
    %c0_185 = arith.constant 0 : index
    %181 = vector.load %arg11[%c0_184, %c0_185] : memref<32x1xf32, #tpu.memory_space<vmem>>, vector<32x1xf32>
    %182 = arith.mulf %175, %168 : vector<32x512xf32>
    %cst_186 = arith.constant dense<0.000000e+00> : vector<32xf32>
    %183 = vector.multi_reduction <add>, %182, %cst_186 [1] : vector<32x512xf32> to vector<32xf32>
    %184 = vector.shape_cast %183 : vector<32xf32> to vector<32x1xf32>
    %185 = arith.addf %181, %184 : vector<32x1xf32>
    %c0_187 = arith.constant 0 : index
    %c0_188 = arith.constant 0 : index
    %186 = vector.load %arg11[%c0_187, %c0_188] : memref<32x1xf32, #tpu.memory_space<vmem>>, vector<32x1xf32>
    tpu.vector_store %arg11[%c0_187, %c0_188], %185 {strides = array<i32>} : memref<32x1xf32, #tpu.memory_space<vmem>>, vector<32x1xf32>,
    %cst_189 = arith.constant 0.000000e+00 : f32
    %187 = vector.broadcast %cst_189 : f32 to vector<32x512xf32>
    %c0_190 = arith.constant 0 : index
    %c0_191 = arith.constant 0 : index
    %c0_192 = arith.constant 0 : index
    %c512 = arith.constant 512 : index
    %188 = vector.load %arg3[%c0_190, %c0_191, %c0_192, %c512] : memref<1x1x8x1408xbf16, #tpu.memory_space<vmem>>, vector<1x1x8x512xbf16>
    %189 = vector.shape_cast %188 : vector<1x1x8x512xbf16> to vector<8x512xbf16>
    %c0_193 = arith.constant 0 : index
    %c0_194 = arith.constant 0 : index
    %c0_195 = arith.constant 0 : index
    %190 = vector.load %arg4[%c0_193, %c0_194, %c0_195] : memref<27x32x8xbf16, #tpu.memory_space<vmem>>, vector<1x32x8xbf16>
    %191 = vector.shape_cast %190 : vector<1x32x8xbf16> to vector<32x8xbf16>
    %cst_196 = arith.constant dense<0.000000e+00> : vector<32x512xf32>
    %192 = tpu.matmul %191, %189, %cst_196 {dimension_numbers = #tpu.dot_dimension_numbers<[1], [0], [0], [1], [0, 0, 1, 1], [], []>} : vector<32x8xbf16>, vector<8x512xbf16>, vector<32x512xf32> -> vector<32x512xf32>
    %193 = arith.addf %187, %192 : vector<32x512xf32>
    %c0_197 = arith.constant 0 : index
    %c0_198 = arith.constant 0 : index
    %c0_199 = arith.constant 0 : index
    %c513 = arith.constant 513 : index
    %194 = vector.load %arg3[%c0_197, %c0_198, %c0_199, %c513] : memref<1x1x8x1408xbf16, #tpu.memory_space<vmem>>, vector<1x1x8x512xbf16>
    %195 = vector.shape_cast %194 : vector<1x1x8x512xbf16> to vector<8x512xbf16>
    %c1_200 = arith.constant 1 : index
    %c0_201 = arith.constant 0 : index
    %c0_202 = arith.constant 0 : index
    %196 = vector.load %arg4[%c1_200, %c0_201, %c0_202] : memref<27x32x8xbf16, #tpu.memory_space<vmem>>, vector<1x32x8xbf16>
    %197 = vector.shape_cast %196 : vector<1x32x8xbf16> to vector<32x8xbf16>
    %cst_203 = arith.constant dense<0.000000e+00> : vector<32x512xf32>
    %198 = tpu.matmul %197, %195, %cst_203 {dimension_numbers = #tpu.dot_dimension_numbers<[1], [0], [0], [1], [0, 0, 1, 1], [], []>} : vector<32x8xbf16>, vector<8x512xbf16>, vector<32x512xf32> -> vector<32x512xf32>
    %199 = arith.addf %193, %198 : vector<32x512xf32>
    %c0_204 = arith.constant 0 : index
    %c0_205 = arith.constant 0 : index
    %c0_206 = arith.constant 0 : index
    %c514 = arith.constant 514 : index
    %200 = vector.load %arg3[%c0_204, %c0_205, %c0_206, %c514] : memref<1x1x8x1408xbf16, #tpu.memory_space<vmem>>, vector<1x1x8x512xbf16>
    %201 = vector.shape_cast %200 : vector<1x1x8x512xbf16> to vector<8x512xbf16>
    %c2_207 = arith.constant 2 : index
    %c0_208 = arith.constant 0 : index
    %c0_209 = arith.constant 0 : index
    %202 = vector.load %arg4[%c2_207, %c0_208, %c0_209] : memref<27x32x8xbf16, #tpu.memory_space<vmem>>, vector<1x32x8xbf16>
    %203 = vector.shape_cast %202 : vector<1x32x8xbf16> to vector<32x8xbf16>
    %cst_210 = arith.constant dense<0.000000e+00> : vector<32x512xf32>
    %204 = tpu.matmul %203, %201, %cst_210 {dimension_numbers = #tpu.dot_dimension_numbers<[1], [0], [0], [1], [0, 0, 1, 1], [], []>} : vector<32x8xbf16>, vector<8x512xbf16>, vector<32x512xf32> -> vector<32x512xf32>
    %205 = arith.addf %199, %204 : vector<32x512xf32>
    %c0_211 = arith.constant 0 : index
    %c0_212 = arith.constant 0 : index
    %c0_213 = arith.constant 0 : index
    %c522 = arith.constant 522 : index
    %206 = vector.load %arg3[%c0_211, %c0_212, %c0_213, %c522] : memref<1x1x8x1408xbf16, #tpu.memory_space<vmem>>, vector<1x1x8x512xbf16>
    %207 = vector.shape_cast %206 : vector<1x1x8x512xbf16> to vector<8x512xbf16>
    %c3_214 = arith.constant 3 : index
    %c0_215 = arith.constant 0 : index
    %c0_216 = arith.constant 0 : index
    %208 = vector.load %arg4[%c3_214, %c0_215, %c0_216] : memref<27x32x8xbf16, #tpu.memory_space<vmem>>, vector<1x32x8xbf16>
    %209 = vector.shape_cast %208 : vector<1x32x8xbf16> to vector<32x8xbf16>
    %cst_217 = arith.constant dense<0.000000e+00> : vector<32x512xf32>
    %210 = tpu.matmul %209, %207, %cst_217 {dimension_numbers = #tpu.dot_dimension_numbers<[1], [0], [0], [1], [0, 0, 1, 1], [], []>} : vector<32x8xbf16>, vector<8x512xbf16>, vector<32x512xf32> -> vector<32x512xf32>
    %211 = arith.addf %205, %210 : vector<32x512xf32>
    %c0_218 = arith.constant 0 : index
    %c0_219 = arith.constant 0 : index
    %c0_220 = arith.constant 0 : index
    %c523 = arith.constant 523 : index
    %212 = vector.load %arg3[%c0_218, %c0_219, %c0_220, %c523] : memref<1x1x8x1408xbf16, #tpu.memory_space<vmem>>, vector<1x1x8x512xbf16>
    %213 = vector.shape_cast %212 : vector<1x1x8x512xbf16> to vector<8x512xbf16>
    %c4_221 = arith.constant 4 : index
    %c0_222 = arith.constant 0 : index
    %c0_223 = arith.constant 0 : index
    %214 = vector.load %arg4[%c4_221, %c0_222, %c0_223] : memref<27x32x8xbf16, #tpu.memory_space<vmem>>, vector<1x32x8xbf16>
    %215 = vector.shape_cast %214 : vector<1x32x8xbf16> to vector<32x8xbf16>
    %cst_224 = arith.constant dense<0.000000e+00> : vector<32x512xf32>
    %216 = tpu.matmul %215, %213, %cst_224 {dimension_numbers = #tpu.dot_dimension_numbers<[1], [0], [0], [1], [0, 0, 1, 1], [], []>} : vector<32x8xbf16>, vector<8x512xbf16>, vector<32x512xf32> -> vector<32x512xf32>
    %217 = arith.addf %211, %216 : vector<32x512xf32>
    %c0_225 = arith.constant 0 : index
    %c0_226 = arith.constant 0 : index
    %c0_227 = arith.constant 0 : index
    %c524 = arith.constant 524 : index
    %218 = vector.load %arg3[%c0_225, %c0_226, %c0_227, %c524] : memref<1x1x8x1408xbf16, #tpu.memory_space<vmem>>, vector<1x1x8x512xbf16>
    %219 = vector.shape_cast %218 : vector<1x1x8x512xbf16> to vector<8x512xbf16>
    %c5_228 = arith.constant 5 : index
    %c0_229 = arith.constant 0 : index
    %c0_230 = arith.constant 0 : index
    %220 = vector.load %arg4[%c5_228, %c0_229, %c0_230] : memref<27x32x8xbf16, #tpu.memory_space<vmem>>, vector<1x32x8xbf16>
    %221 = vector.shape_cast %220 : vector<1x32x8xbf16> to vector<32x8xbf16>
    %cst_231 = arith.constant dense<0.000000e+00> : vector<32x512xf32>
    %222 = tpu.matmul %221, %219, %cst_231 {dimension_numbers = #tpu.dot_dimension_numbers<[1], [0], [0], [1], [0, 0, 1, 1], [], []>} : vector<32x8xbf16>, vector<8x512xbf16>, vector<32x512xf32> -> vector<32x512xf32>
    %223 = arith.addf %217, %222 : vector<32x512xf32>
    %c0_232 = arith.constant 0 : index
    %c0_233 = arith.constant 0 : index
    %c0_234 = arith.constant 0 : index
    %c532 = arith.constant 532 : index
    %224 = vector.load %arg3[%c0_232, %c0_233, %c0_234, %c532] : memref<1x1x8x1408xbf16, #tpu.memory_space<vmem>>, vector<1x1x8x512xbf16>
    %225 = vector.shape_cast %224 : vector<1x1x8x512xbf16> to vector<8x512xbf16>
    %c6_235 = arith.constant 6 : index
    %c0_236 = arith.constant 0 : index
    %c0_237 = arith.constant 0 : index
    %226 = vector.load %arg4[%c6_235, %c0_236, %c0_237] : memref<27x32x8xbf16, #tpu.memory_space<vmem>>, vector<1x32x8xbf16>
    %227 = vector.shape_cast %226 : vector<1x32x8xbf16> to vector<32x8xbf16>
    %cst_238 = arith.constant dense<0.000000e+00> : vector<32x512xf32>
    %228 = tpu.matmul %227, %225, %cst_238 {dimension_numbers = #tpu.dot_dimension_numbers<[1], [0], [0], [1], [0, 0, 1, 1], [], []>} : vector<32x8xbf16>, vector<8x512xbf16>, vector<32x512xf32> -> vector<32x512xf32>
    %229 = arith.addf %223, %228 : vector<32x512xf32>
    %c0_239 = arith.constant 0 : index
    %c0_240 = arith.constant 0 : index
    %c0_241 = arith.constant 0 : index
    %c533 = arith.constant 533 : index
    %230 = vector.load %arg3[%c0_239, %c0_240, %c0_241, %c533] : memref<1x1x8x1408xbf16, #tpu.memory_space<vmem>>, vector<1x1x8x512xbf16>
    %231 = vector.shape_cast %230 : vector<1x1x8x512xbf16> to vector<8x512xbf16>
    %c7_242 = arith.constant 7 : index
    %c0_243 = arith.constant 0 : index
    %c0_244 = arith.constant 0 : index
    %232 = vector.load %arg4[%c7_242, %c0_243, %c0_244] : memref<27x32x8xbf16, #tpu.memory_space<vmem>>, vector<1x32x8xbf16>
    %233 = vector.shape_cast %232 : vector<1x32x8xbf16> to vector<32x8xbf16>
    %cst_245 = arith.constant dense<0.000000e+00> : vector<32x512xf32>
    %234 = tpu.matmul %233, %231, %cst_245 {dimension_numbers = #tpu.dot_dimension_numbers<[1], [0], [0], [1], [0, 0, 1, 1], [], []>} : vector<32x8xbf16>, vector<8x512xbf16>, vector<32x512xf32> -> vector<32x512xf32>
    %235 = arith.addf %229, %234 : vector<32x512xf32>
    %c0_246 = arith.constant 0 : index
    %c0_247 = arith.constant 0 : index
    %c0_248 = arith.constant 0 : index
    %c534 = arith.constant 534 : index
    %236 = vector.load %arg3[%c0_246, %c0_247, %c0_248, %c534] : memref<1x1x8x1408xbf16, #tpu.memory_space<vmem>>, vector<1x1x8x512xbf16>
    %237 = vector.shape_cast %236 : vector<1x1x8x512xbf16> to vector<8x512xbf16>
    %c8_249 = arith.constant 8 : index
    %c0_250 = arith.constant 0 : index
    %c0_251 = arith.constant 0 : index
    %238 = vector.load %arg4[%c8_249, %c0_250, %c0_251] : memref<27x32x8xbf16, #tpu.memory_space<vmem>>, vector<1x32x8xbf16>
    %239 = vector.shape_cast %238 : vector<1x32x8xbf16> to vector<32x8xbf16>
    %cst_252 = arith.constant dense<0.000000e+00> : vector<32x512xf32>
    %240 = tpu.matmul %239, %237, %cst_252 {dimension_numbers = #tpu.dot_dimension_numbers<[1], [0], [0], [1], [0, 0, 1, 1], [], []>} : vector<32x8xbf16>, vector<8x512xbf16>, vector<32x512xf32> -> vector<32x512xf32>
    %241 = arith.addf %235, %240 : vector<32x512xf32>
    %c0_253 = arith.constant 0 : index
    %c0_254 = arith.constant 0 : index
    %c0_255 = arith.constant 0 : index
    %c640 = arith.constant 640 : index
    %242 = vector.load %arg3[%c0_253, %c0_254, %c0_255, %c640] : memref<1x1x8x1408xbf16, #tpu.memory_space<vmem>>, vector<1x1x8x512xbf16>
    %243 = vector.shape_cast %242 : vector<1x1x8x512xbf16> to vector<8x512xbf16>
    %c9_256 = arith.constant 9 : index
    %c0_257 = arith.constant 0 : index
    %c0_258 = arith.constant 0 : index
    %244 = vector.load %arg4[%c9_256, %c0_257, %c0_258] : memref<27x32x8xbf16, #tpu.memory_space<vmem>>, vector<1x32x8xbf16>
    %245 = vector.shape_cast %244 : vector<1x32x8xbf16> to vector<32x8xbf16>
    %cst_259 = arith.constant dense<0.000000e+00> : vector<32x512xf32>
    %246 = tpu.matmul %245, %243, %cst_259 {dimension_numbers = #tpu.dot_dimension_numbers<[1], [0], [0], [1], [0, 0, 1, 1], [], []>} : vector<32x8xbf16>, vector<8x512xbf16>, vector<32x512xf32> -> vector<32x512xf32>
    %247 = arith.addf %241, %246 : vector<32x512xf32>
    %c0_260 = arith.constant 0 : index
    %c0_261 = arith.constant 0 : index
    %c0_262 = arith.constant 0 : index
    %c641 = arith.constant 641 : index
    %248 = vector.load %arg3[%c0_260, %c0_261, %c0_262, %c641] : memref<1x1x8x1408xbf16, #tpu.memory_space<vmem>>, vector<1x1x8x512xbf16>
    %249 = vector.shape_cast %248 : vector<1x1x8x512xbf16> to vector<8x512xbf16>
    %c10_263 = arith.constant 10 : index
    %c0_264 = arith.constant 0 : index
    %c0_265 = arith.constant 0 : index
    %250 = vector.load %arg4[%c10_263, %c0_264, %c0_265] : memref<27x32x8xbf16, #tpu.memory_space<vmem>>, vector<1x32x8xbf16>
    %251 = vector.shape_cast %250 : vector<1x32x8xbf16> to vector<32x8xbf16>
    %cst_266 = arith.constant dense<0.000000e+00> : vector<32x512xf32>
    %252 = tpu.matmul %251, %249, %cst_266 {dimension_numbers = #tpu.dot_dimension_numbers<[1], [0], [0], [1], [0, 0, 1, 1], [], []>} : vector<32x8xbf16>, vector<8x512xbf16>, vector<32x512xf32> -> vector<32x512xf32>
    %253 = arith.addf %247, %252 : vector<32x512xf32>
    %c0_267 = arith.constant 0 : index
    %c0_268 = arith.constant 0 : index
    %c0_269 = arith.constant 0 : index
    %c642 = arith.constant 642 : index
    %254 = vector.load %arg3[%c0_267, %c0_268, %c0_269, %c642] : memref<1x1x8x1408xbf16, #tpu.memory_space<vmem>>, vector<1x1x8x512xbf16>
    %255 = vector.shape_cast %254 : vector<1x1x8x512xbf16> to vector<8x512xbf16>
    %c11_270 = arith.constant 11 : index
    %c0_271 = arith.constant 0 : index
    %c0_272 = arith.constant 0 : index
    %256 = vector.load %arg4[%c11_270, %c0_271, %c0_272] : memref<27x32x8xbf16, #tpu.memory_space<vmem>>, vector<1x32x8xbf16>
    %257 = vector.shape_cast %256 : vector<1x32x8xbf16> to vector<32x8xbf16>
    %cst_273 = arith.constant dense<0.000000e+00> : vector<32x512xf32>
    %258 = tpu.matmul %257, %255, %cst_273 {dimension_numbers = #tpu.dot_dimension_numbers<[1], [0], [0], [1], [0, 0, 1, 1], [], []>} : vector<32x8xbf16>, vector<8x512xbf16>, vector<32x512xf32> -> vector<32x512xf32>
    %259 = arith.addf %253, %258 : vector<32x512xf32>
    %c0_274 = arith.constant 0 : index
    %c0_275 = arith.constant 0 : index
    %c0_276 = arith.constant 0 : index
    %c650 = arith.constant 650 : index
    %260 = vector.load %arg3[%c0_274, %c0_275, %c0_276, %c650] : memref<1x1x8x1408xbf16, #tpu.memory_space<vmem>>, vector<1x1x8x512xbf16>
    %261 = vector.shape_cast %260 : vector<1x1x8x512xbf16> to vector<8x512xbf16>
    %c12_277 = arith.constant 12 : index
    %c0_278 = arith.constant 0 : index
    %c0_279 = arith.constant 0 : index
    %262 = vector.load %arg4[%c12_277, %c0_278, %c0_279] : memref<27x32x8xbf16, #tpu.memory_space<vmem>>, vector<1x32x8xbf16>
    %263 = vector.shape_cast %262 : vector<1x32x8xbf16> to vector<32x8xbf16>
    %cst_280 = arith.constant dense<0.000000e+00> : vector<32x512xf32>
    %264 = tpu.matmul %263, %261, %cst_280 {dimension_numbers = #tpu.dot_dimension_numbers<[1], [0], [0], [1], [0, 0, 1, 1], [], []>} : vector<32x8xbf16>, vector<8x512xbf16>, vector<32x512xf32> -> vector<32x512xf32>
    %265 = arith.addf %259, %264 : vector<32x512xf32>
    %c0_281 = arith.constant 0 : index
    %c0_282 = arith.constant 0 : index
    %c0_283 = arith.constant 0 : index
    %c651 = arith.constant 651 : index
    %266 = vector.load %arg3[%c0_281, %c0_282, %c0_283, %c651] : memref<1x1x8x1408xbf16, #tpu.memory_space<vmem>>, vector<1x1x8x512xbf16>
    %267 = vector.shape_cast %266 : vector<1x1x8x512xbf16> to vector<8x512xbf16>
    %c13_284 = arith.constant 13 : index
    %c0_285 = arith.constant 0 : index
    %c0_286 = arith.constant 0 : index
    %268 = vector.load %arg4[%c13_284, %c0_285, %c0_286] : memref<27x32x8xbf16, #tpu.memory_space<vmem>>, vector<1x32x8xbf16>
    %269 = vector.shape_cast %268 : vector<1x32x8xbf16> to vector<32x8xbf16>
    %cst_287 = arith.constant dense<0.000000e+00> : vector<32x512xf32>
    %270 = tpu.matmul %269, %267, %cst_287 {dimension_numbers = #tpu.dot_dimension_numbers<[1], [0], [0], [1], [0, 0, 1, 1], [], []>} : vector<32x8xbf16>, vector<8x512xbf16>, vector<32x512xf32> -> vector<32x512xf32>
    %271 = arith.addf %265, %270 : vector<32x512xf32>
    %c0_288 = arith.constant 0 : index
    %c0_289 = arith.constant 0 : index
    %c0_290 = arith.constant 0 : index
    %c652 = arith.constant 652 : index
    %272 = vector.load %arg3[%c0_288, %c0_289, %c0_290, %c652] : memref<1x1x8x1408xbf16, #tpu.memory_space<vmem>>, vector<1x1x8x512xbf16>
    %273 = vector.shape_cast %272 : vector<1x1x8x512xbf16> to vector<8x512xbf16>
    %c14_291 = arith.constant 14 : index
    %c0_292 = arith.constant 0 : index
    %c0_293 = arith.constant 0 : index
    %274 = vector.load %arg4[%c14_291, %c0_292, %c0_293] : memref<27x32x8xbf16, #tpu.memory_space<vmem>>, vector<1x32x8xbf16>
    %275 = vector.shape_cast %274 : vector<1x32x8xbf16> to vector<32x8xbf16>
    %cst_294 = arith.constant dense<0.000000e+00> : vector<32x512xf32>
    %276 = tpu.matmul %275, %273, %cst_294 {dimension_numbers = #tpu.dot_dimension_numbers<[1], [0], [0], [1], [0, 0, 1, 1], [], []>} : vector<32x8xbf16>, vector<8x512xbf16>, vector<32x512xf32> -> vector<32x512xf32>
    %277 = arith.addf %271, %276 : vector<32x512xf32>
    %c0_295 = arith.constant 0 : index
    %c0_296 = arith.constant 0 : index
    %c0_297 = arith.constant 0 : index
    %c660 = arith.constant 660 : index
    %278 = vector.load %arg3[%c0_295, %c0_296, %c0_297, %c660] : memref<1x1x8x1408xbf16, #tpu.memory_space<vmem>>, vector<1x1x8x512xbf16>
    %279 = vector.shape_cast %278 : vector<1x1x8x512xbf16> to vector<8x512xbf16>
    %c15_298 = arith.constant 15 : index
    %c0_299 = arith.constant 0 : index
    %c0_300 = arith.constant 0 : index
    %280 = vector.load %arg4[%c15_298, %c0_299, %c0_300] : memref<27x32x8xbf16, #tpu.memory_space<vmem>>, vector<1x32x8xbf16>
    %281 = vector.shape_cast %280 : vector<1x32x8xbf16> to vector<32x8xbf16>
    %cst_301 = arith.constant dense<0.000000e+00> : vector<32x512xf32>
    %282 = tpu.matmul %281, %279, %cst_301 {dimension_numbers = #tpu.dot_dimension_numbers<[1], [0], [0], [1], [0, 0, 1, 1], [], []>} : vector<32x8xbf16>, vector<8x512xbf16>, vector<32x512xf32> -> vector<32x512xf32>
    %283 = arith.addf %277, %282 : vector<32x512xf32>
    %c0_302 = arith.constant 0 : index
    %c0_303 = arith.constant 0 : index
    %c0_304 = arith.constant 0 : index
    %c661 = arith.constant 661 : index
    %284 = vector.load %arg3[%c0_302, %c0_303, %c0_304, %c661] : memref<1x1x8x1408xbf16, #tpu.memory_space<vmem>>, vector<1x1x8x512xbf16>
    %285 = vector.shape_cast %284 : vector<1x1x8x512xbf16> to vector<8x512xbf16>
    %c16_305 = arith.constant 16 : index
    %c0_306 = arith.constant 0 : index
    %c0_307 = arith.constant 0 : index
    %286 = vector.load %arg4[%c16_305, %c0_306, %c0_307] : memref<27x32x8xbf16, #tpu.memory_space<vmem>>, vector<1x32x8xbf16>
    %287 = vector.shape_cast %286 : vector<1x32x8xbf16> to vector<32x8xbf16>
    %cst_308 = arith.constant dense<0.000000e+00> : vector<32x512xf32>
    %288 = tpu.matmul %287, %285, %cst_308 {dimension_numbers = #tpu.dot_dimension_numbers<[1], [0], [0], [1], [0, 0, 1, 1], [], []>} : vector<32x8xbf16>, vector<8x512xbf16>, vector<32x512xf32> -> vector<32x512xf32>
    %289 = arith.addf %283, %288 : vector<32x512xf32>
    %c0_309 = arith.constant 0 : index
    %c0_310 = arith.constant 0 : index
    %c0_311 = arith.constant 0 : index
    %c662 = arith.constant 662 : index
    %290 = vector.load %arg3[%c0_309, %c0_310, %c0_311, %c662] : memref<1x1x8x1408xbf16, #tpu.memory_space<vmem>>, vector<1x1x8x512xbf16>
    %291 = vector.shape_cast %290 : vector<1x1x8x512xbf16> to vector<8x512xbf16>
    %c17_312 = arith.constant 17 : index
    %c0_313 = arith.constant 0 : index
    %c0_314 = arith.constant 0 : index
    %292 = vector.load %arg4[%c17_312, %c0_313, %c0_314] : memref<27x32x8xbf16, #tpu.memory_space<vmem>>, vector<1x32x8xbf16>
    %293 = vector.shape_cast %292 : vector<1x32x8xbf16> to vector<32x8xbf16>
    %cst_315 = arith.constant dense<0.000000e+00> : vector<32x512xf32>
    %294 = tpu.matmul %293, %291, %cst_315 {dimension_numbers = #tpu.dot_dimension_numbers<[1], [0], [0], [1], [0, 0, 1, 1], [], []>} : vector<32x8xbf16>, vector<8x512xbf16>, vector<32x512xf32> -> vector<32x512xf32>
    %295 = arith.addf %289, %294 : vector<32x512xf32>
    %c0_316 = arith.constant 0 : index
    %c0_317 = arith.constant 0 : index
    %c0_318 = arith.constant 0 : index
    %c768 = arith.constant 768 : index
    %296 = vector.load %arg3[%c0_316, %c0_317, %c0_318, %c768] : memref<1x1x8x1408xbf16, #tpu.memory_space<vmem>>, vector<1x1x8x512xbf16>
    %297 = vector.shape_cast %296 : vector<1x1x8x512xbf16> to vector<8x512xbf16>
    %c18_319 = arith.constant 18 : index
    %c0_320 = arith.constant 0 : index
    %c0_321 = arith.constant 0 : index
    %298 = vector.load %arg4[%c18_319, %c0_320, %c0_321] : memref<27x32x8xbf16, #tpu.memory_space<vmem>>, vector<1x32x8xbf16>
    %299 = vector.shape_cast %298 : vector<1x32x8xbf16> to vector<32x8xbf16>
    %cst_322 = arith.constant dense<0.000000e+00> : vector<32x512xf32>
    %300 = tpu.matmul %299, %297, %cst_322 {dimension_numbers = #tpu.dot_dimension_numbers<[1], [0], [0], [1], [0, 0, 1, 1], [], []>} : vector<32x8xbf16>, vector<8x512xbf16>, vector<32x512xf32> -> vector<32x512xf32>
    %301 = arith.addf %295, %300 : vector<32x512xf32>
    %c0_323 = arith.constant 0 : index
    %c0_324 = arith.constant 0 : index
    %c0_325 = arith.constant 0 : index
    %c769 = arith.constant 769 : index
    %302 = vector.load %arg3[%c0_323, %c0_324, %c0_325, %c769] : memref<1x1x8x1408xbf16, #tpu.memory_space<vmem>>, vector<1x1x8x512xbf16>
    %303 = vector.shape_cast %302 : vector<1x1x8x512xbf16> to vector<8x512xbf16>
    %c19_326 = arith.constant 19 : index
    %c0_327 = arith.constant 0 : index
    %c0_328 = arith.constant 0 : index
    %304 = vector.load %arg4[%c19_326, %c0_327, %c0_328] : memref<27x32x8xbf16, #tpu.memory_space<vmem>>, vector<1x32x8xbf16>
    %305 = vector.shape_cast %304 : vector<1x32x8xbf16> to vector<32x8xbf16>
    %cst_329 = arith.constant dense<0.000000e+00> : vector<32x512xf32>
    %306 = tpu.matmul %305, %303, %cst_329 {dimension_numbers = #tpu.dot_dimension_numbers<[1], [0], [0], [1], [0, 0, 1, 1], [], []>} : vector<32x8xbf16>, vector<8x512xbf16>, vector<32x512xf32> -> vector<32x512xf32>
    %307 = arith.addf %301, %306 : vector<32x512xf32>
    %c0_330 = arith.constant 0 : index
    %c0_331 = arith.constant 0 : index
    %c0_332 = arith.constant 0 : index
    %c770 = arith.constant 770 : index
    %308 = vector.load %arg3[%c0_330, %c0_331, %c0_332, %c770] : memref<1x1x8x1408xbf16, #tpu.memory_space<vmem>>, vector<1x1x8x512xbf16>
    %309 = vector.shape_cast %308 : vector<1x1x8x512xbf16> to vector<8x512xbf16>
    %c20_333 = arith.constant 20 : index
    %c0_334 = arith.constant 0 : index
    %c0_335 = arith.constant 0 : index
    %310 = vector.load %arg4[%c20_333, %c0_334, %c0_335] : memref<27x32x8xbf16, #tpu.memory_space<vmem>>, vector<1x32x8xbf16>
    %311 = vector.shape_cast %310 : vector<1x32x8xbf16> to vector<32x8xbf16>
    %cst_336 = arith.constant dense<0.000000e+00> : vector<32x512xf32>
    %312 = tpu.matmul %311, %309, %cst_336 {dimension_numbers = #tpu.dot_dimension_numbers<[1], [0], [0], [1], [0, 0, 1, 1], [], []>} : vector<32x8xbf16>, vector<8x512xbf16>, vector<32x512xf32> -> vector<32x512xf32>
    %313 = arith.addf %307, %312 : vector<32x512xf32>
    %c0_337 = arith.constant 0 : index
    %c0_338 = arith.constant 0 : index
    %c0_339 = arith.constant 0 : index
    %c778 = arith.constant 778 : index
    %314 = vector.load %arg3[%c0_337, %c0_338, %c0_339, %c778] : memref<1x1x8x1408xbf16, #tpu.memory_space<vmem>>, vector<1x1x8x512xbf16>
    %315 = vector.shape_cast %314 : vector<1x1x8x512xbf16> to vector<8x512xbf16>
    %c21_340 = arith.constant 21 : index
    %c0_341 = arith.constant 0 : index
    %c0_342 = arith.constant 0 : index
    %316 = vector.load %arg4[%c21_340, %c0_341, %c0_342] : memref<27x32x8xbf16, #tpu.memory_space<vmem>>, vector<1x32x8xbf16>
    %317 = vector.shape_cast %316 : vector<1x32x8xbf16> to vector<32x8xbf16>
    %cst_343 = arith.constant dense<0.000000e+00> : vector<32x512xf32>
    %318 = tpu.matmul %317, %315, %cst_343 {dimension_numbers = #tpu.dot_dimension_numbers<[1], [0], [0], [1], [0, 0, 1, 1], [], []>} : vector<32x8xbf16>, vector<8x512xbf16>, vector<32x512xf32> -> vector<32x512xf32>
    %319 = arith.addf %313, %318 : vector<32x512xf32>
    %c0_344 = arith.constant 0 : index
    %c0_345 = arith.constant 0 : index
    %c0_346 = arith.constant 0 : index
    %c779 = arith.constant 779 : index
    %320 = vector.load %arg3[%c0_344, %c0_345, %c0_346, %c779] : memref<1x1x8x1408xbf16, #tpu.memory_space<vmem>>, vector<1x1x8x512xbf16>
    %321 = vector.shape_cast %320 : vector<1x1x8x512xbf16> to vector<8x512xbf16>
    %c22_347 = arith.constant 22 : index
    %c0_348 = arith.constant 0 : index
    %c0_349 = arith.constant 0 : index
    %322 = vector.load %arg4[%c22_347, %c0_348, %c0_349] : memref<27x32x8xbf16, #tpu.memory_space<vmem>>, vector<1x32x8xbf16>
    %323 = vector.shape_cast %322 : vector<1x32x8xbf16> to vector<32x8xbf16>
    %cst_350 = arith.constant dense<0.000000e+00> : vector<32x512xf32>
    %324 = tpu.matmul %323, %321, %cst_350 {dimension_numbers = #tpu.dot_dimension_numbers<[1], [0], [0], [1], [0, 0, 1, 1], [], []>} : vector<32x8xbf16>, vector<8x512xbf16>, vector<32x512xf32> -> vector<32x512xf32>
    %325 = arith.addf %319, %324 : vector<32x512xf32>
    %c0_351 = arith.constant 0 : index
    %c0_352 = arith.constant 0 : index
    %c0_353 = arith.constant 0 : index
    %c780 = arith.constant 780 : index
    %326 = vector.load %arg3[%c0_351, %c0_352, %c0_353, %c780] : memref<1x1x8x1408xbf16, #tpu.memory_space<vmem>>, vector<1x1x8x512xbf16>
    %327 = vector.shape_cast %326 : vector<1x1x8x512xbf16> to vector<8x512xbf16>
    %c23_354 = arith.constant 23 : index
    %c0_355 = arith.constant 0 : index
    %c0_356 = arith.constant 0 : index
    %328 = vector.load %arg4[%c23_354, %c0_355, %c0_356] : memref<27x32x8xbf16, #tpu.memory_space<vmem>>, vector<1x32x8xbf16>
    %329 = vector.shape_cast %328 : vector<1x32x8xbf16> to vector<32x8xbf16>
    %cst_357 = arith.constant dense<0.000000e+00> : vector<32x512xf32>
    %330 = tpu.matmul %329, %327, %cst_357 {dimension_numbers = #tpu.dot_dimension_numbers<[1], [0], [0], [1], [0, 0, 1, 1], [], []>} : vector<32x8xbf16>, vector<8x512xbf16>, vector<32x512xf32> -> vector<32x512xf32>
    %331 = arith.addf %325, %330 : vector<32x512xf32>
    %c0_358 = arith.constant 0 : index
    %c0_359 = arith.constant 0 : index
    %c0_360 = arith.constant 0 : index
    %c788 = arith.constant 788 : index
    %332 = vector.load %arg3[%c0_358, %c0_359, %c0_360, %c788] : memref<1x1x8x1408xbf16, #tpu.memory_space<vmem>>, vector<1x1x8x512xbf16>
    %333 = vector.shape_cast %332 : vector<1x1x8x512xbf16> to vector<8x512xbf16>
    %c24_361 = arith.constant 24 : index
    %c0_362 = arith.constant 0 : index
    %c0_363 = arith.constant 0 : index
    %334 = vector.load %arg4[%c24_361, %c0_362, %c0_363] : memref<27x32x8xbf16, #tpu.memory_space<vmem>>, vector<1x32x8xbf16>
    %335 = vector.shape_cast %334 : vector<1x32x8xbf16> to vector<32x8xbf16>
    %cst_364 = arith.constant dense<0.000000e+00> : vector<32x512xf32>
    %336 = tpu.matmul %335, %333, %cst_364 {dimension_numbers = #tpu.dot_dimension_numbers<[1], [0], [0], [1], [0, 0, 1, 1], [], []>} : vector<32x8xbf16>, vector<8x512xbf16>, vector<32x512xf32> -> vector<32x512xf32>
    %337 = arith.addf %331, %336 : vector<32x512xf32>
    %c0_365 = arith.constant 0 : index
    %c0_366 = arith.constant 0 : index
    %c0_367 = arith.constant 0 : index
    %c789 = arith.constant 789 : index
    %338 = vector.load %arg3[%c0_365, %c0_366, %c0_367, %c789] : memref<1x1x8x1408xbf16, #tpu.memory_space<vmem>>, vector<1x1x8x512xbf16>
    %339 = vector.shape_cast %338 : vector<1x1x8x512xbf16> to vector<8x512xbf16>
    %c25_368 = arith.constant 25 : index
    %c0_369 = arith.constant 0 : index
    %c0_370 = arith.constant 0 : index
    %340 = vector.load %arg4[%c25_368, %c0_369, %c0_370] : memref<27x32x8xbf16, #tpu.memory_space<vmem>>, vector<1x32x8xbf16>
    %341 = vector.shape_cast %340 : vector<1x32x8xbf16> to vector<32x8xbf16>
    %cst_371 = arith.constant dense<0.000000e+00> : vector<32x512xf32>
    %342 = tpu.matmul %341, %339, %cst_371 {dimension_numbers = #tpu.dot_dimension_numbers<[1], [0], [0], [1], [0, 0, 1, 1], [], []>} : vector<32x8xbf16>, vector<8x512xbf16>, vector<32x512xf32> -> vector<32x512xf32>
    %343 = arith.addf %337, %342 : vector<32x512xf32>
    %c0_372 = arith.constant 0 : index
    %c0_373 = arith.constant 0 : index
    %c0_374 = arith.constant 0 : index
    %c790 = arith.constant 790 : index
    %344 = vector.load %arg3[%c0_372, %c0_373, %c0_374, %c790] : memref<1x1x8x1408xbf16, #tpu.memory_space<vmem>>, vector<1x1x8x512xbf16>
    %345 = vector.shape_cast %344 : vector<1x1x8x512xbf16> to vector<8x512xbf16>
    %c26_375 = arith.constant 26 : index
    %c0_376 = arith.constant 0 : index
    %c0_377 = arith.constant 0 : index
    %346 = vector.load %arg4[%c26_375, %c0_376, %c0_377] : memref<27x32x8xbf16, #tpu.memory_space<vmem>>, vector<1x32x8xbf16>
    %347 = vector.shape_cast %346 : vector<1x32x8xbf16> to vector<32x8xbf16>
    %cst_378 = arith.constant dense<0.000000e+00> : vector<32x512xf32>
    %348 = tpu.matmul %347, %345, %cst_378 {dimension_numbers = #tpu.dot_dimension_numbers<[1], [0], [0], [1], [0, 0, 1, 1], [], []>} : vector<32x8xbf16>, vector<8x512xbf16>, vector<32x512xf32> -> vector<32x512xf32>
    %349 = arith.addf %343, %348 : vector<32x512xf32>
    %350 = vector.broadcast %3 : vector<32x1xf32> to vector<32x512xf32>
    %351 = arith.addf %349, %350 : vector<32x512xf32>
    %352 = arith.truncf %351 : vector<32x512xf32> to vector<32x512xbf16>
    %c0_379 = arith.constant 0 : index
    %c0_380 = arith.constant 0 : index
    %c512_381 = arith.constant 512 : index
    %353 = vector.load %arg8[%c0_379, %c0_380, %c512_381] : memref<1x32x1024xbf16, #tpu.memory_space<vmem>>, vector<1x32x512xbf16>
    %354 = vector.shape_cast %353 : vector<1x32x512xbf16> to vector<32x512xbf16>
    %355 = vector.shape_cast %352 : vector<32x512xbf16> to vector<1x32x512xbf16>
    tpu.vector_store %arg8[%c0_379, %c0_380, %c512_381], %355 {strides = array<i32>} : memref<1x32x1024xbf16, #tpu.memory_space<vmem>>, vector<1x32x512xbf16>,
    %c0_382 = arith.constant 0 : index
    %c512_383 = arith.constant 512 : index
    %356 = vector.load %arg2[%c0_382, %c512_383] : memref<1x1024xf32, #tpu.memory_space<vmem>>, vector<1x512xf32>
    %357 = vector.broadcast %356 : vector<1x512xf32> to vector<32x512xf32>
    %358 = arith.mulf %351, %357 : vector<32x512xf32>
    %c0_384 = arith.constant 0 : index
    %c0_385 = arith.constant 0 : index
    %359 = vector.load %arg10[%c0_384, %c0_385] : memref<32x1xf32, #tpu.memory_space<vmem>>, vector<32x1xf32>
    %cst_386 = arith.constant dense<0.000000e+00> : vector<32xf32>
    %360 = vector.multi_reduction <add>, %358, %cst_386 [1] : vector<32x512xf32> to vector<32xf32>
    %361 = vector.shape_cast %360 : vector<32xf32> to vector<32x1xf32>
    %362 = arith.addf %359, %361 : vector<32x1xf32>
    %c0_387 = arith.constant 0 : index
    %c0_388 = arith.constant 0 : index
    %363 = vector.load %arg10[%c0_387, %c0_388] : memref<32x1xf32, #tpu.memory_space<vmem>>, vector<32x1xf32>
    tpu.vector_store %arg10[%c0_387, %c0_388], %362 {strides = array<i32>} : memref<32x1xf32, #tpu.memory_space<vmem>>, vector<32x1xf32>,
    %c0_389 = arith.constant 0 : index
    %c0_390 = arith.constant 0 : index
    %364 = vector.load %arg11[%c0_389, %c0_390] : memref<32x1xf32, #tpu.memory_space<vmem>>, vector<32x1xf32>
    %365 = arith.mulf %358, %351 : vector<32x512xf32>
    %cst_391 = arith.constant dense<0.000000e+00> : vector<32xf32>
    %366 = vector.multi_reduction <add>, %365, %cst_391 [1] : vector<32x512xf32> to vector<32xf32>
    %367 = vector.shape_cast %366 : vector<32xf32> to vector<32x1xf32>
    %368 = arith.addf %364, %367 : vector<32x1xf32>
    %c0_392 = arith.constant 0 : index
    %c0_393 = arith.constant 0 : index
    %369 = vector.load %arg11[%c0_392, %c0_393] : memref<32x1xf32, #tpu.memory_space<vmem>>, vector<32x1xf32>
    tpu.vector_store %arg11[%c0_392, %c0_393], %368 {strides = array<i32>} : memref<32x1xf32, #tpu.memory_space<vmem>>, vector<32x1xf32>,
    %c0_i32_394 = arith.constant 0 : i32
    %370 = arith.cmpi eq, %arg1, %c0_i32_394 : i32
    %371 = arith.extui %370 : i1 to i32
    %c0_i32_395 = arith.constant 0 : i32
    %372 = arith.cmpi ne, %371, %c0_i32_395 : i32
    scf.if %372 {
      %c0_396 = arith.constant 0 : index
      %c0_397 = arith.constant 0 : index
      %373 = vector.load %arg10[%c0_396, %c0_397] : memref<32x1xf32, #tpu.memory_space<vmem>>, vector<32x1xf32>
      %cst_398 = arith.constant dense<0.000000e+00> : vector<32xf32>
      %374 = vector.multi_reduction <add>, %373, %cst_398 [1] : vector<32x1xf32> to vector<32xf32>
      %375 = vector.shape_cast %374 : vector<32xf32> to vector<32x1xf32>
      %c0_399 = arith.constant 0 : index
      %c0_400 = arith.constant 0 : index
      %376 = vector.load %arg11[%c0_399, %c0_400] : memref<32x1xf32, #tpu.memory_space<vmem>>, vector<32x1xf32>
      %cst_401 = arith.constant dense<0.000000e+00> : vector<32xf32>
      %377 = vector.multi_reduction <add>, %376, %cst_401 [1] : vector<32x1xf32> to vector<32xf32>
      %378 = vector.shape_cast %377 : vector<32xf32> to vector<32x1xf32>
      %cst_402 = arith.constant 5.120000e+02 : f32
      %379 = vector.broadcast %cst_402 : f32 to vector<32x1xf32>
      %380 = arith.divf %375, %379 : vector<32x1xf32>
      %cst_403 = arith.constant 5.120000e+02 : f32
      %381 = vector.broadcast %cst_403 : f32 to vector<32x1xf32>
      %382 = arith.divf %378, %381 : vector<32x1xf32>
      %383 = arith.mulf %380, %380 : vector<32x1xf32>
      %384 = arith.subf %382, %383 : vector<32x1xf32>
      %cst_404 = arith.constant 0.000000e+00 : f32
      %385 = vector.broadcast %cst_404 : f32 to vector<32x1xf32>
      %386 = arith.maximumf %384, %385 : vector<32x1xf32>
      %cst_405 = arith.constant 9.99999974E-6 : f32
      %387 = vector.broadcast %cst_405 : f32 to vector<32x1xf32>
      %388 = arith.addf %386, %387 : vector<32x1xf32>
      %389 = math.rsqrt %388 : vector<32x1xf32>
      %c0_406 = arith.constant 0 : index
      %c0_407 = arith.constant 0 : index
      %390 = vector.load %arg6[%c0_406, %c0_407] : memref<32x1xf32, #tpu.memory_space<vmem>>, vector<32x1xf32>
      %391 = arith.mulf %390, %389 : vector<32x1xf32>
      %c0_408 = arith.constant 0 : index
      %c0_409 = arith.constant 0 : index
      %392 = vector.load %arg7[%c0_408, %c0_409] : memref<32x1xf32, #tpu.memory_space<vmem>>, vector<32x1xf32>
      %393 = arith.mulf %380, %391 : vector<32x1xf32>
      %394 = arith.subf %392, %393 : vector<32x1xf32>
      %c0_410 = arith.constant 0 : index
      %c0_411 = arith.constant 0 : index
      %c0_412 = arith.constant 0 : index
      %395 = vector.load %arg9[%c0_410, %c0_411, %c0_412] : memref<1x32x2xf32, #tpu.memory_space<vmem>>, vector<1x32x1xf32>
      %396 = vector.shape_cast %395 : vector<1x32x1xf32> to vector<32x1xf32>
      %397 = vector.shape_cast %391 : vector<32x1xf32> to vector<1x32x1xf32>
      tpu.vector_store %arg9[%c0_410, %c0_411, %c0_412], %397 {strides = array<i32>} : memref<1x32x2xf32, #tpu.memory_space<vmem>>, vector<1x32x1xf32>,
      %c0_413 = arith.constant 0 : index
      %c0_414 = arith.constant 0 : index
      %c1_415 = arith.constant 1 : index
      %398 = vector.load %arg9[%c0_413, %c0_414, %c1_415] : memref<1x32x2xf32, #tpu.memory_space<vmem>>, vector<1x32x1xf32>
      %399 = vector.shape_cast %398 : vector<1x32x1xf32> to vector<32x1xf32>
      %400 = vector.shape_cast %394 : vector<32x1xf32> to vector<1x32x1xf32>
      tpu.vector_store %arg9[%c0_413, %c0_414, %c1_415], %400 {strides = array<i32>} : memref<1x32x2xf32, #tpu.memory_space<vmem>>, vector<1x32x1xf32>,
    } else {
    }
    return
  }
  func.func @transform_0(%arg0: i32, %arg1: i32) -> (i32, i32) {
    %c0_i32 = arith.constant 0 : i32
    %c0_i32_0 = arith.constant 0 : i32
    %c0_i32_1 = arith.constant 0 : i32
    return %c0_i32, %c0_i32_0 : i32, i32
  }
  func.func @transform_1(%arg0: i32, %arg1: i32) -> (i32, i32, i32, i32) {
    %c0_i32 = arith.constant 0 : i32
    %c0_i32_0 = arith.constant 0 : i32
    %c0_i32_1 = arith.constant 0 : i32
    return %arg0, %arg1, %c0_i32, %c0_i32_0 : i32, i32, i32, i32
  }
  func.func @transform_2(%arg0: i32, %arg1: i32) -> (i32, i32, i32) {
    %c0_i32 = arith.constant 0 : i32
    %c0_i32_0 = arith.constant 0 : i32
    %c0_i32_1 = arith.constant 0 : i32
    %c0_i32_2 = arith.constant 0 : i32
    return %c0_i32, %c0_i32_0, %c0_i32_1 : i32, i32, i32
  }
  func.func @transform_3(%arg0: i32, %arg1: i32) -> (i32, i32) {
    %c0_i32 = arith.constant 0 : i32
    %c0_i32_0 = arith.constant 0 : i32
    %c0_i32_1 = arith.constant 0 : i32
    return %c0_i32, %c0_i32_0 : i32, i32
  }
  func.func @transform_4(%arg0: i32, %arg1: i32) -> (i32, i32) {
    %c0_i32 = arith.constant 0 : i32
    %c0_i32_0 = arith.constant 0 : i32
    %c0_i32_1 = arith.constant 0 : i32
    return %c0_i32, %c0_i32_0 : i32, i32
  }
  func.func @transform_5(%arg0: i32, %arg1: i32) -> (i32, i32) {
    %c0_i32 = arith.constant 0 : i32
    %c0_i32_0 = arith.constant 0 : i32
    %c0_i32_1 = arith.constant 0 : i32
    return %c0_i32, %c0_i32_0 : i32, i32
  }
  func.func @transform_6(%arg0: i32, %arg1: i32) -> (i32, i32, i32) {
    %c0_i32 = arith.constant 0 : i32
    %c0_i32_0 = arith.constant 0 : i32
    return %arg0, %c0_i32, %arg1 : i32, i32, i32
  }
  func.func @transform_7(%arg0: i32, %arg1: i32) -> (i32, i32, i32) {
    %c0_i32 = arith.constant 0 : i32
    %c0_i32_0 = arith.constant 0 : i32
    %c0_i32_1 = arith.constant 0 : i32
    return %arg0, %c0_i32, %c0_i32_0 : i32, i32, i32
  }
}

module attributes {stable_mosaic.version = 11 : i64} {
  func.func @_norm_silu_kernel(%arg0: i32, %arg1: i32, %arg2: memref<1x32x512xbf16, #tpu.memory_space<vmem>>, %arg3: memref<1x32x2xf32, #tpu.memory_space<vmem>>, %arg4: memref<1x32x512xf32, #tpu.memory_space<vmem>>) attributes {dimension_semantics = [#tpu.dimension_semantics<parallel>, #tpu.dimension_semantics<parallel>], iteration_bounds = array<i64: 2, 1>, scalar_prefetch = 0 : i64, scratch_operands = 0 : i64, tpu.core_type = #tpu.core_type<tc>, window_params = [{transform_indices = @transform_0, window_bounds = array<i64: 1, 32, 512>}, {transform_indices = @transform_1, window_bounds = array<i64: 1, 32, 2>}, {transform_indices = @transform_2, window_bounds = array<i64: 1, 32, 512>}]} {
    %c0 = arith.constant 0 : index
    %c0_0 = arith.constant 0 : index
    %c0_1 = arith.constant 0 : index
    %0 = vector.load %arg3[%c0, %c0_0, %c0_1] : memref<1x32x2xf32, #tpu.memory_space<vmem>>, vector<1x32x1xf32>
    %1 = vector.shape_cast %0 : vector<1x32x1xf32> to vector<32x1xf32>
    %c0_2 = arith.constant 0 : index
    %c0_3 = arith.constant 0 : index
    %c1 = arith.constant 1 : index
    %2 = vector.load %arg3[%c0_2, %c0_3, %c1] : memref<1x32x2xf32, #tpu.memory_space<vmem>>, vector<1x32x1xf32>
    %3 = vector.shape_cast %2 : vector<1x32x1xf32> to vector<32x1xf32>
    %c0_4 = arith.constant 0 : index
    %c0_5 = arith.constant 0 : index
    %c0_6 = arith.constant 0 : index
    %4 = vector.load %arg2[%c0_4, %c0_5, %c0_6] : memref<1x32x512xbf16, #tpu.memory_space<vmem>>, vector<1x32x512xbf16>
    %5 = vector.shape_cast %4 : vector<1x32x512xbf16> to vector<32x512xbf16>
    %6 = arith.extf %5 : vector<32x512xbf16> to vector<32x512xf32>
    %7 = vector.broadcast %1 : vector<32x1xf32> to vector<32x512xf32>
    %8 = arith.mulf %6, %7 : vector<32x512xf32>
    %9 = vector.broadcast %3 : vector<32x1xf32> to vector<32x512xf32>
    %10 = arith.addf %8, %9 : vector<32x512xf32>
    %11 = arith.negf %10 : vector<32x512xf32>
    %12 = math.exp %11 : vector<32x512xf32>
    %cst = arith.constant 1.000000e+00 : f32
    %13 = vector.broadcast %cst : f32 to vector<32x512xf32>
    %14 = arith.addf %13, %12 : vector<32x512xf32>
    %15 = arith.divf %13, %14 : vector<32x512xf32>
    %16 = arith.mulf %10, %15 : vector<32x512xf32>
    %c0_7 = arith.constant 0 : index
    %c0_8 = arith.constant 0 : index
    %c0_9 = arith.constant 0 : index
    %17 = vector.load %arg4[%c0_7, %c0_8, %c0_9] : memref<1x32x512xf32, #tpu.memory_space<vmem>>, vector<1x32x512xf32>
    %18 = vector.shape_cast %17 : vector<1x32x512xf32> to vector<32x512xf32>
    %19 = vector.shape_cast %16 : vector<32x512xf32> to vector<1x32x512xf32>
    tpu.vector_store %arg4[%c0_7, %c0_8, %c0_9], %19 {strides = array<i32>} : memref<1x32x512xf32, #tpu.memory_space<vmem>>, vector<1x32x512xf32>,
    return
  }
  func.func @transform_0(%arg0: i32, %arg1: i32) -> (i32, i32, i32) {
    %c0_i32 = arith.constant 0 : i32
    %c0_i32_0 = arith.constant 0 : i32
    return %arg0, %c0_i32, %arg1 : i32, i32, i32
  }
  func.func @transform_1(%arg0: i32, %arg1: i32) -> (i32, i32, i32) {
    %c0_i32 = arith.constant 0 : i32
    %c0_i32_0 = arith.constant 0 : i32
    %c0_i32_1 = arith.constant 0 : i32
    return %arg0, %c0_i32, %c0_i32_0 : i32, i32, i32
  }
  func.func @transform_2(%arg0: i32, %arg1: i32) -> (i32, i32, i32) {
    %c0_i32 = arith.constant 0 : i32
    %c0_i32_0 = arith.constant 0 : i32
    return %arg0, %c0_i32, %arg1 : i32, i32, i32
  }
}

</mosaic_0001>

<bundles_post_ra>
// kernel: tile.8
= control target key start
LH: loop header
LB: loop body
LE: loop exit
PB: predicated region body
PF: predicated region fallthrough
CT: control target
= control target key end

     0   :  { %s22_s0 = inlined_call_operand.vmem [shape: f32[128], index: 0, kind: input, shape index: {}]   ;;  %s23_s1 = inlined_call_operand.vmem [shape: f32[8,128], index: 1, kind: output, shape index: {}]  }
   0x1   :  { %v4_v0 = vld [vmem:[%s22_s0] ss:$0 sm:$0xff] }
   0x2   :  { %5 = vst [vmem:[%s23_s1] sm:$0xff] %v4_v0 }

// kernel: basic_deconvolution_block.3
= control target key start
LH: loop header
LB: loop body
LE: loop exit
PB: predicated region body
PF: predicated region fallthrough
CT: control target
= control target key end

     0   :  { %s693_s9 = smov 0   ;;  %s695_s10 = smov 0   ;;  %s836_s0 = inlined_call_operand.vmem [shape: bf16[2,32,512], index: 0, kind: input, shape index: {}]   ;;  %s837_s1 = inlined_call_operand.vmem [shape: f32[2,32,2], index: 1, kind: input, shape index: {}]   ;;  %s838_s2 = inlined_call_operand.vmem [shape: f32[2,32,512], index: 2, kind: output, shape index: {}]  }
   0x1   :  { %s697_s11 = smov 0  }
   0x2 LB: > { %s24_s12 = sadd.s32 1, %s670_s10  ;;  %p530_p0 = scmp.ge.s32.totalorder %s674_s11, 1  ;;  %s674_s11 = sphi %s697_s11, %s12_s11   ;;  %s670_s10 = sphi %s695_s10, %s840_s10   ;;  %s666_s9 = sphi %s693_s9, %s839_s9  }
   0x3   : > { %p26_p1 = scmp.ge.s32.totalorder %s24_s12, 2  ;;  %p143_p2 = scmp.lt.s32.totalorder %s674_s11, 3 }
   0x5   : > { %s842_s12 = smov (%p26_p1, %s24_s12), 0  ;;  %p144_p3 = pnand %p530_p0, %p143_p2 }
   0x6   : > { %p179_p4 = scmp.lt.s32.totalorder (!%p144_p3), %s666_s9, 1  ;;  %v676_v0 = vmov (!%p144_p3), 0   ;;  %v677_v5 = vmov (!%p144_p3), 1  }
   0x7   : > { %147 = sbr.rel (%p144_p3) target bundleno = 213 (0xd5), region = 28  ;;  %585 = vset.pattern.permute.xlu1 (!%p144_p3), %v676_v0  ;;  %584 = vset.pattern.permute.xlu0 (!%p144_p3), %v676_v0 }
   0xe   : > { %s844_s9 = smov (!%p179_p4, %s666_s9), 1 }
   0xf   : > { %s556_s13 = sshll.u32 %s844_s9, 5  ;;  %s555_s17 = sshll.u32 %s844_s9, 6 }
  0x10   : > { %s192_s16 = scalar_lea.vmem %s837_s1, %s556_s13  ;;  %s721_s20 = scalar_lea.vmem %s836_s0, %s555_s17 }
  0x11   : > { %v205_v1 = vld [vmem:[%s192_s16 + $0x10] sm:$0xff]  ;;  %v203_v2 = vld [vmem:[%s192_s16] sm:$0xff]  ;;  %v206_v3 = vld [vmem:[%s192_s16 + $0x18] sm:$0xff]  ;;  %s557_s21 = sshll.u32 %s844_s9, 7 }
  0x12   : > { %243 = vperm.xlu1 %585, %v205_v1   ;;  %233 = vperm.xlu0 %584, %v203_v2   ;;  %v204_v4 = vld [vmem:[%s192_s16 + $0x8] sm:$0xff]  ;;  %v209_v8 = vld [vmem:[%s721_s20 + $0x10] sm:$0xff]  ;;  %v210_v9 = vld [vmem:[%s721_s20 + $0x18] sm:$0xff]  ;;  %s792_s24 = scalar_lea.vmem %s838_s2, %s557_s21 }
  0x13   : > { %v207_v10 = vld [vmem:[%s721_s20] sm:$0xff]  ;;  %v208_v11 = vld [vmem:[%s721_s20 + $0x8] sm:$0xff]  ;;  %v219_v14 = vunpack.c.l.bf16 %v209_v8  ;;  %v220_v15 = vunpack.c.h.bf16 %v209_v8  ;;  %v221_v16 = vunpack.c.l.bf16 %v210_v9  ;;  %v222_v17 = vunpack.c.h.bf16 %v210_v9  ;;  %v732_v24 = vld [vmem:[%s721_s20 + $0x30] sm:$0xff] }
  0x14   : > { %v211_v18 = vld [vmem:[%s721_s20 + $0x20] sm:$0xff]  ;;  %v212_v19 = vld [vmem:[%s721_s20 + $0x28] sm:$0xff]  ;;  %v215_v20 = vunpack.c.l.bf16 %v207_v10  ;;  %v216_v21 = vunpack.c.h.bf16 %v207_v10  ;;  %v217_v22 = vunpack.c.l.bf16 %v208_v11  ;;  %v218_v23 = vunpack.c.h.bf16 %v208_v11  ;;  %v214_v9 = vld [vmem:[%s721_s20 + $0x38] sm:$0xff] }
  0x15   : > { %v223_v25 = vunpack.c.l.bf16 %v211_v18  ;;  %v224_v26 = vunpack.c.h.bf16 %v211_v18  ;;  %v225_v27 = vunpack.c.l.bf16 %v212_v19  ;;  %v226_v28 = vunpack.c.h.bf16 %v212_v19 }
  0x16   : > { %248 = vperm.xlu1 %585, %v206_v3   ;;  %238 = vperm.xlu0 %584, %v204_v4   ;;  %v227_v38 = vunpack.c.l.bf16 %v732_v24 }
  0x1a   : > { %587 = vset.pattern.permute.xlu1 %v677_v5  ;;  %586 = vset.pattern.permute.xlu0 %v677_v5 }
  0x1b   : > { %272 = vperm.xlu1 %587, %v204_v4   ;;  %268 = vperm.xlu0 %586, %v203_v2  }
  0x1f   : > { %276 = vperm.xlu1 %587, %v205_v1   ;;  %280 = vperm.xlu0 %586, %v206_v3  }
  0x91   : > { %v244_v6 = vpop.permute.xlu1 %243  ;;  %v234_v7 = vpop.permute.xlu0 %233 }
  0x92   : > { %v251_v33 = vmul.f32 %v234_v7, %v215_v20  ;;  %v252_v34 = vmul.f32 %v234_v7, %v216_v21  ;;  %v253_v35 = vmul.f32 %v234_v7, %v217_v22  ;;  %v254_v43 = vmul.f32 %v234_v7, %v218_v23 }
  0x93   : > { %v259_v46 = vmul.f32 %v244_v6, %v223_v25  ;;  %v260_v54 = vmul.f32 %v244_v6, %v224_v26  ;;  %v261_v56 = vmul.f32 %v244_v6, %v225_v27  ;;  %v262_v59 = vmul.f32 %v244_v6, %v226_v28 }
  0x94   : > { %v230_v20 = vunpack.c.h.bf16 %v214_v9 }
  0x95   : > { %v727_v12 = vpop.permute.xlu1 %248  ;;  %v239_v13 = vpop.permute.xlu0 %238 }
  0x96   : > { %v255_v29 = vmul.f32 %v239_v13, %v219_v14  ;;  %v256_v30 = vmul.f32 %v239_v13, %v220_v15  ;;  %v257_v31 = vmul.f32 %v239_v13, %v221_v16  ;;  %v258_v32 = vmul.f32 %v239_v13, %v222_v17 }
  0x97   : > { %v263_v0 = vmul.f32 %v727_v12, %v227_v38  ;;  %v228_v14 = vunpack.c.h.bf16 %v732_v24  ;;  %v229_v17 = vunpack.c.l.bf16 %v214_v9 }
  0x99   : > { %v264_v26 = vmul.f32 %v727_v12, %v228_v14  ;;  %v265_v24 = vmul.f32 %v727_v12, %v229_v17 }
  0x9a   : > { %v273_v36 = vpop.permute.xlu1 %272  ;;  %v269_v37 = vpop.permute.xlu0 %268 }
  0x9b   : > { %v735_v39 = vadd.f32 %v273_v36, %v255_v29  ;;  %v737_v40 = vadd.f32 %v273_v36, %v256_v30  ;;  %v739_v41 = vadd.f32 %v273_v36, %v257_v31  ;;  %v741_v42 = vadd.f32 %v273_v36, %v258_v32 }
  0x9c   : > { %v743_v44 = vadd.f32 %v269_v37, %v251_v33  ;;  %v745_v45 = vadd.f32 %v269_v37, %v252_v34  ;;  %v750_v50 = vadd.f32 %v269_v37, %v253_v35  ;;  %v753_v52 = vadd.f32 %v269_v37, %v254_v43 }
  0x9d   : > { %v541_v47 = vmul.f32 -1.442695, %v735_v39  ;;  %v542_v48 = vmul.f32 -1.442695, %v737_v40  ;;  %v543_v49 = vmul.f32 -1.442695, %v739_v41  ;;  %v266_v31 = vmul.f32 %v727_v12, %v230_v20 }
  0x9e   : > { %v544_v51 = vmul.f32 -1.442695, %v741_v42  ;;  %v277_v53 = vpop.permute.xlu1 %276  ;;  %v537_v55 = vmul.f32 -1.442695, %v743_v44  ;;  %v538_v58 = vmul.f32 -1.442695, %v745_v45  ;;  %v281_v61 = vpop.permute.xlu0 %280 }
  0x9f   : > { %588 = vpow2.f32 %v541_v47  ;;  %v756_v57 = vadd.f32 %v277_v53, %v259_v46  ;;  %v759_v60 = vadd.f32 %v277_v53, %v260_v54  ;;  %v539_v62 = vmul.f32 -1.442695, %v750_v50 }
  0xa0   : > { %590 = vpow2.f32 %v542_v48  ;;  %v762_v63 = vadd.f32 %v277_v53, %v261_v56  ;;  %v540_v1 = vmul.f32 -1.442695, %v753_v52  ;;  %v766_v2 = vadd.f32 %v277_v53, %v262_v59 }
  0xa1   : > { %592 = vpow2.f32 %v543_v49  ;;  %v545_v3 = vmul.f32 -1.442695, %v756_v57  ;;  %v769_v4 = vadd.f32 %v281_v61, %v263_v0  ;;  %v546_v5 = vmul.f32 -1.442695, %v759_v60 }
  0xa2   : > { %594 = vpow2.f32 %v544_v51  ;;  %v547_v6 = vmul.f32 -1.442695, %v762_v63  ;;  %v548_v7 = vmul.f32 -1.442695, %v766_v2  ;;  %v780_v32 = vadd.f32 %v281_v61, %v264_v26 }
  0xa3   : > { %596 = vpow2.f32 %v537_v55  ;;  %v549_v8 = vmul.f32 -1.442695, %v769_v4  ;;  %v782_v35 = vadd.f32 %v281_v61, %v265_v24  ;;  %v784_v38 = vadd.f32 %v281_v61, %v266_v31 }
  0xa4   : > { %598 = vpow2.f32 %v538_v58  ;;  %v550_v12 = vmul.f32 -1.442695, %v780_v32 }
  0xa5   : > { %600 = vpow2.f32 %v539_v62  ;;  %v551_v53 = vmul.f32 -1.442695, %v782_v35  ;;  %v552_v55 = vmul.f32 -1.442695, %v784_v38 }
  0xa6   : > { %602 = vpow2.f32 %v540_v1 }
  0xa7   : > { %604 = vpow2.f32 %v545_v3 }
  0xa8   : > { %606 = vpow2.f32 %v546_v5 }
  0xa9   : > { %v589_v10 = vpop.eup %588  ;;  %608 = vpow2.f32 %v547_v6 }
  0xaa   : > { %v591_v11 = vpop.eup %590  ;;  %v351_v13 = vadd.f32 1.0, %v589_v10  ;;  %610 = vpow2.f32 %v548_v7 }
  0xab   : > { %v593_v15 = vpop.eup %592  ;;  %v352_v16 = vadd.f32 1.0, %v591_v11  ;;  %612 = vpow2.f32 %v549_v8 }
  0xac   : > { %v595_v18 = vpop.eup %594  ;;  %v353_v19 = vadd.f32 1.0, %v593_v15  ;;  %614 = vrcp.f32 %v351_v13 }
  0xad   : > { %v597_v21 = vpop.eup %596  ;;  %v354_v22 = vadd.f32 1.0, %v595_v18  ;;  %616 = vrcp.f32 %v352_v16 }
  0xae   : > { %v599_v23 = vpop.eup %598  ;;  %618 = vrcp.f32 %v353_v19  ;;  %v347_v25 = vadd.f32 1.0, %v597_v21 }
  0xaf   : > { %v601_v27 = vpop.eup %600  ;;  %620 = vrcp.f32 %v354_v22  ;;  %v348_v28 = vadd.f32 1.0, %v599_v23 }
  0xb0   : > { %v603_v29 = vpop.eup %602  ;;  %v349_v30 = vadd.f32 1.0, %v601_v27  ;;  %622 = vrcp.f32 %v347_v25 }
  0xb1   : > { %v605_v33 = vpop.eup %604  ;;  %v350_v34 = vadd.f32 1.0, %v603_v29  ;;  %624 = vrcp.f32 %v348_v28 }
  0xb2   : > { %v607_v36 = vpop.eup %606  ;;  %626 = vrcp.f32 %v349_v30  ;;  %v355_v37 = vadd.f32 1.0, %v605_v33 }
  0xb3   : > { %v609_v43 = vpop.eup %608  ;;  %628 = vrcp.f32 %v350_v34  ;;  %v356_v46 = vadd.f32 1.0, %v607_v36 }
  0xb4   : > { %v611_v47 = vpop.eup %610  ;;  %v357_v48 = vadd.f32 1.0, %v609_v43  ;;  %630 = vrcp.f32 %v355_v37 }
  0xb5   : > { %v613_v49 = vpop.eup %612  ;;  %v358_v51 = vadd.f32 1.0, %v611_v47  ;;  %632 = vrcp.f32 %v356_v46 }
  0xb6   : > { %v615_v54 = vpop.eup %614  ;;  %634 = vrcp.f32 %v357_v48  ;;  %v359_v59 = vadd.f32 1.0, %v613_v49 }
  0xb7   : > { %v617_v56 = vpop.eup %616  ;;  %v399_v58 = vmul.f32 %v615_v54, %v735_v39  ;;  %636 = vrcp.f32 %v358_v51 }
  0xb8   : > { %v619_v61 = vpop.eup %618  ;;  %v400_v62 = vmul.f32 %v617_v56, %v737_v40  ;;  %638 = vpow2.f32 %v550_v12 }
  0xb9   : > { %v621_v0 = vpop.eup %620  ;;  %v401_v1 = vmul.f32 %v619_v61, %v739_v41  ;;  %415 = vst [vmem:[%s792_s24 + $0x20] sm:$0xff] %v399_v58  ;;  %640 = vpow2.f32 %v551_v53 }
  0xba   : > { %v623_v3 = vpop.eup %622  ;;  %v402_v5 = vmul.f32 %v621_v0, %v741_v42  ;;  %416 = vst [vmem:[%s792_s24 + $0x28] sm:$0xff] %v400_v62  ;;  %642 = vpow2.f32 %v552_v55 }
  0xbb   : > { %v625_v39 = vpop.eup %624  ;;  %417 = vst [vmem:[%s792_s24 + $0x30] sm:$0xff] %v401_v1  ;;  %v395_v6 = vmul.f32 %v623_v3, %v743_v44  ;;  %644 = vrcp.f32 %v359_v59 }
  0xbc   : > { %v627_v40 = vpop.eup %626  ;;  %418 = vst [vmem:[%s792_s24 + $0x38] sm:$0xff] %v402_v5  ;;  %v396_v41 = vmul.f32 %v625_v39, %v745_v45 }
  0xbd   : > { %v629_v7 = vpop.eup %628  ;;  %v397_v8 = vmul.f32 %v627_v40, %v750_v50  ;;  %411 = vst [vmem:[%s792_s24] sm:$0xff] %v395_v6 }
  0xbe   : > { %v631_v42 = vpop.eup %630  ;;  %v398_v9 = vmul.f32 %v629_v7, %v753_v52  ;;  %412 = vst [vmem:[%s792_s24 + $0x8] sm:$0xff] %v396_v41 }
  0xbf   : > { %v633_v10 = vpop.eup %632  ;;  %413 = vst [vmem:[%s792_s24 + $0x10] sm:$0xff] %v397_v8  ;;  %v403_v44 = vmul.f32 %v631_v42, %v756_v57 }
  0xc0   : > { %v635_v11 = vpop.eup %634  ;;  %414 = vst [vmem:[%s792_s24 + $0x18] sm:$0xff] %v398_v9  ;;  %v404_v13 = vmul.f32 %v633_v10, %v759_v60 }
  0xc1   : > { %v637_v45 = vpop.eup %636  ;;  %v405_v14 = vmul.f32 %v635_v11, %v762_v63  ;;  %419 = vst [vmem:[%s792_s24 + $0x40] sm:$0xff] %v403_v44 }
  0xc2   : > { %v639_v50 = vpop.eup %638  ;;  %v406_v15 = vmul.f32 %v637_v45, %v766_v2  ;;  %420 = vst [vmem:[%s792_s24 + $0x48] sm:$0xff] %v404_v13 }
  0xc3   : > { %v641_v52 = vpop.eup %640  ;;  %421 = vst [vmem:[%s792_s24 + $0x50] sm:$0xff] %v405_v14  ;;  %v360_v16 = vadd.f32 1.0, %v639_v50 }
  0xc4   : > { %v643_v17 = vpop.eup %642  ;;  %422 = vst [vmem:[%s792_s24 + $0x58] sm:$0xff] %v406_v15  ;;  %v361_v57 = vadd.f32 1.0, %v641_v52 }
  0xc5   : > { %v645_v18 = vpop.eup %644  ;;  %v362_v60 = vadd.f32 1.0, %v643_v17  ;;  %646 = vrcp.f32 %v360_v16 }
  0xc6   : > { %648 = vrcp.f32 %v361_v57  ;;  %v407_v63 = vmul.f32 %v645_v18, %v769_v4 }
  0xc7   : > { %650 = vrcp.f32 %v362_v60 }
  0xc8   : > { %423 = vst [vmem:[%s792_s24 + $0x60] sm:$0xff] %v407_v63 }
  0xcf   : > { %v647_v19 = vpop.eup %646 }
  0xd0   : > { %v649_v2 = vpop.eup %648  ;;  %v408_v20 = vmul.f32 %v647_v19, %v780_v32 }
  0xd1   : > { %v651_v21 = vpop.eup %650  ;;  %v409_v22 = vmul.f32 %v649_v2, %v782_v35 }
  0xd2   : > { %v410_v23 = vmul.f32 %v651_v21, %v784_v38  ;;  %424 = vst [vmem:[%s792_s24 + $0x68] sm:$0xff] %v408_v20 }
  0xd3   : > { %425 = vst [vmem:[%s792_s24 + $0x70] sm:$0xff] %v409_v22 }
  0xd4   : > { %426 = vst [vmem:[%s792_s24 + $0x78] sm:$0xff] %v410_v23 }
  0xd5 PF: > { %s12_s11 = sadd.s32 1, %s674_s11   ;;  %s839_s9 = smov %s670_s10 }
  0xd6   : > { %p9_p5 = scmp.ge.s32.totalorder %s12_s11, 4   ;;  %s840_s10 = smov %s842_s12 }
  0xd8   :  { %11 = sbr.rel (!%p9_p5) target bundleno = 2 (0x2), region = 61 }

// kernel: basic_deconvolution_block.2
= control target key start
LH: loop header
LB: loop body
LE: loop exit
PB: predicated region body
PF: predicated region fallthrough
CT: control target
= control target key end

     0   :  { %s11895_s24 = smov 0   ;;  %s11897_s25 = smov 0   ;;  %s14572_s0 = inlined_call_operand.vmem [shape: f32[1,1024], index: 0, kind: input, shape index: {}]   ;;  %s14573_s1 = inlined_call_operand.vmem [shape: bf16[2,1,8,1408], index: 1, kind: input, shape index: {}]   ;;  %s14574_s2 = inlined_call_operand.vmem [shape: bf16[27,32,8], index: 2, kind: input, shape index: {}]   ;;  %s14575_s3 = inlined_call_operand.vmem [shape: f32[32,1], index: 3, kind: input, shape index: {}]   ;;  %s14576_s4 = inlined_call_operand.vmem [shape: f32[32,1], index: 4, kind: input, shape index: {}]   ;;  %s14577_s5 = inlined_call_operand.vmem [shape: f32[32,1], index: 5, kind: input, shape index: {}]   ;;  %s14578_s6 = inlined_call_operand.vmem [shape: bf16[2,32,1024], index: 6, kind: output, shape index: {0}]   ;;  %s14579_s7 = inlined_call_operand.vmem [shape: f32[2,32,2], index: 7, kind: output, shape index: {1}]  }
   0x1   :  { %s11899_s26 = smov 0  }
   0x2 LB: > { %s30_s27 = sadd.s32 1, %s11838_s25  ;;  %p10072_p0 = scmp.ge.s32.totalorder %s11842_s26, 1  ;;  %s11842_s26 = sphi %s11899_s26, %s18_s26   ;;  %s11838_s25 = sphi %s11897_s25, %s14692_s25   ;;  %s11834_s24 = sphi %s11895_s24, %s14691_s24  }
   0x3   : > { %p32_p1 = scmp.ge.s32.totalorder %s30_s27, 2  ;;  %p260_p2 = scmp.lt.s32.totalorder %s11842_s26, 3 }
   0x5   : > { %s14694_s27 = smov (%p32_p1, %s30_s27), 0  ;;  %p261_p3 = pnand %p10072_p0, %p260_p2 }
   0x7   : > { %264 = sbr.rel (%p261_p3) target bundleno = 1534 (0x5fe), region = 44 }
   0xe   : > { %p305_p4 = scmp.lt.s32.totalorder %s11834_s24, 1  ;;  %v14598_v0 = vmov 0   ;;  %s11845_s9 = smov 127   ;;  %vm392_vm0 = vcmask 1039360   ;;  %vm404_vm1 = vcmask 1043456   ;;  %v11675_v22 = vld [vmem:[%s14574_s2 + $0x10] sm:$0xff]  }
   0xf   : > { %449 = vmatprep.mubr.bf16.mxu0 %v14598_v0  ;;  %502 = vmatprep.mubr.bf16.mxu1 %v14598_v0  ;;  %s11846_s10 = smov 126   ;;  %s11847_s11 = smov 118   ;;  %vm397_vm2 = vcmask 64512   ;;  %vm682_vm3 = vcmask 1031168   ;;  %v11676_v33 = vld [vmem:[%s14574_s2 + $0x18] sm:$0xff]   ;;  %v11677_v40 = vld [vmem:[%s14574_s2] sm:$0xff]  }
  0x10   : > { %s14696_s24 = smov (!%p305_p4, %s11834_s24), 1  ;;  %11668 = vset.pattern.permute.xlu0 %v14598_v0  ;;  %11669 = vset.pattern.permute.xlu1 %v14598_v0  ;;  %s11848_s12 = smov 117   ;;  %vm852_vm4 = vcmask 965632   ;;  %v11680_v50 = vld [vmem:[%s14574_s2 + $0x8] sm:$0xff]   ;;  %v11684_v56 = vld [vmem:[%s14574_s2 + $0x20] sm:$0xff]   ;;  %vm1022_vm5 = vcmask 957440  }
  0x11   : > { %s11632_s28 = smul.u32 44, %s14696_s24  ;;  %s11849_s13 = smov 116   ;;  %vm1192_vm6 = vcmask 949248   ;;  %vm1362_vm7 = vcmask 883712   ;;  %vm1532_vm8 = vcmask 875520   ;;  %vm1702_vm9 = vcmask 867328  }
  0x12   : > { %s11850_s14 = smov 108   ;;  %s11851_s15 = smov 107   ;;  %vm334_vm10 = vcmask 7168   ;;  %vm9940_vm11 = vcmask 15368  }
  0x13   : > { %s11921_s8 = scalar_lea.vmem %s14573_s1, %s11632_s28  ;;  %s11852_s16 = smov 106  }
  0x14   : > { %v348_v1 = vld [vmem:[%s11921_s8 + $0x8] sm:$0xff]  ;;  %v347_v2 = vld [vmem:[%s11921_s8] sm:$0xff]  ;;  %v11674_v7 = vld [vmem:[%s11921_s8 + $0x10] ss:$0 sps:$4 sm:$0xff]   ;;  %s10782_s29 = sshll.u32 %s14696_s24, 7 }
  0x15   : > { %v11927_v3 = vcombine.low %v348_v1, %v348_v1  ;;  %v11929_v4 = vcombine.low %v347_v2, %v347_v2  ;;  %v11935_v5 = vcombine.high %v348_v1, %v348_v1  ;;  %v11937_v6 = vcombine.high %v347_v2, %v347_v2  ;;  %v2014_v8 = vld [vmem:[%s11921_s8 + $0x4] sm:$0xff]  ;;  %v2015_v9 = vld [vmem:[%s11921_s8 + $0xc] sm:$0xff]  ;;  %v12027_v14 = vld [vmem:[%s11921_s8 + $0x14] ss:$0 sps:$4 sm:$0xff]   ;;  %s14084_s17 = scalar_lea.vmem %s14578_s6, %s10782_s29 }
  0x16   : > { %v12010_v10 = vcombine.low %v2014_v8, %v2014_v8  ;;  %v12012_v11 = vcombine.high %v2014_v8, %v2014_v8  ;;  %v12018_v12 = vcombine.low %v2015_v9, %v2015_v9  ;;  %v12020_v13 = vcombine.high %v2015_v9, %v2015_v9  ;;  %v3550_v8 = vld [vmem:[%s11921_s8 + $0x10] sm:$0xff] }
  0x17   : > { %386 = vrot.lane.b32.xlu1 %v11927_v3, %s11845_s9  ;;  %382 = vrot.lane.b32.xlu0 %v11929_v4, %s11845_s9  ;;  %v540_v25 = vsel %vm404_vm1, %v11929_v4, 0  ;;  %v546_v29 = vsel %vm404_vm1, %v11927_v3, 0  ;;  %v12192_v9 = vcombine.low %v3550_v8, %v3550_v8 }
  0x1b   : > { %388 = vrot.lane.b32.xlu1 %v11935_v5, %s11845_s9  ;;  %384 = vrot.lane.b32.xlu0 %v11937_v6, %s11845_s9 }
  0x1f   : > { %390 = vrot.lane.b32.xlu0 %v11674_v7, %s11845_s9  ;;  %672 = vrot.lane.b32.xlu1 %v11929_v4, %s11846_s10 }
  0x23   : > { %674 = vrot.lane.b32.xlu0 %v11937_v6, %s11846_s10  ;;  %676 = vrot.lane.b32.xlu1 %v11927_v3, %s11846_s10 }
  0x27   : > { %678 = vrot.lane.b32.xlu0 %v11935_v5, %s11846_s10  ;;  %680 = vrot.lane.b32.xlu1 %v11674_v7, %s11846_s10 }
  0x2b   : > { %842 = vrot.lane.b32.xlu0 %v11929_v4, %s11847_s11  ;;  %844 = vrot.lane.b32.xlu1 %v11937_v6, %s11847_s11 }
  0x2f   : > { %846 = vrot.lane.b32.xlu0 %v11927_v3, %s11847_s11  ;;  %848 = vrot.lane.b32.xlu1 %v11935_v5, %s11847_s11 }
  0x33   : > { %850 = vrot.lane.b32.xlu0 %v11674_v7, %s11847_s11  ;;  %1012 = vrot.lane.b32.xlu1 %v11929_v4, %s11848_s12 }
  0x37   : > { %1014 = vrot.lane.b32.xlu0 %v11937_v6, %s11848_s12  ;;  %1016 = vrot.lane.b32.xlu1 %v11927_v3, %s11848_s12 }
  0x3b   : > { %1018 = vrot.lane.b32.xlu0 %v11935_v5, %s11848_s12  ;;  %1020 = vrot.lane.b32.xlu1 %v11674_v7, %s11848_s12 }
  0x3f   : > { %1182 = vrot.lane.b32.xlu0 %v11929_v4, %s11849_s13  ;;  %1184 = vrot.lane.b32.xlu1 %v11937_v6, %s11849_s13 }
  0x43   : > { %1186 = vrot.lane.b32.xlu0 %v11927_v3, %s11849_s13  ;;  %1188 = vrot.lane.b32.xlu1 %v11935_v5, %s11849_s13 }
  0x47   : > { %1190 = vrot.lane.b32.xlu0 %v11674_v7, %s11849_s13  ;;  %1352 = vrot.lane.b32.xlu1 %v11929_v4, %s11850_s14 }
  0x4b   : > { %1354 = vrot.lane.b32.xlu0 %v11937_v6, %s11850_s14  ;;  %1356 = vrot.lane.b32.xlu1 %v11927_v3, %s11850_s14 }
  0x4f   : > { %1358 = vrot.lane.b32.xlu0 %v11935_v5, %s11850_s14  ;;  %1360 = vrot.lane.b32.xlu1 %v11674_v7, %s11850_s14 }
  0x53   : > { %1522 = vrot.lane.b32.xlu0 %v11929_v4, %s11851_s15  ;;  %1524 = vrot.lane.b32.xlu1 %v11937_v6, %s11851_s15 }
  0x57   : > { %1526 = vrot.lane.b32.xlu0 %v11927_v3, %s11851_s15  ;;  %1528 = vrot.lane.b32.xlu1 %v11935_v5, %s11851_s15 }
  0x5b   : > { %1530 = vrot.lane.b32.xlu0 %v11674_v7, %s11851_s15  ;;  %1692 = vrot.lane.b32.xlu1 %v11929_v4, %s11852_s16  ;;  %v11685_v4 = vld [vmem:[%s14574_s2 + $0x28] sm:$0xff]  }
  0x5f   : > { %1694 = vrot.lane.b32.xlu0 %v11937_v6, %s11852_s16  ;;  %1696 = vrot.lane.b32.xlu1 %v11927_v3, %s11852_s16 }
  0x63   : > { %1698 = vrot.lane.b32.xlu0 %v11935_v5, %s11852_s16  ;;  %1700 = vrot.lane.b32.xlu1 %v11674_v7, %s11852_s16 }
  0x67   : > { %2045 = vrot.lane.b32.xlu0 %v12010_v10, %s11845_s9  ;;  %2047 = vrot.lane.b32.xlu1 %v12012_v11, %s11845_s9 }
  0x6b   : > { %2049 = vrot.lane.b32.xlu0 %v12018_v12, %s11845_s9  ;;  %2051 = vrot.lane.b32.xlu1 %v12020_v13, %s11845_s9 }
  0x6f   : > { %2053 = vrot.lane.b32.xlu0 %v12027_v14, %s11845_s9  ;;  %2214 = vrot.lane.b32.xlu1 %v12010_v10, %s11846_s10 }
  0x73   : > { %2216 = vrot.lane.b32.xlu0 %v12012_v11, %s11846_s10  ;;  %2218 = vrot.lane.b32.xlu1 %v12018_v12, %s11846_s10 }
  0x77   : > { %2220 = vrot.lane.b32.xlu0 %v12020_v13, %s11846_s10  ;;  %2222 = vrot.lane.b32.xlu1 %v12027_v14, %s11846_s10 }
  0x7b   : > { %2383 = vrot.lane.b32.xlu0 %v12010_v10, %s11847_s11  ;;  %2385 = vrot.lane.b32.xlu1 %v12012_v11, %s11847_s11 }
  0x7f   : > { %2387 = vrot.lane.b32.xlu0 %v12018_v12, %s11847_s11  ;;  %2389 = vrot.lane.b32.xlu1 %v12020_v13, %s11847_s11 }
  0x83   : > { %2391 = vrot.lane.b32.xlu0 %v12027_v14, %s11847_s11  ;;  %2552 = vrot.lane.b32.xlu1 %v12010_v10, %s11848_s12 }
  0x87   : > { %2554 = vrot.lane.b32.xlu0 %v12012_v11, %s11848_s12  ;;  %2556 = vrot.lane.b32.xlu1 %v12018_v12, %s11848_s12 }
  0x89   : > { %v387_v15 = vpop.permute.xlu1 %386  ;;  %v383_v16 = vpop.permute.xlu0 %382 }
  0x8b   : > { %2558 = vrot.lane.b32.xlu0 %v12020_v13, %s11848_s12  ;;  %2560 = vrot.lane.b32.xlu1 %v12027_v14, %s11848_s12 }
  0x8d   : > { %v389_v17 = vpop.permute.xlu1 %388  ;;  %v385_v18 = vpop.permute.xlu0 %384 }
  0x8e   : > { %v394_v19 = vsel %vm392_vm0, %v385_v18, %v387_v15  ;;  %v393_v20 = vsel %vm392_vm0, %v383_v16, %v385_v18  ;;  %v395_v23 = vsel %vm392_vm0, %v387_v15, %v389_v17  ;;  %v11686_v18 = vld [vmem:[%s14574_s2 + $0x30] sm:$0xff]  }
  0x8f   : > { %10089 = vmatprep.subr.msk.bf16.mxu0 %vm404_vm1, %v394_v19  ;;  %v406_v21 = vsel %vm404_vm1, %v393_v20, 0  ;;  %2721 = vrot.lane.b32.xlu0 %v12010_v10, %s11849_s13  ;;  %v412_v28 = vsel %vm404_vm1, %v395_v23, 0  ;;  %v12210_v19 = vld [vmem:[%s11921_s8 + $0x18] ss:$0 sps:$4 sm:$0xff]  }
  0x90   : > { %418 = vmatpush1.bf16.msra.mxu0 %v406_v21  ;;  %2723 = vrot.lane.b32.xlu1 %v12012_v11, %s11849_s13 }
  0x91   : > { %v391_v24 = vpop.permute.xlu0 %390  ;;  %10097 = vmatprep.subr.msk.bf16.mxu0 %vm404_vm1, %v11937_v6  ;;  %v673_v26 = vpop.permute.xlu1 %672 }
  0x92   : > { %v396_v27 = vsel %vm392_vm0, %v389_v17, %v391_v24 }
  0x93   : > { %10090 = vmatmul.mubr.msk.bf16.vlgmr.msra.gmra.mrb[0].mxu0 %vm397_vm2, %v11675_v22  ;;  %10092 = vmatprep.subr.msk.bf16.mxu1 %vm404_vm1, %v396_v27 }
  0x94   : > { %471 = vmatpush1.bf16.msra.mxu1 %v412_v28  ;;  %552 = vmatpush1.bf16.msra.mxu0 %v540_v25 }
  0x95   : > { %10100 = vmatprep.subr.msk.bf16.mxu1 %vm404_vm1, %v11935_v5  ;;  %459 = vmatprep.mubr.bf16.mxu0 %v14598_v0  ;;  %v675_v30 = vpop.permute.xlu0 %674  ;;  %v677_v31 = vpop.permute.xlu1 %676 }
  0x96   : > { %v684_v32 = vsel %vm682_vm3, %v675_v30, %v677_v31  ;;  %2725 = vrot.lane.b32.xlu0 %v12018_v12, %s11849_s13  ;;  %2727 = vrot.lane.b32.xlu1 %v12020_v13, %s11849_s13  ;;  %v683_v39 = vsel %vm682_vm3, %v673_v26, %v675_v30 }
  0x97   : > { %10093 = vmatmul.mubr.msk.bf16.vlgmr.msra.gmra.mrb[0].mxu1 %vm397_vm2, %v11675_v22  ;;  %10109 = vmatprep.subr.msk.bf16.mxu0 %vm404_vm1, %v684_v32  ;;  %v694_v41 = vsel %vm404_vm1, %v683_v39, 0 }
  0x98   : > { %605 = vmatpush1.bf16.msra.mxu1 %v546_v29  ;;  %512 = vmatprep.mubr.bf16.mxu1 %v14598_v0  ;;  %v11687_v29 = vld [vmem:[%s14574_s2 + $0x38] sm:$0xff]  }
  0x99   : > { %v679_v34 = vpop.permute.xlu0 %678  ;;  %v681_v35 = vpop.permute.xlu1 %680 }
  0x9a   : > { %v686_v36 = vsel %vm682_vm3, %v679_v34, %v681_v35  ;;  %2729 = vrot.lane.b32.xlu0 %v12027_v14, %s11849_s13  ;;  %2890 = vrot.lane.b32.xlu1 %v12010_v10, %s11850_s14  ;;  %v685_v44 = vsel %vm682_vm3, %v677_v31, %v679_v34  ;;  %v11688_v35 = vld [vmem:[%s14574_s2 + $0x40] sm:$0xff]  }
  0x9b   : > { %10091 = vmatmul.mubr.msk.bf16.gmra.mrb[4].mxu0 %vm397_vm2, %v11676_v33  ;;  %10112 = vmatprep.subr.msk.bf16.mxu1 %vm404_vm1, %v686_v36  ;;  %v700_v46 = vsel %vm404_vm1, %v685_v44, 0 }
  0x9c   : > { %583 = vmatprep.mubr.bf16.mxu0 %v14598_v0 }
  0x9d   : > { %v843_v37 = vpop.permute.xlu0 %842  ;;  %v845_v38 = vpop.permute.xlu1 %844 }
  0x9e   : > { %2892 = vrot.lane.b32.xlu0 %v12012_v11, %s11850_s14  ;;  %2894 = vrot.lane.b32.xlu1 %v12018_v12, %s11850_s14  ;;  %v853_v55 = vsel %vm852_vm4, %v843_v37, %v845_v38 }
  0x9f   : > { %10094 = vmatmul.mubr.msk.bf16.gmra.mrb[4].mxu1 %vm397_vm2, %v11676_v33  ;;  %v864_v57 = vsel %vm404_vm1, %v853_v55, 0 }
  0xa0   : > { %636 = vmatprep.mubr.bf16.mxu1 %v14598_v0 }
  0xa1   : > { %v847_v42 = vpop.permute.xlu0 %846  ;;  %v849_v43 = vpop.permute.xlu1 %848 }
  0xa2   : > { %v854_v45 = vsel %vm852_vm4, %v845_v38, %v847_v42  ;;  %2896 = vrot.lane.b32.xlu0 %v12020_v13, %s11850_s14  ;;  %2898 = vrot.lane.b32.xlu1 %v12027_v14, %s11850_s14  ;;  %v855_v60 = vsel %vm852_vm4, %v847_v42, %v849_v43 }
  0xa3   : > { %10098 = vmatmul.mubr.msk.bf16.vlgmr.msra.gmra.mrb[0].mxu0 %vm397_vm2, %v11677_v40  ;;  %v870_v62 = vsel %vm404_vm1, %v855_v60, 0 }
  0xa4   : > { %706 = vmatpush1.bf16.msra.mxu0 %v694_v41  ;;  %593 = vmatprep.mubr.bf16.mxu0 %v14598_v0 }
  0xa5   : > { %10121 = vmatprep.subr.msk.bf16.mxu0 %vm404_vm1, %v854_v45  ;;  %v851_v47 = vpop.permute.xlu0 %850  ;;  %v1013_v48 = vpop.permute.xlu1 %1012  ;;  %v11689_v45 = vld [vmem:[%s14574_s2 + $0x48] sm:$0xff]  }
  0xa6   : > { %v856_v49 = vsel %vm852_vm4, %v849_v43, %v851_v47  ;;  %3059 = vrot.lane.b32.xlu0 %v12010_v10, %s11851_s15  ;;  %3061 = vrot.lane.b32.xlu1 %v12012_v11, %s11851_s15 }
  0xa7   : > { %10101 = vmatmul.mubr.msk.bf16.vlgmr.msra.gmra.mrb[0].mxu1 %vm397_vm2, %v11677_v40 }
  0xa8   : > { %759 = vmatpush1.bf16.msra.mxu1 %v700_v46  ;;  %646 = vmatprep.mubr.bf16.mxu1 %v14598_v0 }
  0xa9   : > { %10124 = vmatprep.subr.msk.bf16.mxu1 %vm404_vm1, %v856_v49  ;;  %v1015_v51 = vpop.permute.xlu0 %1014  ;;  %v1017_v52 = vpop.permute.xlu1 %1016 }
  0xaa   : > { %3063 = vrot.lane.b32.xlu0 %v12018_v12, %s11851_s15  ;;  %3065 = vrot.lane.b32.xlu1 %v12020_v13, %s11851_s15  ;;  %v1024_v61 = vsel %vm1022_vm5, %v1015_v51, %v1017_v52  ;;  %v1023_v17 = vsel %vm1022_vm5, %v1013_v48, %v1015_v51  ;;  %v11690_v51 = vld [vmem:[%s14574_s2 + $0x50] sm:$0xff]  }
  0xab   : > { %10099 = vmatmul.mubr.msk.bf16.gmra.mrb[4].mxu0 %vm397_vm2, %v11680_v50  ;;  %v1034_v20 = vsel %vm404_vm1, %v1023_v17, 0 }
  0xac   : > { %737 = vmatprep.mubr.bf16.mxu0 %v14598_v0 }
  0xad   : > { %v1019_v53 = vpop.permute.xlu0 %1018  ;;  %v1021_v54 = vpop.permute.xlu1 %1020 }
  0xae   : > { %3067 = vrot.lane.b32.xlu0 %v12027_v14, %s11851_s15  ;;  %3228 = vrot.lane.b32.xlu1 %v12010_v10, %s11852_s16  ;;  %v1026_v2 = vsel %vm1022_vm5, %v1019_v53, %v1021_v54  ;;  %v1025_v23 = vsel %vm1022_vm5, %v1017_v52, %v1019_v53 }
  0xaf   : > { %10102 = vmatmul.mubr.msk.bf16.gmra.mrb[4].mxu1 %vm397_vm2, %v11680_v50  ;;  %v1040_v25 = vsel %vm404_vm1, %v1025_v23, 0  ;;  %v11693_v23 = vld [vmem:[%s14574_s2 + $0x68] sm:$0xff]  }
  0xb0   : > { %790 = vmatprep.mubr.bf16.mxu1 %v14598_v0 }
  0xb1   : > { %v12154_v58 = vpop.permute.xlu0 %1182  ;;  %v12156_v59 = vpop.permute.xlu1 %1184 }
  0xb2   : > { %3230 = vrot.lane.b32.xlu0 %v12012_v11, %s11852_s16  ;;  %3232 = vrot.lane.b32.xlu1 %v12018_v12, %s11852_s16  ;;  %v1193_v34 = vsel %vm1192_vm6, %v12154_v58, %v12156_v59 }
  0xb3   : > { %10110 = vmatmul.mubr.msk.bf16.vlgmr.msra.gmra.mrb[0].mxu0 %vm397_vm2, %v11684_v56  ;;  %v1204_v36 = vsel %vm404_vm1, %v1193_v34, 0 }
  0xb4   : > { %876 = vmatpush1.bf16.msra.mxu0 %v864_v57  ;;  %747 = vmatprep.mubr.bf16.mxu0 %v14598_v0 }
  0xb5   : > { %10133 = vmatprep.subr.msk.bf16.mxu0 %vm404_vm1, %v1024_v61  ;;  %v12168_v63 = vpop.permute.xlu0 %1186  ;;  %v12170_v1 = vpop.permute.xlu1 %1188  ;;  %v11691_v61 = vld [vmem:[%s14574_s2 + $0x58] sm:$0xff]  }
  0xb6   : > { %3234 = vrot.lane.b32.xlu0 %v12020_v13, %s11852_s16  ;;  %3236 = vrot.lane.b32.xlu1 %v12027_v14, %s11852_s16  ;;  %v12194_v14 = vcombine.high %v3550_v8, %v3550_v8  ;;  %v1194_v24 = vsel %vm1192_vm6, %v12156_v59, %v12168_v63  ;;  %v1195_v39 = vsel %vm1192_vm6, %v12168_v63, %v12170_v1 }
  0xb7   : > { %10113 = vmatmul.mubr.msk.bf16.vlgmr.msra.gmra.mrb[0].mxu1 %vm397_vm2, %v11684_v56  ;;  %v1210_v41 = vsel %vm404_vm1, %v1195_v39, 0 }
  0xb8   : > { %929 = vmatpush1.bf16.msra.mxu1 %v870_v62  ;;  %800 = vmatprep.mubr.bf16.mxu1 %v14598_v0 }
  0xb9   : > { %10136 = vmatprep.subr.msk.bf16.mxu1 %vm404_vm1, %v1026_v2  ;;  %v1191_v6 = vpop.permute.xlu0 %1190  ;;  %v12183_v7 = vpop.permute.xlu1 %1352 }
  0xba   : > { %3580 = vrot.lane.b32.xlu0 %v11927_v3, %s11845_s9  ;;  %3582 = vrot.lane.b32.xlu1 %v11935_v5, %s11845_s9  ;;  %v1196_v28 = vsel %vm1192_vm6, %v12170_v1, %v1191_v6  ;;  %v11692_v6 = vld [vmem:[%s14574_s2 + $0x60] sm:$0xff]  }
  0xbb   : > { %10111 = vmatmul.mubr.msk.bf16.gmra.mrb[4].mxu0 %vm397_vm2, %v11685_v4 }
  0xbc   : > { %907 = vmatprep.mubr.bf16.mxu0 %v14598_v0 }
  0xbd   : > { %v12196_v15 = vpop.permute.xlu0 %1354  ;;  %v12198_v16 = vpop.permute.xlu1 %1356 }
  0xbe   : > { %3584 = vrot.lane.b32.xlu0 %v12192_v9, %s11845_s9  ;;  %3586 = vrot.lane.b32.xlu1 %v12194_v14, %s11845_s9  ;;  %v1364_v40 = vsel %vm1362_vm7, %v12196_v15, %v12198_v16  ;;  %v1363_v50 = vsel %vm1362_vm7, %v12183_v7, %v12196_v15 }
  0xbf   : > { %10114 = vmatmul.mubr.msk.bf16.gmra.mrb[4].mxu1 %vm397_vm2, %v11685_v4  ;;  %v1374_v52 = vsel %vm404_vm1, %v1363_v50, 0 }
  0xc0   : > { %960 = vmatprep.mubr.bf16.mxu1 %v14598_v0 }
  0xc1   : > { %v12214_v21 = vpop.permute.xlu0 %1358  ;;  %v1361_v22 = vpop.permute.xlu1 %1360 }
  0xc2   : > { %3588 = vrot.lane.b32.xlu0 %v12210_v19, %s11845_s9  ;;  %3749 = vrot.lane.b32.xlu1 %v11927_v3, %s11846_s10  ;;  %v1366_v44 = vsel %vm1362_vm7, %v12214_v21, %v1361_v22  ;;  %v1365_v55 = vsel %vm1362_vm7, %v12198_v16, %v12214_v21 }
  0xc3   : > { %10122 = vmatmul.mubr.msk.bf16.vlgmr.msra.gmra.mrb[0].mxu0 %vm397_vm2, %v11686_v18  ;;  %v1380_v57 = vsel %vm404_vm1, %v1365_v55, 0  ;;  %v11698_v55 = vld [vmem:[%s14574_s2 + $0x90] sm:$0xff]  }
  0xc4   : > { %1046 = vmatpush1.bf16.msra.mxu0 %v1034_v20  ;;  %917 = vmatprep.mubr.bf16.mxu0 %v14598_v0 }
  0xc5   : > { %10145 = vmatprep.subr.msk.bf16.mxu0 %vm404_vm1, %v1194_v24  ;;  %v12228_v26 = vpop.permute.xlu0 %1522  ;;  %v12230_v27 = vpop.permute.xlu1 %1524 }
  0xc6   : > { %3751 = vrot.lane.b32.xlu0 %v11935_v5, %s11846_s10  ;;  %3753 = vrot.lane.b32.xlu1 %v12192_v9, %s11846_s10  ;;  %v1533_v4 = vsel %vm1532_vm8, %v12228_v26, %v12230_v27 }
  0xc7   : > { %10125 = vmatmul.mubr.msk.bf16.vlgmr.msra.gmra.mrb[0].mxu1 %vm397_vm2, %v11686_v18  ;;  %v1544_v7 = vsel %vm404_vm1, %v1533_v4, 0 }
  0xc8   : > { %1099 = vmatpush1.bf16.msra.mxu1 %v1040_v25  ;;  %970 = vmatprep.mubr.bf16.mxu1 %v14598_v0 }
  0xc9   : > { %10148 = vmatprep.subr.msk.bf16.mxu1 %vm404_vm1, %v1196_v28  ;;  %v12244_v30 = vpop.permute.xlu0 %1526  ;;  %v12246_v31 = vpop.permute.xlu1 %1528  ;;  %v11694_v28 = vld [vmem:[%s14574_s2 + $0x70] sm:$0xff]  }
  0xca   : > { %3755 = vrot.lane.b32.xlu0 %v12194_v14, %s11846_s10  ;;  %3757 = vrot.lane.b32.xlu1 %v12210_v19, %s11846_s10  ;;  %v1534_v56 = vsel %vm1532_vm8, %v12230_v27, %v12244_v30  ;;  %v1535_v16 = vsel %vm1532_vm8, %v12244_v30, %v12246_v31 }
  0xcb   : > { %10123 = vmatmul.mubr.msk.bf16.gmra.mrb[4].mxu0 %vm397_vm2, %v11687_v29  ;;  %v1550_v18 = vsel %vm404_vm1, %v1535_v16, 0 }
  0xcc   : > { %1077 = vmatprep.mubr.bf16.mxu0 %v14598_v0 }
  0xcd   : > { %v1531_v32 = vpop.permute.xlu0 %1530  ;;  %v12254_v33 = vpop.permute.xlu1 %1692 }
  0xce   : > { %3918 = vrot.lane.b32.xlu0 %v11927_v3, %s11847_s11  ;;  %3920 = vrot.lane.b32.xlu1 %v11935_v5, %s11847_s11  ;;  %v1536_v60 = vsel %vm1532_vm8, %v12246_v31, %v1531_v32 }
  0xcf   : > { %10126 = vmatmul.mubr.msk.bf16.gmra.mrb[4].mxu1 %vm397_vm2, %v11687_v29 }
  0xd0   : > { %1130 = vmatprep.mubr.bf16.mxu1 %v14598_v0 }
  0xd1   : > { %v12269_v37 = vpop.permute.xlu0 %1694  ;;  %v12271_v38 = vpop.permute.xlu1 %1696 }
  0xd2   : > { %3922 = vrot.lane.b32.xlu0 %v12192_v9, %s11847_s11  ;;  %3924 = vrot.lane.b32.xlu1 %v12194_v14, %s11847_s11  ;;  %v1704_v17 = vsel %vm1702_vm9, %v12269_v37, %v12271_v38  ;;  %v1703_v26 = vsel %vm1702_vm9, %v12254_v33, %v12269_v37 }
  0xd3   : > { %10134 = vmatmul.mubr.msk.bf16.vlgmr.msra.gmra.mrb[0].mxu0 %vm397_vm2, %v11688_v35  ;;  %v1714_v30 = vsel %vm404_vm1, %v1703_v26, 0 }
  0xd4   : > { %1216 = vmatpush1.bf16.msra.mxu0 %v1204_v36  ;;  %1087 = vmatprep.mubr.bf16.mxu0 %v14598_v0  ;;  %v1881_v36 = vsel %vm404_vm1, %v12010_v10, 0 }
  0xd5   : > { %10157 = vmatprep.subr.msk.bf16.mxu0 %vm404_vm1, %v1364_v40  ;;  %v12287_v42 = vpop.permute.xlu0 %1698  ;;  %v12289_v43 = vpop.permute.xlu1 %1700  ;;  %v1887_v40 = vsel %vm404_vm1, %v12018_v12, 0 }
  0xd6   : > { %3926 = vrot.lane.b32.xlu0 %v12210_v19, %s11847_s11  ;;  %4087 = vrot.lane.b32.xlu1 %v11927_v3, %s11848_s12  ;;  %v1706_v22 = vsel %vm1702_vm9, %v12287_v42, %v12289_v43  ;;  %v1705_v31 = vsel %vm1702_vm9, %v12271_v38, %v12287_v42  ;;  %v5129_v43 = vld [vmem:[%s11921_s8 + $0x18] sm:$0xff] }
  0xd7   : > { %10137 = vmatmul.mubr.msk.bf16.vlgmr.msra.gmra.mrb[0].mxu1 %vm397_vm2, %v11688_v35  ;;  %v1720_v33 = vsel %vm404_vm1, %v1705_v31, 0  ;;  %v12534_v50 = vcombine.high %v5129_v43, %v5129_v43 }
  0xd8   : > { %1269 = vmatpush1.bf16.msra.mxu1 %v1210_v41  ;;  %1140 = vmatprep.mubr.bf16.mxu1 %v14598_v0  ;;  %v11697_v41 = vld [vmem:[%s14574_s2 + $0x88] sm:$0xff]  }
  0xd9   : > { %10160 = vmatprep.subr.msk.bf16.mxu1 %vm404_vm1, %v1366_v44  ;;  %v12303_v46 = vpop.permute.xlu0 %2045  ;;  %v12305_v47 = vpop.permute.xlu1 %2047  ;;  %v12527_v44 = vcombine.low %v5129_v43, %v5129_v43 }
  0xda   : > { %4089 = vrot.lane.b32.xlu0 %v11935_v5, %s11848_s12  ;;  %4091 = vrot.lane.b32.xlu1 %v12192_v9, %s11848_s12 }
  0xdb   : > { %10135 = vmatmul.mubr.msk.bf16.gmra.mrb[4].mxu0 %vm397_vm2, %v11689_v45 }
  0xdc   : > { %1247 = vmatprep.mubr.bf16.mxu0 %v14598_v0 }
  0xdd   : > { %v12313_v48 = vpop.permute.xlu0 %2049  ;;  %v12315_v49 = vpop.permute.xlu1 %2051 }
  0xde   : > { %4093 = vrot.lane.b32.xlu0 %v12194_v14, %s11848_s12  ;;  %4095 = vrot.lane.b32.xlu1 %v12210_v19, %s11848_s12  ;;  %v2056_v38 = vsel %vm392_vm0, %v12305_v47, %v12313_v48 }
  0xdf   : > { %10138 = vmatmul.mubr.msk.bf16.gmra.mrb[4].mxu1 %vm397_vm2, %v11689_v45 }
  0xe0   : > { %1300 = vmatprep.mubr.bf16.mxu1 %v14598_v0 }
  0xe1   : > { %v12330_v53 = vpop.permute.xlu0 %2053  ;;  %v12332_v54 = vpop.permute.xlu1 %2214 }
  0xe2   : > { %4256 = vrot.lane.b32.xlu0 %v11927_v3, %s11849_s13  ;;  %4258 = vrot.lane.b32.xlu1 %v11935_v5, %s11849_s13  ;;  %v2058_v10 = vsel %vm392_vm0, %v12315_v49, %v12330_v53  ;;  %v2055_v53 = vsel %vm392_vm0, %v12303_v46, %v12305_v47  ;;  %v2057_v46 = vsel %vm392_vm0, %v12313_v48, %v12315_v49  ;;  %v11699_v49 = vld [vmem:[%s14574_s2 + $0x98] sm:$0xff]  }
  0xe3   : > { %10146 = vmatmul.mubr.msk.bf16.vlgmr.msra.gmra.mrb[0].mxu0 %vm397_vm2, %v11690_v51 }
  0xe4   : > { %1386 = vmatpush1.bf16.msra.mxu0 %v1374_v52  ;;  %1257 = vmatprep.mubr.bf16.mxu0 %v14598_v0 }
  0xe5   : > { %10169 = vmatprep.subr.msk.bf16.mxu0 %vm404_vm1, %v1534_v56  ;;  %v12348_v58 = vpop.permute.xlu0 %2216  ;;  %v12350_v59 = vpop.permute.xlu1 %2218  ;;  %v2066_v56 = vsel %vm404_vm1, %v2055_v53, 0 }
  0xe6   : > { %4260 = vrot.lane.b32.xlu0 %v12192_v9, %s11849_s13  ;;  %4262 = vrot.lane.b32.xlu1 %v12194_v14, %s11849_s13  ;;  %v2225_v47 = vsel %vm682_vm3, %v12348_v58, %v12350_v59  ;;  %v2224_v16 = vsel %vm682_vm3, %v12332_v54, %v12348_v58 }
  0xe7   : > { %10149 = vmatmul.mubr.msk.bf16.vlgmr.msra.gmra.mrb[0].mxu1 %vm397_vm2, %v11690_v51  ;;  %v12537_v51 = vld [vmem:[%s11921_s8 + $0x20] ss:$0 sps:$4 sm:$0xff]  }
  0xe8   : > { %1439 = vmatpush1.bf16.msra.mxu1 %v1380_v57  ;;  %1310 = vmatprep.mubr.bf16.mxu1 %v14598_v0 }
  0xe9   : > { %10172 = vmatprep.subr.msk.bf16.mxu1 %vm404_vm1, %v1536_v60  ;;  %v12364_v62 = vpop.permute.xlu0 %2220  ;;  %v12366_v63 = vpop.permute.xlu1 %2222 }
  0xea   : > { %4264 = vrot.lane.b32.xlu0 %v12210_v19, %s11849_s13  ;;  %4425 = vrot.lane.b32.xlu1 %v11927_v3, %s11850_s14  ;;  %v2227_v48 = vsel %vm682_vm3, %v12364_v62, %v12366_v63  ;;  %v2226_v54 = vsel %vm682_vm3, %v12350_v59, %v12364_v62  ;;  %v11701_v62 = vld [vmem:[%s14574_s2 + $0xa8] sm:$0xff]  }
  0xeb   : > { %10147 = vmatmul.mubr.msk.bf16.gmra.mrb[4].mxu0 %vm397_vm2, %v11691_v61  ;;  %v2241_v26 = vsel %vm404_vm1, %v2226_v54, 0 }
  0xec   : > { %1417 = vmatprep.mubr.bf16.mxu0 %v14598_v0 }
  0xed   : > { %v12374_v1 = vpop.permute.xlu0 %2383  ;;  %v12376_v2 = vpop.permute.xlu1 %2385 }
  0xee   : > { %4427 = vrot.lane.b32.xlu0 %v11935_v5, %s11850_s14  ;;  %4429 = vrot.lane.b32.xlu1 %v12192_v9, %s11850_s14 }
  0xef   : > { %10150 = vmatmul.mubr.msk.bf16.gmra.mrb[4].mxu1 %vm397_vm2, %v11691_v61  ;;  %v2072_v61 = vsel %vm404_vm1, %v2057_v46, 0 }
  0xf0   : > { %1470 = vmatprep.mubr.bf16.mxu1 %v14598_v0 }
  0xf1   : > { %v12391_v8 = vpop.permute.xlu0 %2387  ;;  %v12393_v15 = vpop.permute.xlu1 %2389 }
  0xf2   : > { %4431 = vrot.lane.b32.xlu0 %v12194_v14, %s11850_s14  ;;  %4433 = vrot.lane.b32.xlu1 %v12210_v19, %s11850_s14  ;;  %v2394_v58 = vsel %vm852_vm4, %v12376_v2, %v12391_v8 }
  0xf3   : > { %10158 = vmatmul.mubr.msk.bf16.vlgmr.msra.gmra.mrb[0].mxu0 %vm397_vm2, %v11692_v6 }
  0xf4   : > { %1556 = vmatpush1.bf16.msra.mxu0 %v1544_v7  ;;  %1427 = vmatprep.mubr.bf16.mxu0 %v14598_v0 }
  0xf5   : > { %10181 = vmatprep.subr.msk.bf16.mxu0 %vm404_vm1, %v1704_v17  ;;  %v12409_v20 = vpop.permute.xlu0 %2391  ;;  %v12411_v21 = vpop.permute.xlu1 %2552  ;;  %v11700_v17 = vld [vmem:[%s14574_s2 + $0xa0] sm:$0xff]  }
  0xf6   : > { %4594 = vrot.lane.b32.xlu0 %v11927_v3, %s11851_s15  ;;  %4596 = vrot.lane.b32.xlu1 %v11935_v5, %s11851_s15  ;;  %v2396_v59 = vsel %vm852_vm4, %v12393_v15, %v12409_v20 }
  0xf7   : > { %10161 = vmatmul.mubr.msk.bf16.vlgmr.msra.gmra.mrb[0].mxu1 %vm397_vm2, %v11692_v6 }
  0xf8   : > { %1609 = vmatpush1.bf16.msra.mxu1 %v1550_v18  ;;  %1480 = vmatprep.mubr.bf16.mxu1 %v14598_v0  ;;  %v2235_v18 = vsel %vm404_vm1, %v2224_v16, 0 }
  0xf9   : > { %10184 = vmatprep.subr.msk.bf16.mxu1 %vm404_vm1, %v1706_v22  ;;  %v12426_v24 = vpop.permute.xlu0 %2554  ;;  %v12428_v25 = vpop.permute.xlu1 %2556 }
  0xfa   : > { %4598 = vrot.lane.b32.xlu0 %v12192_v9, %s11851_s15  ;;  %4600 = vrot.lane.b32.xlu1 %v12194_v14, %s11851_s15  ;;  %v2562_v53 = vsel %vm1022_vm5, %v12411_v21, %v12426_v24 }
  0xfb   : > { %10159 = vmatmul.mubr.msk.bf16.gmra.mrb[4].mxu0 %vm397_vm2, %v11693_v23  ;;  %v2573_v46 = vsel %vm404_vm1, %v2562_v53, 0 }
  0xfc   : > { %1587 = vmatprep.mubr.bf16.mxu0 %v14598_v0 }
  0xfd   : > { %v12439_v27 = vpop.permute.xlu0 %2558  ;;  %v12449_v29 = vpop.permute.xlu1 %2560 }
  0xfe   : > { %4602 = vrot.lane.b32.xlu0 %v12210_v19, %s11851_s15  ;;  %4763 = vrot.lane.b32.xlu1 %v11927_v3, %s11852_s16  ;;  %v2564_v21 = vsel %vm1022_vm5, %v12428_v25, %v12439_v27 }
  0xff   : > { %10162 = vmatmul.mubr.msk.bf16.gmra.mrb[4].mxu1 %vm397_vm2, %v11693_v23 }
 0x100   : > { %1640 = vmatprep.mubr.bf16.mxu1 %v14598_v0 }
 0x101   : > { %v12456_v32 = vpop.permute.xlu0 %2721 }
 0x102   : > { %4765 = vrot.lane.b32.xlu0 %v11935_v5, %s11852_s16  ;;  %4767 = vrot.lane.b32.xlu1 %v12192_v9, %s11852_s16  ;;  %v12463_v3 = vpop.permute.xlu1 %2723  ;;  %v11695_v5 = vld [vmem:[%s14574_s2 + $0x78] sm:$0xff]  }
 0x103   : > { %10170 = vmatmul.mubr.msk.bf16.vlgmr.msra.gmra.mrb[0].mxu0 %vm397_vm2, %v11694_v28 }
 0x104   : > { %1726 = vmatpush1.bf16.msra.mxu0 %v1714_v30  ;;  %1597 = vmatprep.mubr.bf16.mxu0 %v14598_v0 }
 0x105   : > { %10197 = vmatprep.subr.msk.bf16.mxu0 %vm404_vm1, %v12012_v11 }
 0x106   : > { %4769 = vrot.lane.b32.xlu0 %v12194_v14, %s11852_s16  ;;  %4771 = vrot.lane.b32.xlu1 %v12210_v19, %s11852_s16 }
 0x107   : > { %10173 = vmatmul.mubr.msk.bf16.vlgmr.msra.gmra.mrb[0].mxu1 %vm397_vm2, %v11694_v28 }
 0x108   : > { %1779 = vmatpush1.bf16.msra.mxu1 %v1720_v33  ;;  %1650 = vmatprep.mubr.bf16.mxu1 %v14598_v0  ;;  %v12478_v34 = vpop.permute.xlu0 %2725  ;;  %v12482_v11 = vpop.permute.xlu1 %2727  ;;  %v2393_v33 = vsel %vm852_vm4, %v12374_v1, %v12376_v2  ;;  %v2395_v1 = vsel %vm852_vm4, %v12391_v8, %v12393_v15  ;;  %v2563_v2 = vsel %vm1022_vm5, %v12426_v24, %v12428_v25  ;;  %v11706_v15 = vld [vmem:[%s14574_s2 + $0xb8] sm:$0xff]  }
 0x109   : > { %10200 = vmatprep.subr.msk.bf16.mxu1 %vm404_vm1, %v12020_v13  ;;  %v11696_v13 = vld [vmem:[%s14574_s2 + $0x80] sm:$0xff]   ;;  %v2565_v8 = vsel %vm1022_vm5, %v12439_v27, %v12449_v29  ;;  %v2732_v24 = vsel %vm1192_vm6, %v12463_v3, %v12478_v34  ;;  %v11708_v27 = vld [vmem:[%s14574_s2 + $0xc8] sm:$0xff]  }
 0x10a   : > { %5162 = vrot.lane.b32.xlu0 %v12192_v9, %s11845_s9  ;;  %5164 = vrot.lane.b32.xlu1 %v12194_v14, %s11845_s9 }
 0x10b   : > { %10171 = vmatmul.mubr.msk.bf16.gmra.mrb[4].mxu0 %vm397_vm2, %v11695_v5 }
 0x10c   : > { %1757 = vmatprep.mubr.bf16.mxu0 %v14598_v0  ;;  %v12490_v19 = vpop.permute.xlu0 %2729  ;;  %v12492_v35 = vpop.permute.xlu1 %2890 }
 0x10d   : > { %v2734_v25 = vsel %vm1192_vm6, %v12482_v11, %v12490_v19 }
 0x10e   : > { %5166 = vrot.lane.b32.xlu0 %v12527_v44, %s11845_s9  ;;  %5168 = vrot.lane.b32.xlu1 %v12534_v50, %s11845_s9 }
 0x10f   : > { %10174 = vmatmul.mubr.msk.bf16.gmra.mrb[4].mxu1 %vm397_vm2, %v11695_v5  ;;  %v11705_v5 = vld [vmem:[%s14574_s2 + $0xb0] sm:$0xff]  }
 0x110   : > { %1810 = vmatprep.mubr.bf16.mxu1 %v14598_v0  ;;  %v12501_v37 = vpop.permute.xlu0 %2892  ;;  %v12507_v39 = vpop.permute.xlu1 %2894 }
 0x111   : > { %v2900_v53 = vsel %vm1362_vm7, %v12492_v35, %v12501_v37 }
 0x112   : > { %5170 = vrot.lane.b32.xlu0 %v12537_v51, %s11845_s9  ;;  %5448 = vrot.lane.b32.xlu1 %v12192_v9, %s11846_s10 }
 0x113   : > { %10182 = vmatmul.mubr.msk.bf16.vlgmr.msra.gmra.mrb[0].mxu0 %vm397_vm2, %v11696_v13 }
 0x114   : > { %1893 = vmatpush1.bf16.msra.mxu0 %v1881_v36  ;;  %1767 = vmatprep.mubr.bf16.mxu0 %v14598_v0  ;;  %v12520_v42 = vpop.permute.xlu0 %2896  ;;  %v12525_v12 = vpop.permute.xlu1 %2898 }
 0x115   : > { %10214 = vmatprep.subr.msk.bf16.mxu0 %vm404_vm1, %v2056_v38  ;;  %v2902_v35 = vsel %vm1362_vm7, %v12507_v39, %v12520_v42 }
 0x116   : > { %5450 = vrot.lane.b32.xlu0 %v12194_v14, %s11846_s10  ;;  %5452 = vrot.lane.b32.xlu1 %v12527_v44, %s11846_s10 }
 0x117   : > { %10185 = vmatmul.mubr.msk.bf16.vlgmr.msra.gmra.mrb[0].mxu1 %vm397_vm2, %v11696_v13  ;;  %v2404_v13 = vsel %vm404_vm1, %v2393_v33, 0 }
 0x118   : > { %1946 = vmatpush1.bf16.msra.mxu1 %v1887_v40  ;;  %1820 = vmatprep.mubr.bf16.mxu1 %v14598_v0  ;;  %v12530_v45 = vpop.permute.xlu0 %3059  ;;  %v12540_v52 = vpop.permute.xlu1 %3061  ;;  %v2410_v40 = vsel %vm404_vm1, %v2395_v1, 0 }
 0x119   : > { %10217 = vmatprep.subr.msk.bf16.mxu1 %vm404_vm1, %v2058_v10 }
 0x11a   : > { %5454 = vrot.lane.b32.xlu0 %v12534_v50, %s11846_s10  ;;  %5456 = vrot.lane.b32.xlu1 %v12537_v51, %s11846_s10 }
 0x11b   : > { %10183 = vmatmul.mubr.msk.bf16.gmra.mrb[4].mxu0 %vm397_vm2, %v11697_v41 }
 0x11c   : > { %1924 = vmatprep.mubr.bf16.mxu0 %v14598_v0  ;;  %v12555_v57 = vpop.permute.xlu0 %3063  ;;  %v12566_v60 = vpop.permute.xlu1 %3065 }
 0x11e   : > { %5616 = vrot.lane.b32.xlu0 %v12192_v9, %s11847_s11  ;;  %5618 = vrot.lane.b32.xlu1 %v12194_v14, %s11847_s11 }
 0x11f   : > { %10186 = vmatmul.mubr.msk.bf16.gmra.mrb[4].mxu1 %vm397_vm2, %v11697_v41 }
 0x120   : > { %1977 = vmatprep.mubr.bf16.mxu1 %v14598_v0  ;;  %v12582_v4 = vpop.permute.xlu0 %3067  ;;  %v12584_v6 = vpop.permute.xlu1 %3228 }
 0x122   : > { %5620 = vrot.lane.b32.xlu0 %v12527_v44, %s11847_s11  ;;  %5622 = vrot.lane.b32.xlu1 %v12534_v50, %s11847_s11 }
 0x123   : > { %10198 = vmatmul.mubr.msk.bf16.vlgmr.msra.gmra.mrb[0].mxu0 %vm397_vm2, %v11698_v55 }
 0x124   : > { %2078 = vmatpush1.bf16.msra.mxu0 %v2066_v56  ;;  %1934 = vmatprep.mubr.bf16.mxu0 %v14598_v0  ;;  %v12593_v63 = vpop.permute.xlu0 %3230  ;;  %v12598_v7 = vpop.permute.xlu1 %3232 }
 0x125   : > { %10226 = vmatprep.subr.msk.bf16.mxu0 %vm404_vm1, %v2225_v47 }
 0x126   : > { %5624 = vrot.lane.b32.xlu0 %v12537_v51, %s11847_s11  ;;  %5784 = vrot.lane.b32.xlu1 %v12192_v9, %s11848_s12 }
 0x127   : > { %10201 = vmatmul.mubr.msk.bf16.vlgmr.msra.gmra.mrb[0].mxu1 %vm397_vm2, %v11698_v55  ;;  %v11707_v55 = vld [vmem:[%s14574_s2 + $0xc0] sm:$0xff]  }
 0x128   : > { %2131 = vmatpush1.bf16.msra.mxu1 %v2072_v61  ;;  %1987 = vmatprep.mubr.bf16.mxu1 %v14598_v0  ;;  %v12613_v22 = vpop.permute.xlu0 %3234  ;;  %v12624_v23 = vpop.permute.xlu1 %3236  ;;  %v2579_v61 = vsel %vm404_vm1, %v2564_v21, 0  ;;  %v2911_v21 = vsel %vm404_vm1, %v2900_v53, 0 }
 0x129   : > { %10229 = vmatprep.subr.msk.bf16.mxu1 %vm404_vm1, %v2227_v48 }
 0x12a   : > { %5786 = vrot.lane.b32.xlu0 %v12194_v14, %s11848_s12  ;;  %5788 = vrot.lane.b32.xlu1 %v12527_v44, %s11848_s12 }
 0x12b   : > { %10199 = vmatmul.mubr.msk.bf16.gmra.mrb[4].mxu0 %vm397_vm2, %v11699_v49 }
 0x12c   : > { %2109 = vmatprep.mubr.bf16.mxu0 %v14598_v0  ;;  %v12631_v28 = vpop.permute.xlu0 %3580  ;;  %v12642_v30 = vpop.permute.xlu1 %3582 }
 0x12e   : > { %5790 = vrot.lane.b32.xlu0 %v12534_v50, %s11848_s12  ;;  %5792 = vrot.lane.b32.xlu1 %v12537_v51, %s11848_s12 }
 0x12f   : > { %10202 = vmatmul.mubr.msk.bf16.gmra.mrb[4].mxu1 %vm397_vm2, %v11699_v49 }
 0x130   : > { %2162 = vmatprep.mubr.bf16.mxu1 %v14598_v0  ;;  %v12651_v20 = vpop.permute.xlu0 %3584  ;;  %v12656_v31 = vpop.permute.xlu1 %3586 }
 0x132   : > { %5952 = vrot.lane.b32.xlu0 %v12192_v9, %s11849_s13  ;;  %5954 = vrot.lane.b32.xlu1 %v12194_v14, %s11849_s13 }
 0x133   : > { %10215 = vmatmul.mubr.msk.bf16.vlgmr.msra.gmra.mrb[0].mxu0 %vm397_vm2, %v11700_v17 }
 0x134   : > { %2247 = vmatpush1.bf16.msra.mxu0 %v2235_v18  ;;  %2119 = vmatprep.mubr.bf16.mxu0 %v14598_v0  ;;  %v12671_v36 = vpop.permute.xlu0 %3588  ;;  %v12673_v38 = vpop.permute.xlu1 %3749  ;;  %v11709_v18 = vld [vmem:[%s14574_s2 + $0xd0] sm:$0xff]  }
 0x135   : > { %10238 = vmatprep.subr.msk.bf16.mxu0 %vm404_vm1, %v2394_v58 }
 0x136   : > { %5956 = vrot.lane.b32.xlu0 %v12527_v44, %s11849_s13  ;;  %5958 = vrot.lane.b32.xlu1 %v12534_v50, %s11849_s13 }
 0x137   : > { %10218 = vmatmul.mubr.msk.bf16.vlgmr.msra.gmra.mrb[0].mxu1 %vm397_vm2, %v11700_v17  ;;  %v2731_v17 = vsel %vm1192_vm6, %v12456_v32, %v12463_v3  ;;  %v2733_v32 = vsel %vm1192_vm6, %v12478_v34, %v12482_v11  ;;  %v2901_v3 = vsel %vm1362_vm7, %v12501_v37, %v12507_v39  ;;  %v2903_v11 = vsel %vm1362_vm7, %v12520_v42, %v12525_v12  ;;  %v11712_v42 = vld [vmem:[%s14574_s2 + $0xe8] sm:$0xff]  }
 0x138   : > { %2300 = vmatpush1.bf16.msra.mxu1 %v2241_v26  ;;  %2172 = vmatprep.mubr.bf16.mxu1 %v14598_v0  ;;  %v12689_v10 = vpop.permute.xlu0 %3751  ;;  %v12700_v41 = vpop.permute.xlu1 %3753  ;;  %v2742_v26 = vsel %vm404_vm1, %v2731_v17, 0  ;;  %v3070_v37 = vsel %vm1532_vm8, %v12540_v52, %v12555_v57  ;;  %v3072_v39 = vsel %vm1532_vm8, %v12566_v60, %v12582_v4 }
 0x139   : > { %10241 = vmatprep.subr.msk.bf16.mxu1 %vm404_vm1, %v2396_v59  ;;  %v6776_v59 = vld [vmem:[%s11921_s8 + $0x14] sm:$0xff] }
 0x13a   : > { %5960 = vrot.lane.b32.xlu0 %v12537_v51, %s11849_s13  ;;  %6120 = vrot.lane.b32.xlu1 %v12192_v9, %s11850_s14  ;;  %v12810_v34 = vcombine.low %v6776_v59, %v6776_v59  ;;  %v12823_v1 = vcombine.high %v6776_v59, %v6776_v59 }
 0x13b   : > { %10216 = vmatmul.mubr.msk.bf16.gmra.mrb[4].mxu0 %vm397_vm2, %v11701_v62 }
 0x13c   : > { %2278 = vmatprep.mubr.bf16.mxu0 %v14598_v0  ;;  %v12709_v29 = vpop.permute.xlu0 %3755  ;;  %v12714_v43 = vpop.permute.xlu1 %3757 }
 0x13e   : > { %6122 = vrot.lane.b32.xlu0 %v12194_v14, %s11850_s14  ;;  %6124 = vrot.lane.b32.xlu1 %v12527_v44, %s11850_s14 }
 0x13f   : > { %10219 = vmatmul.mubr.msk.bf16.gmra.mrb[4].mxu1 %vm397_vm2, %v11701_v62  ;;  %v2748_v62 = vsel %vm404_vm1, %v2733_v32, 0  ;;  %v11713_v32 = vld [vmem:[%s14574_s2 + $0xf0] sm:$0xff]  }
 0x140   : > { %2331 = vmatprep.mubr.bf16.mxu1 %v14598_v0  ;;  %v12725_v56 = vpop.permute.xlu0 %3918  ;;  %v12731_v47 = vpop.permute.xlu1 %3920 }
 0x142   : > { %6126 = vrot.lane.b32.xlu0 %v12534_v50, %s11850_s14  ;;  %6128 = vrot.lane.b32.xlu1 %v12537_v51, %s11850_s14 }
 0x143   : > { %10227 = vmatmul.mubr.msk.bf16.vlgmr.msra.gmra.mrb[0].mxu0 %vm397_vm2, %v11705_v5 }
 0x144   : > { %2416 = vmatpush1.bf16.msra.mxu0 %v2404_v13  ;;  %2288 = vmatprep.mubr.bf16.mxu0 %v14598_v0  ;;  %v12747_v48 = vpop.permute.xlu0 %3922  ;;  %v12758_v49 = vpop.permute.xlu1 %3924  ;;  %v11710_v13 = vld [vmem:[%s14574_s2 + $0xd8] sm:$0xff]  }
 0x145   : > { %10250 = vmatprep.subr.msk.bf16.mxu0 %vm404_vm1, %v2563_v2 }
 0x146   : > { %6288 = vrot.lane.b32.xlu0 %v12192_v9, %s11851_s15  ;;  %6290 = vrot.lane.b32.xlu1 %v12194_v14, %s11851_s15 }
 0x147   : > { %10230 = vmatmul.mubr.msk.bf16.vlgmr.msra.gmra.mrb[0].mxu1 %vm397_vm2, %v11705_v5 }
 0x148   : > { %2469 = vmatpush1.bf16.msra.mxu1 %v2410_v40  ;;  %2341 = vmatprep.mubr.bf16.mxu1 %v14598_v0  ;;  %v12767_v19 = vpop.permute.xlu0 %3926  ;;  %v12771_v16 = vpop.permute.xlu1 %4087 }
 0x149   : > { %10253 = vmatprep.subr.msk.bf16.mxu1 %vm404_vm1, %v2565_v8  ;;  %v12840_v8 = vld [vmem:[%s11921_s8 + $0x24] ss:$0 sps:$4 sm:$0xff]  }
 0x14a   : > { %6292 = vrot.lane.b32.xlu0 %v12527_v44, %s11851_s15  ;;  %6294 = vrot.lane.b32.xlu1 %v12534_v50, %s11851_s15 }
 0x14b   : > { %10228 = vmatmul.mubr.msk.bf16.gmra.mrb[4].mxu0 %vm397_vm2, %v11706_v15 }
 0x14c   : > { %2447 = vmatprep.mubr.bf16.mxu0 %v14598_v0  ;;  %v12783_v54 = vpop.permute.xlu0 %4089  ;;  %v12788_v58 = vpop.permute.xlu1 %4091 }
 0x14e   : > { %6296 = vrot.lane.b32.xlu0 %v12537_v51, %s11851_s15  ;;  %6456 = vrot.lane.b32.xlu1 %v12192_v9, %s11852_s16 }
 0x14f   : > { %10231 = vmatmul.mubr.msk.bf16.gmra.mrb[4].mxu1 %vm397_vm2, %v11706_v15 }
 0x150   : > { %2500 = vmatprep.mubr.bf16.mxu1 %v14598_v0  ;;  %v12806_v33 = vpop.permute.xlu0 %4093  ;;  %v12815_v5 = vpop.permute.xlu1 %4095 }
 0x152   : > { %6458 = vrot.lane.b32.xlu0 %v12194_v14, %s11852_s16  ;;  %6460 = vrot.lane.b32.xlu1 %v12527_v44, %s11852_s16 }
 0x153   : > { %10239 = vmatmul.mubr.msk.bf16.vlgmr.msra.gmra.mrb[0].mxu0 %vm397_vm2, %v11707_v55 }
 0x154   : > { %2585 = vmatpush1.bf16.msra.mxu0 %v2573_v46  ;;  %2457 = vmatprep.mubr.bf16.mxu0 %v14598_v0  ;;  %v12835_v2 = vpop.permute.xlu0 %4256  ;;  %v12843_v15 = vpop.permute.xlu1 %4258 }
 0x155   : > { %10262 = vmatprep.subr.msk.bf16.mxu0 %vm404_vm1, %v2732_v24 }
 0x156   : > { %6462 = vrot.lane.b32.xlu0 %v12534_v50, %s11852_s16  ;;  %6464 = vrot.lane.b32.xlu1 %v12537_v51, %s11852_s16  ;;  %v6777_v51 = vld [vmem:[%s11921_s8 + $0x1c] sm:$0xff] }
 0x157   : > { %10242 = vmatmul.mubr.msk.bf16.vlgmr.msra.gmra.mrb[0].mxu1 %vm397_vm2, %v11707_v55  ;;  %v12830_v12 = vcombine.low %v6777_v51, %v6777_v51  ;;  %v12837_v40 = vcombine.high %v6777_v51, %v6777_v51  ;;  %v11711_v55 = vld [vmem:[%s14574_s2 + $0xe0] sm:$0xff]  }
 0x158   : > { %2638 = vmatpush1.bf16.msra.mxu1 %v2579_v61  ;;  %2510 = vmatprep.mubr.bf16.mxu1 %v14598_v0  ;;  %v12856_v46 = vpop.permute.xlu0 %4260  ;;  %v12868_v24 = vpop.permute.xlu1 %4262 }
 0x159   : > { %10265 = vmatprep.subr.msk.bf16.mxu1 %vm404_vm1, %v2734_v25  ;;  %v2917_v25 = vsel %vm404_vm1, %v2902_v35, 0  ;;  %v3238_v35 = vsel %vm1702_vm9, %v12584_v6, %v12593_v63  ;;  %v3240_v6 = vsel %vm1702_vm9, %v12598_v7, %v12613_v22 }
 0x15a   : > { %6806 = vrot.lane.b32.xlu0 %v12810_v34, %s11845_s9  ;;  %6808 = vrot.lane.b32.xlu1 %v12823_v1, %s11845_s9 }
 0x15b   : > { %10240 = vmatmul.mubr.msk.bf16.gmra.mrb[4].mxu0 %vm397_vm2, %v11708_v27 }
 0x15c   : > { %2616 = vmatprep.mubr.bf16.mxu0 %v14598_v0  ;;  %v12874_v61 = vpop.permute.xlu0 %4264 }
 0x15e   : > { %6810 = vrot.lane.b32.xlu0 %v12830_v12, %s11845_s9  ;;  %6812 = vrot.lane.b32.xlu1 %v12837_v40, %s11845_s9 }
 0x15f   : > { %10243 = vmatmul.mubr.msk.bf16.gmra.mrb[4].mxu1 %vm397_vm2, %v11708_v27  ;;  %v12890_v27 = vpop.permute.xlu1 %4425 }
 0x160   : > { %2669 = vmatprep.mubr.bf16.mxu1 %v14598_v0  ;;  %v12892_v17 = vpop.permute.xlu0 %4427 }
 0x162   : > { %6814 = vrot.lane.b32.xlu0 %v12840_v8, %s11845_s9  ;;  %6974 = vrot.lane.b32.xlu1 %v12810_v34, %s11846_s10 }
 0x163   : > { %10251 = vmatmul.mubr.msk.bf16.vlgmr.msra.gmra.mrb[0].mxu0 %vm397_vm2, %v11709_v18  ;;  %v12901_v4 = vpop.permute.xlu1 %4429 }
 0x164   : > { %2754 = vmatpush1.bf16.msra.mxu0 %v2742_v26  ;;  %2626 = vmatprep.mubr.bf16.mxu0 %v14598_v0  ;;  %v3069_v26 = vsel %vm1532_vm8, %v12530_v45, %v12540_v52  ;;  %v3071_v45 = vsel %vm1532_vm8, %v12555_v57, %v12566_v60  ;;  %v3239_v52 = vsel %vm1702_vm9, %v12593_v63, %v12598_v7  ;;  %v11714_v60 = vld [vmem:[%s14574_s2 + $0xf8] sm:$0xff]   ;;  %v11717_v7 = vld [vmem:[%s14574_s2 + $0x108] sm:$0xff]  }
 0x165   : > { %10274 = vmatprep.subr.msk.bf16.mxu0 %vm404_vm1, %v2901_v3  ;;  %v3086_v51 = vsel %vm404_vm1, %v3071_v45, 0  ;;  %v3241_v57 = vsel %vm1702_vm9, %v12613_v22, %v12624_v23  ;;  %v3255_v45 = vsel %vm404_vm1, %v3240_v6, 0 }
 0x166   : > { %6976 = vrot.lane.b32.xlu0 %v12823_v1, %s11846_s10  ;;  %6978 = vrot.lane.b32.xlu1 %v12830_v12, %s11846_s10 }
 0x167   : > { %10254 = vmatmul.mubr.msk.bf16.vlgmr.msra.gmra.mrb[0].mxu1 %vm397_vm2, %v11709_v18  ;;  %v12903_v18 = vpop.permute.xlu0 %4431  ;;  %v12917_v3 = vpop.permute.xlu1 %4433 }
 0x168   : > { %2807 = vmatpush1.bf16.msra.mxu1 %v2748_v62  ;;  %2679 = vmatprep.mubr.bf16.mxu1 %v14598_v0  ;;  %v3080_v62 = vsel %vm404_vm1, %v3069_v26, 0  ;;  %v3249_v26 = vsel %vm404_vm1, %v3238_v35, 0  ;;  %v11720_v35 = vld [vmem:[%s14574_s2 + $0x110] sm:$0xff]  }
 0x169   : > { %10277 = vmatprep.subr.msk.bf16.mxu1 %vm404_vm1, %v2903_v11 }
 0x16a   : > { %6980 = vrot.lane.b32.xlu0 %v12837_v40, %s11846_s10  ;;  %6982 = vrot.lane.b32.xlu1 %v12840_v8, %s11846_s10 }
 0x16b   : > { %10252 = vmatmul.mubr.msk.bf16.gmra.mrb[4].mxu0 %vm397_vm2, %v11710_v13  ;;  %v12919_v59 = vpop.permute.xlu0 %4594  ;;  %v12934_v11 = vpop.permute.xlu1 %4596 }
 0x16c   : > { %2785 = vmatprep.mubr.bf16.mxu0 %v14598_v0 }
 0x16e   : > { %7142 = vrot.lane.b32.xlu0 %v12810_v34, %s11847_s11  ;;  %7144 = vrot.lane.b32.xlu1 %v12823_v1, %s11847_s11 }
 0x16f   : > { %10255 = vmatmul.mubr.msk.bf16.gmra.mrb[4].mxu1 %vm397_vm2, %v11710_v13  ;;  %v12936_v13 = vpop.permute.xlu0 %4598  ;;  %v12952_v53 = vpop.permute.xlu1 %4600 }
 0x170   : > { %2838 = vmatprep.mubr.bf16.mxu1 %v14598_v0 }
 0x172   : > { %7146 = vrot.lane.b32.xlu0 %v12830_v12, %s11847_s11  ;;  %7148 = vrot.lane.b32.xlu1 %v12837_v40, %s11847_s11 }
 0x173   : > { %10263 = vmatmul.mubr.msk.bf16.vlgmr.msra.gmra.mrb[0].mxu0 %vm397_vm2, %v11711_v55  ;;  %v12963_v23 = vpop.permute.xlu1 %4763 }
 0x174   : > { %2923 = vmatpush1.bf16.msra.mxu0 %v2911_v21  ;;  %2795 = vmatprep.mubr.bf16.mxu0 %v14598_v0 }
 0x175   : > { %10286 = vmatprep.subr.msk.bf16.mxu0 %vm404_vm1, %v3070_v37  ;;  %v3382_v37 = vld [vmem:[%s11921_s8 + $0x8] sm:$0xff] }
 0x176   : > { %7150 = vrot.lane.b32.xlu0 %v12840_v8, %s11847_s11  ;;  %7310 = vrot.lane.b32.xlu1 %v12810_v34, %s11848_s12 }
 0x177   : > { %10266 = vmatmul.mubr.msk.bf16.vlgmr.msra.gmra.mrb[0].mxu1 %vm397_vm2, %v11711_v55  ;;  %v12954_v55 = vpop.permute.xlu0 %4602 }
 0x178   : > { %2976 = vmatpush1.bf16.msra.mxu1 %v2917_v25  ;;  %2848 = vmatprep.mubr.bf16.mxu1 %v14598_v0  ;;  %v11715_v25 = vld [vmem:[%s14574_s2 + $0x100] sm:$0xff]  }
 0x179   : > { %10289 = vmatprep.subr.msk.bf16.mxu1 %vm404_vm1, %v3072_v39  ;;  %v12980_v39 = vpop.permute.xlu1 %4767 }
 0x17a   : > { %7312 = vrot.lane.b32.xlu0 %v12823_v1, %s11848_s12  ;;  %7314 = vrot.lane.b32.xlu1 %v12830_v12, %s11848_s12 }
 0x17b   : > { %10264 = vmatmul.mubr.msk.bf16.gmra.mrb[4].mxu0 %vm397_vm2, %v11712_v42  ;;  %v12965_v21 = vpop.permute.xlu0 %4765 }
 0x17c   : > { %2954 = vmatprep.mubr.bf16.mxu0 %v14598_v0 }
 0x17d   : > { %v12994_v63 = vpop.permute.xlu1 %4771 }
 0x17e   : > { %7316 = vrot.lane.b32.xlu0 %v12837_v40, %s11848_s12  ;;  %7318 = vrot.lane.b32.xlu1 %v12840_v8, %s11848_s12 }
 0x17f   : > { %10267 = vmatmul.mubr.msk.bf16.gmra.mrb[4].mxu1 %vm397_vm2, %v11712_v42  ;;  %v12982_v42 = vpop.permute.xlu0 %4769 }
 0x180   : > { %3007 = vmatprep.mubr.bf16.mxu1 %v14598_v0 }
 0x181   : > { %v13009_v22 = vpop.permute.xlu1 %5164 }
 0x182   : > { %7478 = vrot.lane.b32.xlu0 %v12810_v34, %s11849_s13  ;;  %7480 = vrot.lane.b32.xlu1 %v12823_v1, %s11849_s13 }
 0x183   : > { %10275 = vmatmul.mubr.msk.bf16.vlgmr.msra.gmra.mrb[0].mxu0 %vm397_vm2, %v11713_v32 }
 0x184   : > { %3092 = vmatpush1.bf16.msra.mxu0 %v3080_v62  ;;  %2964 = vmatprep.mubr.bf16.mxu0 %v14598_v0  ;;  %v12996_v62 = vpop.permute.xlu0 %5162 }
 0x185   : > { %10298 = vmatprep.subr.msk.bf16.mxu0 %vm404_vm1, %v3239_v52 }
 0x186   : > { %7482 = vrot.lane.b32.xlu0 %v12830_v12, %s11849_s13  ;;  %7484 = vrot.lane.b32.xlu1 %v12837_v40, %s11849_s13 }
 0x187   : > { %10278 = vmatmul.mubr.msk.bf16.vlgmr.msra.gmra.mrb[0].mxu1 %vm397_vm2, %v11713_v32  ;;  %v10311_v32 = vcombine.high %v3382_v37, %v3382_v37 }
 0x188   : > { %3145 = vmatpush1.bf16.msra.mxu1 %v3086_v51  ;;  %3017 = vmatprep.mubr.bf16.mxu1 %v14598_v0  ;;  %v13011_v52 = vpop.permute.xlu0 %5166  ;;  %v13021_v51 = vpop.permute.xlu1 %5168 }
 0x189   : > { %10301 = vmatprep.subr.msk.bf16.mxu1 %vm404_vm1, %v3241_v57 }
 0x18a   : > { %7486 = vrot.lane.b32.xlu0 %v12840_v8, %s11849_s13  ;;  %7646 = vrot.lane.b32.xlu1 %v12810_v34, %s11850_s14 }
 0x18b   : > { %10276 = vmatmul.mubr.msk.bf16.gmra.mrb[4].mxu0 %vm397_vm2, %v11714_v60 }
 0x18c   : > { %3123 = vmatprep.mubr.bf16.mxu0 %v14598_v0  ;;  %v13023_v57 = vpop.permute.xlu0 %5170 }
 0x18e   : > { %7648 = vrot.lane.b32.xlu0 %v12823_v1, %s11850_s14  ;;  %7650 = vrot.lane.b32.xlu1 %v12830_v12, %s11850_s14 }
 0x18f   : > { %10279 = vmatmul.mubr.msk.bf16.gmra.mrb[4].mxu1 %vm397_vm2, %v11714_v60  ;;  %v10310_v60 = vcombine.low %v3382_v37, %v3382_v37 }
 0x190   : > { %3176 = vmatprep.mubr.bf16.mxu1 %v14598_v0 }
 0x191   : > { %v3416_v37 = vsel %vm404_vm1, %v10310_v60, 0  ;;  %v3593_v60 = vsel %vm392_vm0, %v12656_v31, %v12671_v36 }
 0x192   : > { %7652 = vrot.lane.b32.xlu0 %v12837_v40, %s11850_s14  ;;  %7654 = vrot.lane.b32.xlu1 %v12840_v8, %s11850_s14 }
 0x193   : > { %10287 = vmatmul.mubr.msk.bf16.vlgmr.msra.gmra.mrb[0].mxu0 %vm397_vm2, %v11715_v25 }
 0x194   : > { %3261 = vmatpush1.bf16.msra.mxu0 %v3249_v26  ;;  %3133 = vmatprep.mubr.bf16.mxu0 %v14598_v0  ;;  %v13036_v26 = vpop.permute.xlu0 %5450 }
 0x195   : > { %10314 = vmatprep.subr.msk.bf16.mxu0 %vm404_vm1, %v10311_v32  ;;  %v3591_v32 = vsel %vm392_vm0, %v12642_v30, %v12651_v20 }
 0x196   : > { %7814 = vrot.lane.b32.xlu0 %v12810_v34, %s11851_s15  ;;  %7816 = vrot.lane.b32.xlu1 %v12823_v1, %s11851_s15 }
 0x197   : > { %10290 = vmatmul.mubr.msk.bf16.vlgmr.msra.gmra.mrb[0].mxu1 %vm397_vm2, %v11715_v25  ;;  %v13034_v25 = vpop.permute.xlu1 %5448 }
 0x198   : > { %3314 = vmatpush1.bf16.msra.mxu1 %v3255_v45  ;;  %3186 = vmatprep.mubr.bf16.mxu1 %v14598_v0  ;;  %v13050_v45 = vpop.permute.xlu0 %5454 }
 0x199   : > { %10317 = vmatprep.subr.msk.bf16.mxu1 %vm404_vm1, %v12194_v14 }
 0x19a   : > { %7818 = vrot.lane.b32.xlu0 %v12830_v12, %s11851_s15  ;;  %7820 = vrot.lane.b32.xlu1 %v12837_v40, %s11851_s15 }
 0x19b   : > { %10288 = vmatmul.mubr.msk.bf16.gmra.mrb[4].mxu0 %vm397_vm2, %v11717_v7  ;;  %v13048_v6 = vpop.permute.xlu1 %5452 }
 0x19c   : > { %3292 = vmatprep.mubr.bf16.mxu0 %v14598_v0 }
 0x19e   : > { %7822 = vrot.lane.b32.xlu0 %v12840_v8, %s11851_s15  ;;  %7982 = vrot.lane.b32.xlu1 %v12810_v34, %s11852_s16 }
 0x19f   : > { %10291 = vmatmul.mubr.msk.bf16.gmra.mrb[4].mxu1 %vm397_vm2, %v11717_v7  ;;  %v13054_v7 = vsel %vm404_vm1, %v12192_v9, 0  ;;  %v13070_v9 = vpop.permute.xlu1 %5456 }
 0x1a0   : > { %3345 = vmatprep.mubr.bf16.mxu1 %v14598_v0 }
 0x1a2   : > { %7984 = vrot.lane.b32.xlu0 %v12823_v1, %s11852_s16  ;;  %7986 = vrot.lane.b32.xlu1 %v12830_v12, %s11852_s16 }
 0x1a3   : > { %10299 = vmatmul.mubr.msk.bf16.vlgmr.msra.gmra.mrb[0].mxu0 %vm397_vm2, %v11720_v35  ;;  %v13081_v36 = vpop.permute.xlu1 %5618 }
 0x1a4   : > { %3428 = vmatpush1.bf16.msra.mxu0 %v3416_v37  ;;  %3302 = vmatprep.mubr.bf16.mxu0 %v14598_v0  ;;  %v11723_v37 = vld [vmem:[%s14574_s2 + $0x118] sm:$0xff]   ;;  %14601 = vst [vmem:[#allocation5_spill] sm:$0xff] %v13081_v36 }
 0x1a5   : > { %10331 = vmatprep.subr.msk.bf16.mxu0 %vm404_vm1, %v3591_v32  ;;  %v13072_v32 = vpop.permute.xlu0 %5616 }
 0x1a6   : > { %14600 = vst [vmem:[#allocation4_spill] sm:$0xff] %v13072_v32  ;;  %v11724_v32 = vld [vmem:[%s14574_s2 + $0x120] sm:$0xff]   ;;  %7988 = vrot.lane.b32.xlu0 %v12837_v40, %s11852_s16  ;;  %7990 = vrot.lane.b32.xlu1 %v12840_v8, %s11852_s16 }
 0x1a7   : > { %10302 = vmatmul.mubr.msk.bf16.vlgmr.msra.gmra.mrb[0].mxu1 %vm397_vm2, %v11720_v35  ;;  %v13097_v36 = vpop.permute.xlu1 %5622 }
 0x1a8   : > { %3481 = vmatpush1.bf16.msra.mxu1 %v13054_v7  ;;  %3355 = vmatprep.mubr.bf16.mxu1 %v14598_v0 }
 0x1a9   : > { %10334 = vmatprep.subr.msk.bf16.mxu1 %vm404_vm1, %v3593_v60  ;;  %v13083_v35 = vpop.permute.xlu0 %5620  ;;  %v3590_v60 = vsel %vm392_vm0, %v12631_v28, %v12642_v30  ;;  %v3592_v28 = vsel %vm392_vm0, %v12651_v20, %v12656_v31  ;;  %v3760_v30 = vsel %vm682_vm3, %v12689_v10, %v12700_v41  ;;  %v3762_v20 = vsel %vm682_vm3, %v12709_v29, %v12714_v43  ;;  %v11725_v31 = vld [vmem:[%s14574_s2 + $0x128] sm:$0xff]  }
 0x1aa   : > { %14602 = vst [vmem:[#allocation6_spill] sm:$0xff] %v13083_v35  ;;  %v3601_v34 = vsel %vm404_vm1, %v3590_v60, 0  ;;  %8332 = vrot.lane.b32.xlu0 %v12527_v44, %s11845_s9  ;;  %v8303_v60 = vld [vmem:[%s11921_s8 + $0x20] sm:$0xff]  ;;  %8334 = vrot.lane.b32.xlu1 %v12534_v50, %s11845_s9 }
 0x1ab   : > { %10300 = vmatmul.mubr.msk.bf16.gmra.mrb[4].mxu0 %vm397_vm2, %v11723_v37  ;;  %v13114_v1 = vpop.permute.xlu1 %5784  ;;  %v13140_v43 = vcombine.low %v8303_v60, %v8303_v60 }
 0x1ac   : > { %3459 = vmatprep.mubr.bf16.mxu0 %v14598_v0  ;;  %14603 = vst [vmem:[#allocation7_spill] sm:$0xff] %v13114_v1 }
 0x1ad   : > { %v13099_v35 = vpop.permute.xlu0 %5624 }
 0x1ae   : > { %8336 = vrot.lane.b32.xlu0 %v13140_v43, %s11845_s9 }
 0x1af   : > { %10303 = vmatmul.mubr.msk.bf16.gmra.mrb[4].mxu1 %vm397_vm2, %v11723_v37  ;;  %v3607_v37 = vsel %vm404_vm1, %v3592_v28, 0  ;;  %v13132_v40 = vpop.permute.xlu1 %5788 }
 0x1b0   : > { %3512 = vmatprep.mubr.bf16.mxu1 %v14598_v0 }
 0x1b1   : > { %v13116_v12 = vpop.permute.xlu0 %5786 }
 0x1b3   : > { %10315 = vmatmul.mubr.msk.bf16.vlgmr.msra.gmra.mrb[0].mxu0 %vm397_vm2, %v11724_v32  ;;  %v13151_v28 = vpop.permute.xlu1 %5792 }
 0x1b4   : > { %3613 = vmatpush1.bf16.msra.mxu0 %v3601_v34  ;;  %3469 = vmatprep.mubr.bf16.mxu0 %v14598_v0  ;;  %v13148_v34 = vld [vmem:[%s11921_s8 + $0x28] ss:$0 sps:$4 sm:$0xff]  }
 0x1b5   : > { %10343 = vmatprep.subr.msk.bf16.mxu0 %vm404_vm1, %v3760_v30  ;;  %v13134_v8 = vpop.permute.xlu0 %5790  ;;  %8340 = vrot.lane.b32.xlu0 %v13148_v34, %s11845_s9 }
 0x1b7   : > { %10318 = vmatmul.mubr.msk.bf16.vlgmr.msra.gmra.mrb[0].mxu1 %vm397_vm2, %v11724_v32  ;;  %v13145_v32 = vcombine.high %v8303_v60, %v8303_v60  ;;  %v13167_v60 = vpop.permute.xlu1 %5954 }
 0x1b8   : > { %3666 = vmatpush1.bf16.msra.mxu1 %v3607_v37  ;;  %3522 = vmatprep.mubr.bf16.mxu1 %v14598_v0  ;;  %v3759_v37 = vsel %vm682_vm3, %v12673_v38, %v12689_v10  ;;  %14605 = vst [vmem:[#allocation9_spill] sm:$0xff] %v13167_v60  ;;  %v3761_v38 = vsel %vm682_vm3, %v12700_v41, %v12709_v29  ;;  %v11727_v29 = vld [vmem:[%s14574_s2 + $0x138] sm:$0xff]  }
 0x1b9   : > { %10346 = vmatprep.subr.msk.bf16.mxu1 %vm404_vm1, %v3762_v20  ;;  %v13153_v30 = vpop.permute.xlu0 %5952  ;;  %8338 = vrot.lane.b32.xlu1 %v13145_v32, %s11845_s9  ;;  %v11726_v20 = vld [vmem:[%s14574_s2 + $0x130] sm:$0xff]   ;;  %v3770_v1 = vsel %vm404_vm1, %v3759_v37, 0  ;;  %v3929_v10 = vsel %vm852_vm4, %v12731_v47, %v12747_v48  ;;  %v3776_v60 = vsel %vm404_vm1, %v3761_v38, 0  ;;  %v3931_v41 = vsel %vm852_vm4, %v12758_v49, %v12767_v19 }
 0x1ba   : > { %14604 = vst [vmem:[#allocation8_spill] sm:$0xff] %v13153_v30  ;;  %8502 = vrot.lane.b32.xlu0 %v12534_v50, %s11846_s10 }
 0x1bb   : > { %10316 = vmatmul.mubr.msk.bf16.gmra.mrb[4].mxu0 %vm397_vm2, %v11725_v31 }
 0x1bc   : > { %3644 = vmatprep.mubr.bf16.mxu0 %v14598_v0 }
 0x1bd   : > { %v13169_v30 = vpop.permute.xlu0 %5956  ;;  %8500 = vrot.lane.b32.xlu1 %v12527_v44, %s11846_s10 }
 0x1be   : > { %8506 = vrot.lane.b32.xlu0 %v13145_v32, %s11846_s10 }
 0x1bf   : > { %10319 = vmatmul.mubr.msk.bf16.gmra.mrb[4].mxu1 %vm397_vm2, %v11725_v31  ;;  %v13184_v31 = vpop.permute.xlu1 %5958 }
 0x1c0   : > { %3697 = vmatprep.mubr.bf16.mxu1 %v14598_v0 }
 0x1c1   : > { %v13186_v37 = vpop.permute.xlu0 %5960  ;;  %8504 = vrot.lane.b32.xlu1 %v13140_v43, %s11846_s10 }
 0x1c2   : > { %8668 = vrot.lane.b32.xlu0 %v12527_v44, %s11847_s11 }
 0x1c3   : > { %10332 = vmatmul.mubr.msk.bf16.vlgmr.msra.gmra.mrb[0].mxu0 %vm397_vm2, %v11726_v20 }
 0x1c4   : > { %3782 = vmatpush1.bf16.msra.mxu0 %v3770_v1  ;;  %3654 = vmatprep.mubr.bf16.mxu0 %v14598_v0  ;;  %v13202_v1 = vpop.permute.xlu1 %6120 }
 0x1c5   : > { %10355 = vmatprep.subr.msk.bf16.mxu0 %vm404_vm1, %v3929_v10  ;;  %14606 = vst [vmem:[#allocation10_spill] sm:$0xff] %v13202_v1  ;;  %v13204_v38 = vpop.permute.xlu0 %6122  ;;  %8508 = vrot.lane.b32.xlu1 %v13148_v34, %s11846_s10  ;;  %v11728_v10 = vld [vmem:[%s14574_s2 + $0x140] sm:$0xff]  }
 0x1c6   : > { %8672 = vrot.lane.b32.xlu0 %v13140_v43, %s11847_s11 }
 0x1c7   : > { %10335 = vmatmul.mubr.msk.bf16.vlgmr.msra.gmra.mrb[0].mxu1 %vm397_vm2, %v11726_v20 }
 0x1c8   : > { %3835 = vmatpush1.bf16.msra.mxu1 %v3776_v60  ;;  %3707 = vmatprep.mubr.bf16.mxu1 %v14598_v0  ;;  %v13213_v19 = vpop.permute.xlu1 %6124  ;;  %v3928_v60 = vsel %vm852_vm4, %v12725_v56, %v12731_v47  ;;  %v3930_v56 = vsel %vm852_vm4, %v12747_v48, %v12758_v49  ;;  %v4098_v47 = vsel %vm1022_vm5, %v12783_v54, %v12788_v58  ;;  %v11729_v49 = vld [vmem:[%s14574_s2 + $0x148] sm:$0xff]  }
 0x1c9   : > { %10358 = vmatprep.subr.msk.bf16.mxu1 %vm404_vm1, %v3931_v41  ;;  %v13215_v20 = vpop.permute.xlu0 %6126  ;;  %8670 = vrot.lane.b32.xlu1 %v12534_v50, %s11847_s11  ;;  %v4100_v48 = vsel %vm1022_vm5, %v12806_v33, %v12815_v5 }
 0x1ca   : > { %14607 = vst [vmem:[#allocation11_spill] sm:$0xff] %v13215_v20  ;;  %v3939_v20 = vsel %vm404_vm1, %v3928_v60, 0  ;;  %8676 = vrot.lane.b32.xlu0 %v13148_v34, %s11847_s11 }
 0x1cb   : > { %10333 = vmatmul.mubr.msk.bf16.gmra.mrb[4].mxu0 %vm397_vm2, %v11727_v29 }
 0x1cc   : > { %3813 = vmatprep.mubr.bf16.mxu0 %v14598_v0  ;;  %v13229_v41 = vpop.permute.xlu1 %6128 }
 0x1cd   : > { %v13231_v1 = vpop.permute.xlu0 %6288  ;;  %8674 = vrot.lane.b32.xlu1 %v13145_v32, %s11847_s11 }
 0x1ce   : > { %14608 = vst [vmem:[#allocation12_spill] sm:$0xff] %v13231_v1  ;;  %v3945_v1 = vsel %vm404_vm1, %v3930_v56, 0  ;;  %8838 = vrot.lane.b32.xlu0 %v12534_v50, %s11848_s12 }
 0x1cf   : > { %10336 = vmatmul.mubr.msk.bf16.gmra.mrb[4].mxu1 %vm397_vm2, %v11727_v29 }
 0x1d0   : > { %3866 = vmatprep.mubr.bf16.mxu1 %v14598_v0  ;;  %v13246_v29 = vpop.permute.xlu1 %6290 }
 0x1d1   : > { %v13248_v60 = vpop.permute.xlu0 %6292  ;;  %8836 = vrot.lane.b32.xlu1 %v12527_v44, %s11848_s12 }
 0x1d2   : > { %8842 = vrot.lane.b32.xlu0 %v13145_v32, %s11848_s12 }
 0x1d3   : > { %10344 = vmatmul.mubr.msk.bf16.vlgmr.msra.gmra.mrb[0].mxu0 %vm397_vm2, %v11728_v10 }
 0x1d4   : > { %3951 = vmatpush1.bf16.msra.mxu0 %v3939_v20  ;;  %3823 = vmatprep.mubr.bf16.mxu0 %v14598_v0  ;;  %v13264_v20 = vpop.permute.xlu1 %6294 }
 0x1d5   : > { %10367 = vmatprep.subr.msk.bf16.mxu0 %vm404_vm1, %v4098_v47  ;;  %v13266_v56 = vpop.permute.xlu0 %6296  ;;  %8840 = vrot.lane.b32.xlu1 %v13140_v43, %s11848_s12  ;;  %v11730_v47 = vld [vmem:[%s14574_s2 + $0x150] sm:$0xff]  }
 0x1d6   : > { %9004 = vrot.lane.b32.xlu0 %v12527_v44, %s11849_s13 }
 0x1d7   : > { %10347 = vmatmul.mubr.msk.bf16.vlgmr.msra.gmra.mrb[0].mxu1 %vm397_vm2, %v11728_v10  ;;  %v4097_v10 = vsel %vm1022_vm5, %v12771_v16, %v12783_v54  ;;  %v4099_v16 = vsel %vm1022_vm5, %v12788_v58, %v12806_v33  ;;  %v4267_v54 = vsel %vm1192_vm6, %v12843_v15, %v12856_v46  ;;  %v4269_v58 = vsel %vm1192_vm6, %v12868_v24, %v12874_v61  ;;  %v11734_v33 = vld [vmem:[%s14574_s2 + $0x158] sm:$0xff]  }
 0x1d8   : > { %4004 = vmatpush1.bf16.msra.mxu1 %v3945_v1  ;;  %3876 = vmatprep.mubr.bf16.mxu1 %v14598_v0  ;;  %v13275_v5 = vpop.permute.xlu1 %6456 }
 0x1d9   : > { %10370 = vmatprep.subr.msk.bf16.mxu1 %vm404_vm1, %v4100_v48  ;;  %14609 = vst [vmem:[#allocation13_spill] sm:$0xff] %v13275_v5  ;;  %v13277_v1 = vpop.permute.xlu0 %6458  ;;  %8844 = vrot.lane.b32.xlu1 %v13148_v34, %s11848_s12 }
 0x1da   : > { %14610 = vst [vmem:[#allocation14_spill] sm:$0xff] %v13277_v1  ;;  %v4108_v1 = vsel %vm404_vm1, %v4097_v10, 0  ;;  %9008 = vrot.lane.b32.xlu0 %v13140_v43, %s11849_s13 }
 0x1db   : > { %10345 = vmatmul.mubr.msk.bf16.gmra.mrb[4].mxu0 %vm397_vm2, %v11729_v49 }
 0x1dc   : > { %3982 = vmatprep.mubr.bf16.mxu0 %v14598_v0  ;;  %v13291_v48 = vpop.permute.xlu1 %6460 }
 0x1dd   : > { %v13293_v5 = vpop.permute.xlu0 %6462  ;;  %9006 = vrot.lane.b32.xlu1 %v12534_v50, %s11849_s13 }
 0x1de   : > { %14611 = vst [vmem:[#allocation15_spill] sm:$0xff] %v13293_v5  ;;  %v4114_v5 = vsel %vm404_vm1, %v4099_v16, 0  ;;  %9012 = vrot.lane.b32.xlu0 %v13148_v34, %s11849_s13 }
 0x1df   : > { %10348 = vmatmul.mubr.msk.bf16.gmra.mrb[4].mxu1 %vm397_vm2, %v11729_v49 }
 0x1e0   : > { %4035 = vmatprep.mubr.bf16.mxu1 %v14598_v0  ;;  %v13308_v49 = vpop.permute.xlu1 %6464 }
 0x1e1   : > { %v13310_v10 = vpop.permute.xlu0 %6806  ;;  %9010 = vrot.lane.b32.xlu1 %v13145_v32, %s11849_s13 }
 0x1e2   : > { %14612 = vst [vmem:[#allocation16_spill] sm:$0xff] %v13310_v10  ;;  %9174 = vrot.lane.b32.xlu0 %v12534_v50, %s11850_s14 }
 0x1e3   : > { %10356 = vmatmul.mubr.msk.bf16.vlgmr.msra.gmra.mrb[0].mxu0 %vm397_vm2, %v11730_v47 }
 0x1e4   : > { %4120 = vmatpush1.bf16.msra.mxu0 %v4108_v1  ;;  %3992 = vmatprep.mubr.bf16.mxu0 %v14598_v0  ;;  %v13326_v1 = vpop.permute.xlu1 %6808 }
 0x1e5   : > { %10379 = vmatprep.subr.msk.bf16.mxu0 %vm404_vm1, %v4267_v54  ;;  %v13328_v16 = vpop.permute.xlu0 %6810  ;;  %9172 = vrot.lane.b32.xlu1 %v12527_v44, %s11850_s14  ;;  %v11737_v54 = vld [vmem:[%s14574_s2 + $0x160] sm:$0xff]  }
 0x1e6   : > { %9178 = vrot.lane.b32.xlu0 %v13145_v32, %s11850_s14 }
 0x1e7   : > { %10359 = vmatmul.mubr.msk.bf16.vlgmr.msra.gmra.mrb[0].mxu1 %vm397_vm2, %v11730_v47  ;;  %v4266_v47 = vsel %vm1192_vm6, %v12835_v2, %v12843_v15  ;;  %v4268_v2 = vsel %vm1192_vm6, %v12856_v46, %v12868_v24  ;;  %v4436_v15 = vsel %vm1362_vm7, %v12892_v17, %v12901_v4 }
 0x1e8   : > { %4173 = vmatpush1.bf16.msra.mxu1 %v4114_v5  ;;  %4045 = vmatprep.mubr.bf16.mxu1 %v14598_v0  ;;  %v13337_v61 = vpop.permute.xlu1 %6812 }
 0x1e9   : > { %10382 = vmatprep.subr.msk.bf16.mxu1 %vm404_vm1, %v4269_v58  ;;  %14613 = vst [vmem:[#allocation17_spill] sm:$0xff] %v13337_v61  ;;  %v13339_v5 = vpop.permute.xlu0 %6814  ;;  %9176 = vrot.lane.b32.xlu1 %v13140_v43, %s11850_s14  ;;  %v4277_v61 = vsel %vm404_vm1, %v4266_v47, 0 }
 0x1ea   : > { %9340 = vrot.lane.b32.xlu0 %v12527_v44, %s11851_s15 }
 0x1eb   : > { %10357 = vmatmul.mubr.msk.bf16.gmra.mrb[4].mxu0 %vm397_vm2, %v11734_v33 }
 0x1ec   : > { %4151 = vmatprep.mubr.bf16.mxu0 %v14598_v0  ;;  %v13353_v58 = vpop.permute.xlu1 %6974 }
 0x1ed   : > { %14614 = vst [vmem:[#allocation18_spill] sm:$0xff] %v13353_v58  ;;  %v13355_v10 = vpop.permute.xlu0 %6976  ;;  %9180 = vrot.lane.b32.xlu1 %v13148_v34, %s11850_s14  ;;  %v4283_v58 = vsel %vm404_vm1, %v4268_v2, 0  ;;  %v11738_v2 = vld [vmem:[%s14574_s2 + $0x168] sm:$0xff]  }
 0x1ee   : > { %14615 = vst [vmem:[#allocation19_spill] sm:$0xff] %v13355_v10  ;;  %9344 = vrot.lane.b32.xlu0 %v13140_v43, %s11851_s15 }
 0x1ef   : > { %10360 = vmatmul.mubr.msk.bf16.gmra.mrb[4].mxu1 %vm397_vm2, %v11734_v33 }
 0x1f0   : > { %4204 = vmatprep.mubr.bf16.mxu1 %v14598_v0  ;;  %v6979_v33 = vpop.permute.xlu1 %6978 }
 0x1f1   : > { %v6981_v47 = vpop.permute.xlu0 %6980  ;;  %v13374_v46 = vsel %vm682_vm3, %v13355_v10, %v6979_v33  ;;  %9342 = vrot.lane.b32.xlu1 %v12534_v50, %s11851_s15 }
 0x1f2   : > { %v13379_v24 = vsel %vm682_vm3, %v6979_v33, %v6981_v47  ;;  %9348 = vrot.lane.b32.xlu0 %v13148_v34, %s11851_s15 }
 0x1f3   : > { %10368 = vmatmul.mubr.msk.bf16.vlgmr.msra.gmra.mrb[0].mxu0 %vm397_vm2, %v11737_v54 }
 0x1f4   : > { %4289 = vmatpush1.bf16.msra.mxu0 %v4277_v61  ;;  %4161 = vmatprep.mubr.bf16.mxu0 %v14598_v0  ;;  %v4438_v61 = vsel %vm1362_vm7, %v12903_v18, %v12917_v3 }
 0x1f5   : > { %10391 = vmatprep.subr.msk.bf16.mxu0 %vm404_vm1, %v4436_v15  ;;  %v6983_v15 = vpop.permute.xlu1 %6982  ;;  %v7143_v10 = vpop.permute.xlu0 %7142  ;;  %9346 = vrot.lane.b32.xlu1 %v13145_v32, %s11851_s15 }
 0x1f6   : > { %v13393_v33 = vsel %vm682_vm3, %v6981_v47, %v6983_v15  ;;  %v11739_v15 = vld [vmem:[%s14574_s2 + $0x170] sm:$0xff]   ;;  %9510 = vrot.lane.b32.xlu0 %v12534_v50, %s11852_s16 }
 0x1f7   : > { %10371 = vmatmul.mubr.msk.bf16.vlgmr.msra.gmra.mrb[0].mxu1 %vm397_vm2, %v11737_v54 }
 0x1f8   : > { %4342 = vmatpush1.bf16.msra.mxu1 %v4283_v58  ;;  %4214 = vmatprep.mubr.bf16.mxu1 %v14598_v0 }
 0x1f9   : > { %10394 = vmatprep.subr.msk.bf16.mxu1 %vm404_vm1, %v4438_v61  ;;  %v7145_v3 = vpop.permute.xlu1 %7144  ;;  %v7147_v54 = vpop.permute.xlu0 %7146  ;;  %9508 = vrot.lane.b32.xlu1 %v12527_v44, %s11852_s16  ;;  %v4435_v61 = vsel %vm1362_vm7, %v12890_v27, %v12892_v17  ;;  %v4437_v17 = vsel %vm1362_vm7, %v12901_v4, %v12903_v18  ;;  %v4607_v18 = vsel %vm1532_vm8, %v12952_v53, %v12954_v55 }
 0x1fa   : > { %v13402_v58 = vsel %vm852_vm4, %v7143_v10, %v7145_v3  ;;  %v13407_v47 = vsel %vm852_vm4, %v7145_v3, %v7147_v54  ;;  %v4446_v3 = vsel %vm404_vm1, %v4435_v61, 0  ;;  %9514 = vrot.lane.b32.xlu0 %v13145_v32, %s11852_s16  ;;  %v343_v32 = vld [vmem:[%s14575_s3] sm:$0xff]  ;;  %v11740_v61 = vld [vmem:[%s14574_s2 + $0x178] sm:$0xff]  }
 0x1fb   : > { %10369 = vmatmul.mubr.msk.bf16.gmra.mrb[4].mxu0 %vm397_vm2, %v11738_v2  ;;  %14616 = vst [vmem:[#allocation20_spill] sm:$0xff] %v13402_v58  ;;  %14617 = vst [vmem:[#allocation21_spill] sm:$0xff] %v13407_v47 }
 0x1fc   : > { %4320 = vmatprep.mubr.bf16.mxu0 %v14598_v0 }
 0x1fd   : > { %v7149_v10 = vpop.permute.xlu1 %7148  ;;  %v7151_v58 = vpop.permute.xlu0 %7150  ;;  %9512 = vrot.lane.b32.xlu1 %v13140_v43, %s11852_s16 }
 0x1fe   : > { %v13421_v47 = vsel %vm852_vm4, %v7147_v54, %v7149_v10  ;;  %v13426_v27 = vsel %vm852_vm4, %v7149_v10, %v7151_v58  ;;  %v4452_v58 = vsel %vm404_vm1, %v4437_v17, 0  ;;  %4919 = vperm.xlu0 %11668, %v343_v32   ;;  %v344_v10 = vld [vmem:[%s14575_s3 + $0x8] sm:$0xff]  ;;  %v345_v17 = vld [vmem:[%s14575_s3 + $0x10] sm:$0xff]  ;;  %v346_v32 = vld [vmem:[%s14575_s3 + $0x18] sm:$0xff] }
 0x1ff   : > { %10372 = vmatmul.mubr.msk.bf16.gmra.mrb[4].mxu1 %vm397_vm2, %v11738_v2  ;;  %v4605_v2 = vsel %vm1532_vm8, %v12934_v11, %v12936_v13 }
 0x200   : > { %4373 = vmatprep.mubr.bf16.mxu1 %v14598_v0 }
 0x201   : > { %v7311_v43 = vpop.permute.xlu1 %7310  ;;  %v7313_v54 = vpop.permute.xlu0 %7312  ;;  %9516 = vrot.lane.b32.xlu1 %v13148_v34, %s11852_s16 }
 0x202   : > { %v13443_v4 = vsel %vm1022_vm5, %v7311_v43, %v7313_v54  ;;  %4934 = vperm.xlu0 %11668, %v346_v32  }
 0x203   : > { %10380 = vmatmul.mubr.msk.bf16.vlgmr.msra.gmra.mrb[0].mxu0 %vm397_vm2, %v11739_v15 }
 0x204   : > { %4458 = vmatpush1.bf16.msra.mxu0 %v4446_v3  ;;  %4330 = vmatprep.mubr.bf16.mxu0 %v14598_v0 }
 0x205   : > { %10403 = vmatprep.subr.msk.bf16.mxu0 %vm404_vm1, %v4605_v2  ;;  %v7315_v34 = vpop.permute.xlu1 %7314  ;;  %v7317_v55 = vpop.permute.xlu0 %7316  ;;  %4924 = vperm.xlu1 %11669, %v344_v10  }
 0x206   : > { %v13461_v3 = vsel %vm1022_vm5, %v7313_v54, %v7315_v34  ;;  %v4604_v54 = vsel %vm1532_vm8, %v12919_v59, %v12934_v11  ;;  %v4606_v11 = vsel %vm1532_vm8, %v12936_v13, %v12952_v53  ;;  %v4776_v53 = vsel %vm1702_vm9, %v12982_v42, %v12994_v63 }
 0x207   : > { %10383 = vmatmul.mubr.msk.bf16.vlgmr.msra.gmra.mrb[0].mxu1 %vm397_vm2, %v11739_v15  ;;  %v13464_v15 = vsel %vm1022_vm5, %v7315_v34, %v7317_v55 }
 0x208   : > { %4511 = vmatpush1.bf16.msra.mxu1 %v4452_v58  ;;  %4383 = vmatprep.mubr.bf16.mxu1 %v14598_v0 }
 0x209   : > { %10406 = vmatprep.subr.msk.bf16.mxu1 %vm404_vm1, %v4607_v18  ;;  %v7319_v2 = vpop.permute.xlu1 %7318  ;;  %v7479_v43 = vpop.permute.xlu0 %7478  ;;  %4929 = vperm.xlu1 %11669, %v345_v17   ;;  %v11741_v18 = vld [vmem:[%s14574_s2 + $0x180] sm:$0xff]  }
 0x20a   : > { %v13472_v58 = vsel %vm1022_vm5, %v7317_v55, %v7319_v2  ;;  %v4615_v55 = vsel %vm404_vm1, %v4604_v54, 0 }
 0x20b   : > { %10381 = vmatmul.mubr.msk.bf16.gmra.mrb[4].mxu0 %vm397_vm2, %v11740_v61 }
 0x20c   : > { %4489 = vmatprep.mubr.bf16.mxu0 %v14598_v0 }
 0x20d   : > { %v7481_v34 = vpop.permute.xlu1 %7480  ;;  %v7483_v10 = vpop.permute.xlu0 %7482 }
 0x20e   : > { %v13487_v17 = vsel %vm1192_vm6, %v7479_v43, %v7481_v34  ;;  %v13490_v59 = vsel %vm1192_vm6, %v7481_v34, %v7483_v10  ;;  %v4621_v43 = vsel %vm404_vm1, %v4606_v11, 0  ;;  %v11742_v34 = vld [vmem:[%s14574_s2 + $0x188] sm:$0xff]  }
 0x20f   : > { %10384 = vmatmul.mubr.msk.bf16.gmra.mrb[4].mxu1 %vm397_vm2, %v11740_v61  ;;  %v4774_v61 = vsel %vm1702_vm9, %v12965_v21, %v12980_v39 }
 0x210   : > { %4542 = vmatprep.mubr.bf16.mxu1 %v14598_v0 }
 0x211   : > { %v7485_v2 = vpop.permute.xlu1 %7484  ;;  %v7487_v54 = vpop.permute.xlu0 %7486 }
 0x212   : > { %v13503_v32 = vsel %vm1192_vm6, %v7483_v10, %v7485_v2  ;;  %v13506_v13 = vsel %vm1192_vm6, %v7485_v2, %v7487_v54  ;;  %v4773_v54 = vsel %vm1702_vm9, %v12963_v23, %v12965_v21  ;;  %v5173_v23 = vsel %vm392_vm0, %v13009_v22, %v13011_v52 }
 0x213   : > { %10392 = vmatmul.mubr.msk.bf16.vlgmr.msra.gmra.mrb[0].mxu0 %vm397_vm2, %v11741_v18 }
 0x214   : > { %4627 = vmatpush1.bf16.msra.mxu0 %v4615_v55  ;;  %4499 = vmatprep.mubr.bf16.mxu0 %v14598_v0 }
 0x215   : > { %10415 = vmatprep.subr.msk.bf16.mxu0 %vm404_vm1, %v4774_v61  ;;  %v7647_v55 = vpop.permute.xlu1 %7646  ;;  %v7649_v11 = vpop.permute.xlu0 %7648 }
 0x216   : > { %v13518_v10 = vsel %vm1362_vm7, %v7647_v55, %v7649_v11 }
 0x217   : > { %10395 = vmatmul.mubr.msk.bf16.vlgmr.msra.gmra.mrb[0].mxu1 %vm397_vm2, %v11741_v18  ;;  %14618 = vst [vmem:[#allocation22_spill] sm:$0xff] %v13518_v10 }
 0x218   : > { %4680 = vmatpush1.bf16.msra.mxu1 %v4621_v43  ;;  %4552 = vmatprep.mubr.bf16.mxu1 %v14598_v0  ;;  %v11743_v43 = vld [vmem:[%s14574_s2 + $0x190] sm:$0xff]  }
 0x219   : > { %10418 = vmatprep.subr.msk.bf16.mxu1 %vm404_vm1, %v4776_v53  ;;  %v7651_v63 = vpop.permute.xlu1 %7650  ;;  %v7653_v18 = vpop.permute.xlu0 %7652 }
 0x21a   : > { %v13523_v61 = vsel %vm1362_vm7, %v7649_v11, %v7651_v63  ;;  %v13526_v2 = vsel %vm1362_vm7, %v7651_v63, %v7653_v18  ;;  %v4784_v11 = vsel %vm404_vm1, %v4773_v54, 0  ;;  %v4775_v63 = vsel %vm1702_vm9, %v12980_v39, %v12982_v42 }
 0x21b   : > { %10393 = vmatmul.mubr.msk.bf16.gmra.mrb[4].mxu0 %vm397_vm2, %v11742_v34  ;;  %v4790_v54 = vsel %vm404_vm1, %v4775_v63, 0  ;;  %v5175_v42 = vsel %vm392_vm0, %v13021_v51, %v13023_v57 }
 0x21c   : > { %4658 = vmatprep.mubr.bf16.mxu0 %v14598_v0 }
 0x21d   : > { %v7655_v53 = vpop.permute.xlu1 %7654  ;;  %v7815_v55 = vpop.permute.xlu0 %7814 }
 0x21e   : > { %v13538_v10 = vsel %vm1362_vm7, %v7653_v18, %v7655_v53  ;;  %v11744_v53 = vld [vmem:[%s14574_s2 + $0x198] sm:$0xff]  }
 0x21f   : > { %10396 = vmatmul.mubr.msk.bf16.gmra.mrb[4].mxu1 %vm397_vm2, %v11742_v34 }
 0x220   : > { %4711 = vmatprep.mubr.bf16.mxu1 %v14598_v0 }
 0x221   : > { %v7817_v21 = vpop.permute.xlu1 %7816  ;;  %v7819_v34 = vpop.permute.xlu0 %7818 }
 0x222   : > { %v13551_v18 = vsel %vm1532_vm8, %v7815_v55, %v7817_v21  ;;  %v13554_v39 = vsel %vm1532_vm8, %v7817_v21, %v7819_v34 }
 0x223   : > { %10404 = vmatmul.mubr.msk.bf16.vlgmr.msra.gmra.mrb[0].mxu0 %vm397_vm2, %v11743_v43 }
 0x224   : > { %4796 = vmatpush1.bf16.msra.mxu0 %v4784_v11  ;;  %4668 = vmatprep.mubr.bf16.mxu0 %v14598_v0 }
 0x225   : > { %10440 = vmatprep.subr.msk.bf16.mxu0 %vm404_vm1, %v5173_v23  ;;  %v7821_v11 = vpop.permute.xlu1 %7820  ;;  %v7823_v63 = vpop.permute.xlu0 %7822 }
 0x226   : > { %v13566_v55 = vsel %vm1532_vm8, %v7819_v34, %v7821_v11  ;;  %v13569_v23 = vsel %vm1532_vm8, %v7821_v11, %v7823_v63  ;;  %v11745_v34 = vld [vmem:[%s14574_s2 + $0x1a0] sm:$0xff]  }
 0x227   : > { %10407 = vmatmul.mubr.msk.bf16.vlgmr.msra.gmra.mrb[0].mxu1 %vm397_vm2, %v11743_v43  ;;  %14619 = vst [vmem:[#allocation23_spill] sm:$0xff] %v13566_v55 }
 0x228   : > { %4849 = vmatpush1.bf16.msra.mxu1 %v4790_v54  ;;  %4721 = vmatprep.mubr.bf16.mxu1 %v14598_v0  ;;  %v5172_v54 = vsel %vm392_vm0, %v12996_v62, %v13009_v22  ;;  %v5174_v62 = vsel %vm392_vm0, %v13011_v52, %v13021_v51  ;;  %v11747_v52 = vld [vmem:[%s14574_s2 + $0x1a8] sm:$0xff]  }
 0x229   : > { %10443 = vmatprep.subr.msk.bf16.mxu1 %vm404_vm1, %v5175_v42  ;;  %v7983_v57 = vpop.permute.xlu1 %7982  ;;  %v7985_v43 = vpop.permute.xlu0 %7984  ;;  %v5183_v63 = vsel %vm404_vm1, %v5172_v54, 0 }
 0x22a   : > { %v13574_v21 = vsel %vm1702_vm9, %v7983_v57, %v7985_v43 }
 0x22b   : > { %10405 = vmatmul.mubr.msk.bf16.gmra.mrb[4].mxu0 %vm397_vm2, %v11744_v53  ;;  %14620 = vst [vmem:[#allocation24_spill] sm:$0xff] %v13574_v21  ;;  %v5189_v21 = vsel %vm404_vm1, %v5174_v62, 0 }
 0x22c   : > { %4827 = vmatprep.mubr.bf16.mxu0 %v14598_v0 }
 0x22d   : > { %v7987_v42 = vpop.permute.xlu1 %7986  ;;  %v7989_v11 = vpop.permute.xlu0 %7988 }
 0x22e   : > { %v13586_v55 = vsel %vm1702_vm9, %v7985_v43, %v7987_v42  ;;  %v13589_v57 = vsel %vm1702_vm9, %v7987_v42, %v7989_v11 }
 0x22f   : > { %10408 = vmatmul.mubr.msk.bf16.gmra.mrb[4].mxu1 %vm397_vm2, %v11744_v53 }
 0x230   : > { %4880 = vmatprep.mubr.bf16.mxu1 %v14598_v0 }
 0x231   : > { %v7991_v22 = vpop.permute.xlu1 %7990  ;;  %v8333_v53 = vpop.permute.xlu0 %8332 }
 0x232   : > { %v13600_v43 = vsel %vm1702_vm9, %v7989_v11, %v7991_v22 }
 0x233   : > { %10416 = vmatmul.mubr.msk.bf16.vlgmr.msra.gmra.mrb[0].mxu0 %vm397_vm2, %v11745_v34 }
 0x234   : > { %5195 = vmatpush1.bf16.msra.mxu0 %v5183_v63  ;;  %4837 = vmatprep.mubr.bf16.mxu0 %v14598_v0 }
 0x235   : > { %10448 = vmatprep.subr.msk.bf16.mxu0 %vm404_vm1, %v12194_v14  ;;  %v8335_v51 = vpop.permute.xlu1 %8334  ;;  %v8337_v54 = vpop.permute.xlu0 %8336 }
 0x236   : > { %v13610_v42 = vsel %vm392_vm0, %v8333_v53, %v8335_v51  ;;  %v13613_v14 = vsel %vm392_vm0, %v8335_v51, %v8337_v54  ;;  %v5459_v51 = vsel %vm682_vm3, %v13036_v26, %v13048_v6 }
 0x237   : > { %10419 = vmatmul.mubr.msk.bf16.vlgmr.msra.gmra.mrb[0].mxu1 %vm397_vm2, %v11745_v34 }
 0x238   : > { %5248 = vmatpush1.bf16.msra.mxu1 %v5189_v21  ;;  %4890 = vmatprep.mubr.bf16.mxu1 %v14598_v0 }
 0x239   : > { %10451 = vmatprep.subr.msk.bf16.mxu1 %vm404_vm1, %v12534_v50  ;;  %v8339_v34 = vpop.permute.xlu1 %8338  ;;  %v8341_v11 = vpop.permute.xlu0 %8340  ;;  %v11750_v50 = vld [vmem:[%s14574_s2 + $0x10] sm:$0xff]  }
 0x23a   : > { %v13618_v21 = vsel %vm392_vm0, %v8337_v54, %v8339_v34  ;;  %v13621_v63 = vsel %vm392_vm0, %v8339_v34, %v8341_v11  ;;  %v5323_v34 = vsel %vm404_vm1, %v12527_v44, 0 }
 0x23b   : > { %10417 = vmatmul.mubr.msk.bf16.gmra.mrb[4].mxu0 %vm397_vm2, %v11747_v52 }
 0x23c   : > { %5226 = vmatprep.mubr.bf16.mxu0 %v14598_v0 }
 0x23d   : > { %v8501_v62 = vpop.permute.xlu1 %8500  ;;  %v8503_v22 = vpop.permute.xlu0 %8502 }
 0x23e   : > { %v13629_v53 = vsel %vm682_vm3, %v8501_v62, %v8503_v22 }
 0x23f   : > { %10420 = vmatmul.mubr.msk.bf16.gmra.mrb[4].mxu1 %vm397_vm2, %v11747_v52  ;;  %14621 = vst [vmem:[#allocation25_spill] sm:$0xff] %v13629_v53  ;;  %v5461_v53 = vsel %vm682_vm3, %v13050_v45, %v13070_v9 }
 0x240   : > { %5279 = vmatprep.mubr.bf16.mxu1 %v14598_v0 }
 0x241   : > { %v8505_v52 = vpop.permute.xlu1 %8504  ;;  %v8507_v54 = vpop.permute.xlu0 %8506 }
 0x242   : > { %v13641_v11 = vsel %vm682_vm3, %v8503_v22, %v8505_v52  ;;  %v13644_v62 = vsel %vm682_vm3, %v8505_v52, %v8507_v54 }
 0x243   : > { %10441 = vmatmul.mubr.msk.bf16.vlgmr.msra.gmra.mrb[8].mxu0 %vm397_vm2, %v11750_v50  ;;  %14622 = vst [vmem:[#allocation26_spill] sm:$0xff] %v13644_v62  ;;  %v5458_v62 = vsel %vm682_vm3, %v13034_v25, %v13036_v26  ;;  %v5460_v25 = vsel %vm682_vm3, %v13048_v6, %v13050_v45  ;;  %v14626_v26 = vld [vmem:[#allocation6_spill] sm:$0xff]  ;;  %v5629_v6 = vsel %vm852_vm4, %v13097_v36, %v13099_v35  ;;  %v11753_v45 = vld [vmem:[%s14574_s2 + $0x8] sm:$0xff]  }
 0x244   : > { %5329 = vmatpush1.bf16.msra.mxu0 %v13054_v7  ;;  %5236 = vmatprep.mubr.bf16.mxu0 %v14598_v0  ;;  %v11751_v7 = vld [vmem:[%s14574_s2 + $0x18] sm:$0xff]  }
 0x245   : > { %10460 = vmatprep.subr.msk.bf16.mxu0 %vm404_vm1, %v5459_v51  ;;  %v8509_v44 = vpop.permute.xlu1 %8508  ;;  %v8669_v51 = vpop.permute.xlu0 %8668 }
 0x246   : > { %v13656_v22 = vsel %vm682_vm3, %v8507_v54, %v8509_v44 }
 0x247   : > { %10444 = vmatmul.mubr.msk.bf16.vlgmr.msra.gmra.mrb[8].mxu1 %vm397_vm2, %v11750_v50  ;;  %14623 = vst [vmem:[#allocation27_spill] sm:$0xff] %v13656_v22 }
 0x248   : > { %5382 = vmatpush1.bf16.msra.mxu1 %v5323_v34  ;;  %5289 = vmatprep.mubr.bf16.mxu1 %v14598_v0 }
 0x249   : > { %10463 = vmatprep.subr.msk.bf16.mxu1 %vm404_vm1, %v5461_v53  ;;  %v8671_v9 = vpop.permute.xlu1 %8670  ;;  %v8673_v50 = vpop.permute.xlu0 %8672  ;;  %v11752_v53 = vld [vmem:[%s14574_s2] sm:$0xff]  }
 0x24a   : > { %v13661_v52 = vsel %vm852_vm4, %v8669_v51, %v8671_v9  ;;  %v13664_v34 = vsel %vm852_vm4, %v8671_v9, %v8673_v50  ;;  %v5469_v51 = vsel %vm404_vm1, %v5458_v62, 0 }
 0x24b   : > { %10442 = vmatmul.mubr.msk.bf16.gmra.mrb[12].mxu0 %vm397_vm2, %v11751_v7  ;;  %14624 = vst [vmem:[#allocation28_spill] sm:$0xff] %v13661_v52  ;;  %14625 = vst [vmem:[#allocation29_spill] sm:$0xff] %v13664_v34 }
 0x24c   : > { %5360 = vmatprep.mubr.bf16.mxu0 %v14598_v0 }
 0x24d   : > { %v8675_v54 = vpop.permute.xlu1 %8674  ;;  %v8677_v44 = vpop.permute.xlu0 %8676 }
 0x24e   : > { %v13676_v52 = vsel %vm852_vm4, %v8673_v50, %v8675_v54  ;;  %v13679_v9 = vsel %vm852_vm4, %v8675_v54, %v8677_v44  ;;  %v5475_v50 = vsel %vm404_vm1, %v5460_v25, 0 }
 0x24f   : > { %10445 = vmatmul.mubr.msk.bf16.gmra.mrb[12].mxu1 %vm397_vm2, %v11751_v7  ;;  %v14627_v7 = vld [vmem:[#allocation5_spill] sm:$0xff] }
 0x250   : > { %5413 = vmatprep.mubr.bf16.mxu1 %v14598_v0  ;;  %v5627_v34 = vsel %vm852_vm4, %v14627_v7, %v14626_v26 }
 0x251   : > { %v8837_v62 = vpop.permute.xlu1 %8836  ;;  %v8839_v22 = vpop.permute.xlu0 %8838 }
 0x252   : > { %v13692_v54 = vsel %vm1022_vm5, %v8837_v62, %v8839_v22 }
 0x253   : > { %10449 = vmatmul.mubr.msk.bf16.vlgmr.msra.gmra.mrb[8].mxu0 %vm397_vm2, %v11752_v53  ;;  %14628 = vst [vmem:[#allocation6_spill] sm:$0xff] %v13692_v54 }
 0x254   : > { %5481 = vmatpush1.bf16.msra.mxu0 %v5469_v51  ;;  %5370 = vmatprep.mubr.bf16.mxu0 %v14598_v0 }
 0x255   : > { %10472 = vmatprep.subr.msk.bf16.mxu0 %vm404_vm1, %v5627_v34  ;;  %v8841_v44 = vpop.permute.xlu1 %8840  ;;  %v8843_v51 = vpop.permute.xlu0 %8842 }
 0x256   : > { %v13704_v34 = vsel %vm1022_vm5, %v8839_v22, %v8841_v44  ;;  %v13707_v25 = vsel %vm1022_vm5, %v8841_v44, %v8843_v51  ;;  %v11754_v22 = vld [vmem:[%s14574_s2 + $0x20] sm:$0xff]  }
 0x257   : > { %10452 = vmatmul.mubr.msk.bf16.vlgmr.msra.gmra.mrb[8].mxu1 %vm397_vm2, %v11752_v53  ;;  %14629 = vst [vmem:[#allocation5_spill] sm:$0xff] %v13704_v34  ;;  %14630 = vst [vmem:[#allocation30_spill] sm:$0xff] %v13707_v25 }
 0x258   : > { %5534 = vmatpush1.bf16.msra.mxu1 %v5475_v50  ;;  %5423 = vmatprep.mubr.bf16.mxu1 %v14598_v0  ;;  %v14631_v50 = vld [vmem:[#allocation4_spill] sm:$0xff] }
 0x259   : > { %10475 = vmatprep.subr.msk.bf16.mxu1 %vm404_vm1, %v5629_v6  ;;  %v8845_v35 = vpop.permute.xlu1 %8844  ;;  %v9005_v53 = vpop.permute.xlu0 %9004  ;;  %v5626_v54 = vsel %vm852_vm4, %v14631_v50, %v14627_v7  ;;  %v5628_v7 = vsel %vm852_vm4, %v14626_v26, %v13097_v36  ;;  %v5797_v26 = vsel %vm1022_vm5, %v13134_v8, %v13151_v28 }
 0x25a   : > { %v13712_v62 = vsel %vm1022_vm5, %v8843_v51, %v8845_v35  ;;  %v5637_v25 = vsel %vm404_vm1, %v5626_v54, 0 }
 0x25b   : > { %10450 = vmatmul.mubr.msk.bf16.gmra.mrb[12].mxu0 %vm397_vm2, %v11753_v45 }
 0x25c   : > { %5512 = vmatprep.mubr.bf16.mxu0 %v14598_v0 }
 0x25d   : > { %v9007_v6 = vpop.permute.xlu1 %9006  ;;  %v9009_v44 = vpop.permute.xlu0 %9008 }
 0x25e   : > { %v13724_v34 = vsel %vm1192_vm6, %v9005_v53, %v9007_v6  ;;  %v13727_v51 = vsel %vm1192_vm6, %v9007_v6, %v9009_v44  ;;  %v5643_v53 = vsel %vm404_vm1, %v5628_v7, 0 }
 0x25f   : > { %10453 = vmatmul.mubr.msk.bf16.gmra.mrb[12].mxu1 %vm397_vm2, %v11753_v45  ;;  %v5795_v45 = vsel %vm1022_vm5, %v13116_v12, %v13132_v40 }
 0x260   : > { %5565 = vmatprep.mubr.bf16.mxu1 %v14598_v0 }
 0x261   : > { %v9011_v54 = vpop.permute.xlu1 %9010  ;;  %v9013_v35 = vpop.permute.xlu0 %9012 }
 0x262   : > { %v13740_v50 = vsel %vm1192_vm6, %v9009_v44, %v9011_v54  ;;  %v13743_v36 = vsel %vm1192_vm6, %v9011_v54, %v9013_v35  ;;  %v14635_v35 = vld [vmem:[#allocation7_spill] sm:$0xff] }
 0x263   : > { %10461 = vmatmul.mubr.msk.bf16.vlgmr.msra.gmra.mrb[8].mxu0 %vm397_vm2, %v11754_v22 }
 0x264   : > { %5649 = vmatpush1.bf16.msra.mxu0 %v5637_v25  ;;  %5522 = vmatprep.mubr.bf16.mxu0 %v14598_v0  ;;  %v11755_v25 = vld [vmem:[%s14574_s2 + $0x28] sm:$0xff]  }
 0x265   : > { %10484 = vmatprep.subr.msk.bf16.mxu0 %vm404_vm1, %v5795_v45  ;;  %v9173_v6 = vpop.permute.xlu1 %9172  ;;  %v9175_v7 = vpop.permute.xlu0 %9174 }
 0x266   : > { %v13755_v44 = vsel %vm1362_vm7, %v9173_v6, %v9175_v7 }
 0x267   : > { %10464 = vmatmul.mubr.msk.bf16.vlgmr.msra.gmra.mrb[8].mxu1 %vm397_vm2, %v11754_v22  ;;  %14632 = vst [vmem:[#allocation4_spill] sm:$0xff] %v13755_v44 }
 0x268   : > { %5702 = vmatpush1.bf16.msra.mxu1 %v5643_v53  ;;  %5575 = vmatprep.mubr.bf16.mxu1 %v14598_v0  ;;  %v5794_v53 = vsel %vm1022_vm5, %v14635_v35, %v13116_v12  ;;  %v14636_v12 = vld [vmem:[#allocation9_spill] sm:$0xff] }
 0x269   : > { %10487 = vmatprep.subr.msk.bf16.mxu1 %vm404_vm1, %v5797_v26  ;;  %v9177_v28 = vpop.permute.xlu1 %9176  ;;  %v9179_v22 = vpop.permute.xlu0 %9178  ;;  %v11756_v26 = vld [vmem:[%s14574_s2 + $0x30] sm:$0xff]  }
 0x26a   : > { %v13760_v45 = vsel %vm1362_vm7, %v9175_v7, %v9177_v28  ;;  %v13763_v54 = vsel %vm1362_vm7, %v9177_v28, %v9179_v22  ;;  %v5805_v7 = vsel %vm404_vm1, %v5794_v53, 0  ;;  %v5796_v28 = vsel %vm1022_vm5, %v13132_v40, %v13134_v8 }
 0x26b   : > { %10462 = vmatmul.mubr.msk.bf16.gmra.mrb[12].mxu0 %vm397_vm2, %v11755_v25  ;;  %14633 = vst [vmem:[#allocation31_spill] sm:$0xff] %v13760_v45  ;;  %14634 = vst [vmem:[#allocation32_spill] sm:$0xff] %v13763_v54  ;;  %v5811_v53 = vsel %vm404_vm1, %v5796_v28, 0  ;;  %v5965_v8 = vsel %vm1192_vm6, %v13184_v31, %v13186_v37 }
 0x26c   : > { %5680 = vmatprep.mubr.bf16.mxu0 %v14598_v0 }
 0x26d   : > { %v9181_v6 = vpop.permute.xlu1 %9180  ;;  %v9341_v44 = vpop.permute.xlu0 %9340 }
 0x26e   : > { %v13775_v45 = vsel %vm1362_vm7, %v9179_v22, %v9181_v6  ;;  %v11757_v6 = vld [vmem:[%s14574_s2 + $0x38] sm:$0xff]  }
 0x26f   : > { %10465 = vmatmul.mubr.msk.bf16.gmra.mrb[12].mxu1 %vm397_vm2, %v11755_v25  ;;  %v5963_v25 = vsel %vm1192_vm6, %v14636_v12, %v13169_v30 }
 0x270   : > { %5733 = vmatprep.mubr.bf16.mxu1 %v14598_v0 }
 0x271   : > { %v9343_v35 = vpop.permute.xlu1 %9342  ;;  %v9345_v54 = vpop.permute.xlu0 %9344 }
 0x272   : > { %v13788_v22 = vsel %vm1532_vm8, %v9341_v44, %v9343_v35  ;;  %v13791_v40 = vsel %vm1532_vm8, %v9343_v35, %v9345_v54 }
 0x273   : > { %10473 = vmatmul.mubr.msk.bf16.vlgmr.msra.gmra.mrb[8].mxu0 %vm397_vm2, %v11756_v26  ;;  %14637 = vst [vmem:[#allocation7_spill] sm:$0xff] %v13788_v22  ;;  %14638 = vst [vmem:[#allocation9_spill] sm:$0xff] %v13791_v40 }
 0x274   : > { %5817 = vmatpush1.bf16.msra.mxu0 %v5805_v7  ;;  %5690 = vmatprep.mubr.bf16.mxu0 %v14598_v0 }
 0x275   : > { %10496 = vmatprep.subr.msk.bf16.mxu0 %vm404_vm1, %v5963_v25  ;;  %v9347_v7 = vpop.permute.xlu1 %9346  ;;  %v9349_v28 = vpop.permute.xlu0 %9348 }
 0x276   : > { %v13803_v44 = vsel %vm1532_vm8, %v9345_v54, %v9347_v7  ;;  %v13806_v25 = vsel %vm1532_vm8, %v9347_v7, %v9349_v28  ;;  %v11758_v54 = vld [vmem:[%s14574_s2 + $0x40] sm:$0xff]  }
 0x277   : > { %10476 = vmatmul.mubr.msk.bf16.vlgmr.msra.gmra.mrb[8].mxu1 %vm397_vm2, %v11756_v26  ;;  %14639 = vst [vmem:[#allocation33_spill] sm:$0xff] %v13803_v44  ;;  %14640 = vst [vmem:[#allocation34_spill] sm:$0xff] %v13806_v25 }
 0x278   : > { %5870 = vmatpush1.bf16.msra.mxu1 %v5811_v53  ;;  %5743 = vmatprep.mubr.bf16.mxu1 %v14598_v0  ;;  %v14642_v53 = vld [vmem:[#allocation8_spill] sm:$0xff] }
 0x279   : > { %10499 = vmatprep.subr.msk.bf16.mxu1 %vm404_vm1, %v5965_v8  ;;  %v9509_v37 = vpop.permute.xlu1 %9508  ;;  %v9511_v26 = vpop.permute.xlu0 %9510  ;;  %v5962_v22 = vsel %vm1192_vm6, %v14642_v53, %v14636_v12  ;;  %v5964_v12 = vsel %vm1192_vm6, %v13169_v30, %v13184_v31  ;;  %v11759_v31 = vld [vmem:[%s14574_s2 + $0x48] sm:$0xff]  }
 0x27a   : > { %v13811_v35 = vsel %vm1702_vm9, %v9509_v37, %v9511_v26  ;;  %v5973_v28 = vsel %vm404_vm1, %v5962_v22, 0 }
 0x27b   : > { %10474 = vmatmul.mubr.msk.bf16.gmra.mrb[12].mxu0 %vm397_vm2, %v11757_v6  ;;  %14641 = vst [vmem:[#allocation35_spill] sm:$0xff] %v13811_v35 }
 0x27c   : > { %5848 = vmatprep.mubr.bf16.mxu0 %v14598_v0 }
 0x27d   : > { %v9513_v8 = vpop.permute.xlu1 %9512  ;;  %v9515_v7 = vpop.permute.xlu0 %9514 }
 0x27e   : > { %v13823_v44 = vsel %vm1702_vm9, %v9511_v26, %v9513_v8  ;;  %v13826_v37 = vsel %vm1702_vm9, %v9513_v8, %v9515_v7  ;;  %v5979_v26 = vsel %vm404_vm1, %v5964_v12, 0  ;;  %v14646_v8 = vld [vmem:[#allocation11_spill] sm:$0xff] }
 0x27f   : > { %10477 = vmatmul.mubr.msk.bf16.gmra.mrb[12].mxu1 %vm397_vm2, %v11757_v6  ;;  %14643 = vst [vmem:[#allocation8_spill] sm:$0xff] %v13823_v44  ;;  %14644 = vst [vmem:[#allocation36_spill] sm:$0xff] %v13826_v37  ;;  %v6131_v6 = vsel %vm1362_vm7, %v13204_v38, %v13213_v19  ;;  %v6133_v30 = vsel %vm1362_vm7, %v14646_v8, %v13229_v41  ;;  %v11760_v41 = vld [vmem:[%s14574_s2 + $0x50] sm:$0xff]   ;;  %v6132_v12 = vsel %vm1362_vm7, %v13213_v19, %v14646_v8  ;;  %v11761_v19 = vld [vmem:[%s14574_s2 + $0x58] sm:$0xff]   ;;  %v14661_v44 = vmov 0  }
 0x280   : > { %5901 = vmatprep.mubr.bf16.mxu1 %v14598_v0 }
 0x281   : > { %v9517_v22 = vpop.permute.xlu1 %9516 }
 0x282   : > { %v13839_v53 = vsel %vm1702_vm9, %v9515_v7, %v9517_v22  ;;  %v14647_v7 = vld [vmem:[#allocation10_spill] sm:$0xff]  ;;  %v6301_v22 = vsel %vm1532_vm8, %v13264_v20, %v13266_v56  ;;  %v11762_v56 = vld [vmem:[%s14574_s2 + $0x60] sm:$0xff]  }
 0x283   : > { %10485 = vmatmul.mubr.msk.bf16.vlgmr.msra.gmra.mrb[8].mxu0 %vm397_vm2, %v11758_v54  ;;  %14645 = vst [vmem:[#allocation37_spill] sm:$0xff] %v13839_v53 }
 0x284   : > { %5985 = vmatpush1.bf16.msra.mxu0 %v5973_v28  ;;  %5858 = vmatprep.mubr.bf16.mxu0 %v14598_v0  ;;  %v6130_v28 = vsel %vm1362_vm7, %v14647_v7, %v13204_v38  ;;  %v6147_v38 = vsel %vm404_vm1, %v6132_v12, 0  ;;  %v14649_v7 = vld [vmem:[#allocation14_spill] sm:$0xff] }
 0x285   : > { %10508 = vmatprep.subr.msk.bf16.mxu0 %vm404_vm1, %v6131_v6  ;;  %v6299_v6 = vsel %vm1532_vm8, %v13246_v29, %v13248_v60  ;;  %v6610_v12 = vld [vmem:[%s11921_s8 + $0x14] sm:$0xff] }
 0x287   : > { %10488 = vmatmul.mubr.msk.bf16.vlgmr.msra.gmra.mrb[8].mxu1 %vm397_vm2, %v11758_v54  ;;  %v6141_v54 = vsel %vm404_vm1, %v6130_v28, 0  ;;  %v6467_v28 = vsel %vm1702_vm9, %v14649_v7, %v13291_v48 }
 0x288   : > { %6038 = vmatpush1.bf16.msra.mxu1 %v5979_v26  ;;  %5911 = vmatprep.mubr.bf16.mxu1 %v14598_v0  ;;  %v14648_v26 = vld [vmem:[#allocation12_spill] sm:$0xff] }
 0x289   : > { %10511 = vmatprep.subr.msk.bf16.mxu1 %vm404_vm1, %v6133_v30  ;;  %v6298_v8 = vsel %vm1532_vm8, %v14648_v26, %v13246_v29  ;;  %v6611_v26 = vld [vmem:[%s11921_s8 + $0x1c] sm:$0xff] }
 0x28a   : > { %v6309_v30 = vsel %vm404_vm1, %v6298_v8, 0 }
 0x28b   : > { %10486 = vmatmul.mubr.msk.bf16.gmra.mrb[12].mxu0 %vm397_vm2, %v11759_v31 }
 0x28c   : > { %6016 = vmatprep.mubr.bf16.mxu0 %v14598_v0 }
 0x28f   : > { %10489 = vmatmul.mubr.msk.bf16.gmra.mrb[12].mxu1 %vm397_vm2, %v11759_v31  ;;  %v6300_v31 = vsel %vm1532_vm8, %v13248_v60, %v13264_v20  ;;  %v11763_v60 = vld [vmem:[%s14574_s2 + $0x68] sm:$0xff]  }
 0x290   : > { %6069 = vmatprep.mubr.bf16.mxu1 %v14598_v0  ;;  %v6315_v29 = vsel %vm404_vm1, %v6300_v31, 0  ;;  %v14651_v20 = vld [vmem:[#allocation13_spill] sm:$0xff]  ;;  %v11766_v31 = vld [vmem:[%s14574_s2 + $0x80] sm:$0xff]  }
 0x293   : > { %10497 = vmatmul.mubr.msk.bf16.vlgmr.msra.gmra.mrb[8].mxu0 %vm397_vm2, %v11760_v41 }
 0x294   : > { %6153 = vmatpush1.bf16.msra.mxu0 %v6141_v54  ;;  %6026 = vmatprep.mubr.bf16.mxu0 %v14598_v0 }
 0x295   : > { %10520 = vmatprep.subr.msk.bf16.mxu0 %vm404_vm1, %v6299_v6  ;;  %v11764_v6 = vld [vmem:[%s14574_s2 + $0x70] sm:$0xff]  }
 0x297   : > { %10500 = vmatmul.mubr.msk.bf16.vlgmr.msra.gmra.mrb[8].mxu1 %vm397_vm2, %v11760_v41  ;;  %v14650_v41 = vld [vmem:[#allocation15_spill] sm:$0xff] }
 0x298   : > { %6206 = vmatpush1.bf16.msra.mxu1 %v6147_v38  ;;  %6079 = vmatprep.mubr.bf16.mxu1 %v14598_v0  ;;  %v6469_v54 = vsel %vm1702_vm9, %v14650_v41, %v13308_v49  ;;  %v6466_v49 = vsel %vm1702_vm9, %v14651_v20, %v14649_v7  ;;  %v11771_v20 = vld [vmem:[%s14574_s2 + $0x88] sm:$0xff]  }
 0x299   : > { %10523 = vmatprep.subr.msk.bf16.mxu1 %vm404_vm1, %v6301_v22  ;;  %v6477_v38 = vsel %vm404_vm1, %v6466_v49, 0  ;;  %v10545_v22 = vcombine.high %v6610_v12, %v6610_v12  ;;  %v14653_v49 = vld [vmem:[#allocation16_spill] sm:$0xff] }
 0x29b   : > { %10498 = vmatmul.mubr.msk.bf16.gmra.mrb[12].mxu0 %vm397_vm2, %v11761_v19 }
 0x29c   : > { %6184 = vmatprep.mubr.bf16.mxu0 %v14598_v0 }
 0x29f   : > { %10501 = vmatmul.mubr.msk.bf16.gmra.mrb[12].mxu1 %vm397_vm2, %v11761_v19  ;;  %v6468_v19 = vsel %vm1702_vm9, %v13291_v48, %v14650_v41  ;;  %v10544_v48 = vcombine.low %v6610_v12, %v6610_v12  ;;  %v6816_v12 = vsel %vm392_vm0, %v14653_v49, %v13326_v1 }
 0x2a0   : > { %6237 = vmatprep.mubr.bf16.mxu1 %v14598_v0  ;;  %v6483_v8 = vsel %vm404_vm1, %v6468_v19, 0  ;;  %v14655_v19 = vld [vmem:[#allocation18_spill] sm:$0xff] }
 0x2a1   : > { %v6643_v7 = vsel %vm404_vm1, %v10544_v48, 0  ;;  %v14657_v48 = vld [vmem:[#allocation20_spill] sm:$0xff] }
 0x2a3   : > { %10509 = vmatmul.mubr.msk.bf16.vlgmr.msra.gmra.mrb[8].mxu0 %vm397_vm2, %v11762_v56 }
 0x2a4   : > { %6321 = vmatpush1.bf16.msra.mxu0 %v6309_v30  ;;  %6194 = vmatprep.mubr.bf16.mxu0 %v14598_v0  ;;  %v11765_v30 = vld [vmem:[%s14574_s2 + $0x78] sm:$0xff]  }
 0x2a5   : > { %10532 = vmatprep.subr.msk.bf16.mxu0 %vm404_vm1, %v6467_v28  ;;  %v10546_v28 = vcombine.low %v6611_v26, %v6611_v26 }
 0x2a7   : > { %10512 = vmatmul.mubr.msk.bf16.vlgmr.msra.gmra.mrb[8].mxu1 %vm397_vm2, %v11762_v56  ;;  %v10547_v56 = vcombine.high %v6611_v26, %v6611_v26  ;;  %v6649_v41 = vsel %vm404_vm1, %v10546_v28, 0  ;;  %v11774_v26 = vld [vmem:[%s14574_s2 + $0xa0] sm:$0xff]   ;;  %v5011_v28 = vlaneseq }
 0x2a8   : > { %6374 = vmatpush1.bf16.msra.mxu1 %v6315_v29  ;;  %6247 = vmatprep.mubr.bf16.mxu1 %v14598_v0  ;;  %v6817_v29 = vsel %vm392_vm0, %v13326_v1, %v13328_v16 }
 0x2a9   : > { %10535 = vmatprep.subr.msk.bf16.mxu1 %vm404_vm1, %v6469_v54  ;;  %v14652_v54 = vld [vmem:[#allocation17_spill] sm:$0xff] }
 0x2ab   : > { %10510 = vmatmul.mubr.msk.bf16.gmra.mrb[12].mxu0 %vm397_vm2, %v11763_v60 }
 0x2ac   : > { %6352 = vmatprep.mubr.bf16.mxu0 %v14598_v0 }
 0x2af   : > { %10513 = vmatmul.mubr.msk.bf16.gmra.mrb[12].mxu1 %vm397_vm2, %v11763_v60  ;;  %v6819_v60 = vsel %vm392_vm0, %v14652_v54, %v13339_v5  ;;  %v11772_v5 = vld [vmem:[%s14574_s2 + $0x90] sm:$0xff]  }
 0x2b0   : > { %6405 = vmatprep.mubr.bf16.mxu1 %v14598_v0 }
 0x2b3   : > { %10521 = vmatmul.mubr.msk.bf16.vlgmr.msra.gmra.mrb[8].mxu0 %vm397_vm2, %v11764_v6 }
 0x2b4   : > { %6489 = vmatpush1.bf16.msra.mxu0 %v6477_v38  ;;  %6362 = vmatprep.mubr.bf16.mxu0 %v14598_v0  ;;  %v6818_v38 = vsel %vm392_vm0, %v13328_v16, %v14652_v54  ;;  %v14654_v16 = vld [vmem:[#allocation19_spill] sm:$0xff] }
 0x2b5   : > { %10548 = vmatprep.subr.msk.bf16.mxu0 %vm404_vm1, %v10545_v22  ;;  %v6833_v1 = vsel %vm404_vm1, %v6818_v38, 0  ;;  %v11773_v22 = vld [vmem:[%s14574_s2 + $0x98] sm:$0xff]  }
 0x2b7   : > { %10524 = vmatmul.mubr.msk.bf16.vlgmr.msra.gmra.mrb[8].mxu1 %vm397_vm2, %v11764_v6  ;;  %v6827_v6 = vsel %vm404_vm1, %v6816_v12, 0 }
 0x2b8   : > { %6542 = vmatpush1.bf16.msra.mxu1 %v6483_v8  ;;  %6415 = vmatprep.mubr.bf16.mxu1 %v14598_v0 }
 0x2b9   : > { %10551 = vmatprep.subr.msk.bf16.mxu1 %vm404_vm1, %v10547_v56  ;;  %v14656_v56 = vld [vmem:[#allocation21_spill] sm:$0xff] }
 0x2bb   : > { %10522 = vmatmul.mubr.msk.bf16.gmra.mrb[12].mxu0 %vm397_vm2, %v11765_v30 }
 0x2bc   : > { %6520 = vmatprep.mubr.bf16.mxu0 %v14598_v0 }
 0x2bf   : > { %10525 = vmatmul.mubr.msk.bf16.gmra.mrb[12].mxu1 %vm397_vm2, %v11765_v30  ;;  %v11775_v30 = vld [vmem:[%s14574_s2 + $0xa8] sm:$0xff]  }
 0x2c0   : > { %6573 = vmatprep.mubr.bf16.mxu1 %v14598_v0 }
 0x2c3   : > { %10533 = vmatmul.mubr.msk.bf16.vlgmr.msra.gmra.mrb[8].mxu0 %vm397_vm2, %v11766_v31 }
 0x2c4   : > { %6655 = vmatpush1.bf16.msra.mxu0 %v6643_v7  ;;  %6530 = vmatprep.mubr.bf16.mxu0 %v14598_v0  ;;  %v11777_v7 = vld [vmem:[%s14574_s2 + $0xb8] sm:$0xff]  }
 0x2c5   : > { %10565 = vmatprep.subr.msk.bf16.mxu0 %vm404_vm1, %v6817_v29  ;;  %v7331_v29 = vsel %vm404_vm1, %v13443_v4, 0 }
 0x2c7   : > { %10536 = vmatmul.mubr.msk.bf16.vlgmr.msra.gmra.mrb[8].mxu1 %vm397_vm2, %v11766_v31  ;;  %v7163_v31 = vsel %vm404_vm1, %v14657_v48, 0 }
 0x2c8   : > { %6708 = vmatpush1.bf16.msra.mxu1 %v6649_v41  ;;  %6583 = vmatprep.mubr.bf16.mxu1 %v14598_v0  ;;  %v5009_v41 = vld [vmem:[%s14572_s0] sm:$0xf] }
 0x2c9   : > { %10568 = vmatprep.subr.msk.bf16.mxu1 %vm404_vm1, %v6819_v60  ;;  %v14049_v60 = vpop.permute.xlu0 %4919 }
 0x2ca   : > { %14659 = vst [vmem:[#allocation10_spill] sm:$0xff] %v14049_v60 }
 0x2cb   : > { %10534 = vmatmul.mubr.msk.bf16.gmra.mrb[12].mxu0 %vm397_vm2, %v11771_v20 }
 0x2cc   : > { %6686 = vmatprep.mubr.bf16.mxu0 %v14598_v0 }
 0x2cf   : > { %10537 = vmatmul.mubr.msk.bf16.gmra.mrb[12].mxu1 %vm397_vm2, %v11771_v20  ;;  %v7337_v20 = vsel %vm404_vm1, %v13464_v15, 0 }
 0x2d0   : > { %6739 = vmatprep.mubr.bf16.mxu1 %v14598_v0 }
 0x2d3   : > { %10549 = vmatmul.mubr.msk.bf16.vlgmr.msra.gmra.mrb[8].mxu0 %vm397_vm2, %v11772_v5 }
 0x2d4   : > { %6839 = vmatpush1.bf16.msra.mxu0 %v6827_v6  ;;  %6696 = vmatprep.mubr.bf16.mxu0 %v14598_v0  ;;  %v14066_v6 = vpop.permute.xlu1 %4924 }
 0x2d5   : > { %10577 = vmatprep.subr.msk.bf16.mxu0 %vm404_vm1, %v13374_v46  ;;  %v6984_v46 = vsel %vm682_vm3, %v14655_v19, %v14654_v16  ;;  %14660 = vst [vmem:[#allocation12_spill] sm:$0xff] %v14066_v6  ;;  %v14078_v19 = vsel %vm404_vm1, %v13487_v17, 0  ;;  %v14095_v17 = vsel %vm404_vm1, %v13503_v32, 0 }
 0x2d6   : > { %v6995_v8 = vsel %vm404_vm1, %v6984_v46, 0 }
 0x2d7   : > { %10552 = vmatmul.mubr.msk.bf16.vlgmr.msra.gmra.mrb[8].mxu1 %vm397_vm2, %v11772_v5 }
 0x2d8   : > { %6892 = vmatpush1.bf16.msra.mxu1 %v6833_v1  ;;  %6749 = vmatprep.mubr.bf16.mxu1 %v14598_v0 }
 0x2d9   : > { %10580 = vmatprep.subr.msk.bf16.mxu1 %vm404_vm1, %v13393_v33  ;;  %v7001_v33 = vsel %vm404_vm1, %v13379_v24, 0  ;;  %v11776_v24 = vld [vmem:[%s14574_s2 + $0xb0] sm:$0xff]  }
 0x2db   : > { %10550 = vmatmul.mubr.msk.bf16.gmra.mrb[12].mxu0 %vm397_vm2, %v11773_v22 }
 0x2dc   : > { %6870 = vmatprep.mubr.bf16.mxu0 %v14598_v0 }
 0x2df   : > { %10553 = vmatmul.mubr.msk.bf16.gmra.mrb[12].mxu1 %vm397_vm2, %v11773_v22  ;;  %v11779_v22 = vld [vmem:[%s14574_s2 + $0xc8] sm:$0xff]  }
 0x2e0   : > { %6923 = vmatprep.mubr.bf16.mxu1 %v14598_v0 }
 0x2e3   : > { %10566 = vmatmul.mubr.msk.bf16.vlgmr.msra.gmra.mrb[8].mxu0 %vm397_vm2, %v11774_v26 }
 0x2e4   : > { %7007 = vmatpush1.bf16.msra.mxu0 %v6995_v8  ;;  %6880 = vmatprep.mubr.bf16.mxu0 %v14598_v0 }
 0x2e5   : > { %10589 = vmatprep.subr.msk.bf16.mxu0 %vm404_vm1, %v14656_v56 }
 0x2e7   : > { %10569 = vmatmul.mubr.msk.bf16.vlgmr.msra.gmra.mrb[8].mxu1 %vm397_vm2, %v11774_v26 }
 0x2e8   : > { %7060 = vmatpush1.bf16.msra.mxu1 %v7001_v33  ;;  %6933 = vmatprep.mubr.bf16.mxu1 %v14598_v0 }
 0x2e9   : > { %10592 = vmatprep.subr.msk.bf16.mxu1 %vm404_vm1, %v13426_v27  ;;  %v7169_v27 = vsel %vm404_vm1, %v13421_v47, 0  ;;  %v14034_v47 = vshrl.u32 %v5011_v28, 7 }
 0x2eb   : > { %10567 = vmatmul.mubr.msk.bf16.gmra.mrb[12].mxu0 %vm397_vm2, %v11775_v30  ;;  %14658 = vst [vmem:[#allocation11_spill] sm:$0xff] %v14034_v47  ;;  %v14590_v54 = vsub.s32 1, %v14034_v47  ;;  %v14589_v49 = vsub.s32 2, %v14034_v47  ;;  %v14588_v1 = vsub.s32 3, %v14034_v47 }
 0x2ec   : > { %7038 = vmatprep.mubr.bf16.mxu0 %v14598_v0 }
 0x2ed   : > { %v14064_v5 = vrot.slane %v5009_v41, %v14590_v54  ;;  %v14089_v33 = vrot.slane %v5009_v41, %v14589_v49 }
 0x2ef   : > { %10570 = vmatmul.mubr.msk.bf16.gmra.mrb[12].mxu1 %vm397_vm2, %v11775_v30 }
 0x2f0   : > { %7091 = vmatprep.mubr.bf16.mxu1 %v14598_v0 }
 0x2f3   : > { %10578 = vmatmul.mubr.msk.bf16.vlgmr.msra.gmra.mrb[8].mxu0 %vm397_vm2, %v11776_v24 }
 0x2f4   : > { %7175 = vmatpush1.bf16.msra.mxu0 %v7163_v31  ;;  %7048 = vmatprep.mubr.bf16.mxu0 %v14598_v0 }
 0x2f5   : > { %10601 = vmatprep.subr.msk.bf16.mxu0 %vm404_vm1, %v13461_v3  ;;  %v11778_v3 = vld [vmem:[%s14574_s2 + $0xc0] sm:$0xff]  }
 0x2f7   : > { %10581 = vmatmul.mubr.msk.bf16.vlgmr.msra.gmra.mrb[8].mxu1 %vm397_vm2, %v11776_v24 }
 0x2f8   : > { %7228 = vmatpush1.bf16.msra.mxu1 %v7169_v27  ;;  %7101 = vmatprep.mubr.bf16.mxu1 %v14598_v0 }
 0x2f9   : > { %10604 = vmatprep.subr.msk.bf16.mxu1 %vm404_vm1, %v13472_v58  ;;  %v14591_v58 = vsub.s32 0, %v14034_v47 }
 0x2fb   : > { %10579 = vmatmul.mubr.msk.bf16.gmra.mrb[12].mxu0 %vm397_vm2, %v11777_v7  ;;  %v14056_v4 = vrot.slane %v5009_v41, %v14591_v58 }
 0x2fc   : > { %7206 = vmatprep.mubr.bf16.mxu0 %v14598_v0 }
 0x2ff   : > { %10582 = vmatmul.mubr.msk.bf16.gmra.mrb[12].mxu1 %vm397_vm2, %v11777_v7 }
 0x300   : > { %7259 = vmatprep.mubr.bf16.mxu1 %v14598_v0 }
 0x303   : > { %10590 = vmatmul.mubr.msk.bf16.vlgmr.msra.gmra.mrb[8].mxu0 %vm397_vm2, %v11778_v3 }
 0x304   : > { %7343 = vmatpush1.bf16.msra.mxu0 %v7331_v29  ;;  %7216 = vmatprep.mubr.bf16.mxu0 %v14598_v0 }
 0x305   : > { %10613 = vmatprep.subr.msk.bf16.mxu0 %vm404_vm1, %v13490_v59 }
 0x306   : > { %v4829_v12 = vpop.f32.mrb[0].mxu0 }
 0x307   : > { %v4937_v38 = vadd.f32 %v14049_v60, %v4829_v12  ;;  %v4831_v15 = vpop.f32.mrb[1].mxu0  ;;  %10593 = vmatmul.mubr.msk.bf16.vlgmr.msra.gmra.mrb[8].mxu1 %vm397_vm2, %v11778_v3  ;;  %v14103_v3 = vrot.slane %v5009_v41, %v14588_v1 }
 0x308   : > { %v4938_v59 = vadd.f32 %v14049_v60, %v4831_v15  ;;  %7396 = vmatpush1.bf16.msra.mxu1 %v7337_v20  ;;  %v4833_v16 = vpop.f32.mrb[2].mxu0  ;;  %7269 = vmatprep.mubr.bf16.mxu1 %v14598_v0 }
 0x309   : > { %v5031_v46 = vmul.f32 %v14056_v4, %v4937_v38  ;;  %v4941_v26 = vadd.f32 %v14066_v6, %v4833_v16  ;;  %v4835_v8 = vpop.f32.mrb[3].mxu0  ;;  %10616 = vmatprep.subr.msk.bf16.mxu1 %vm404_vm1, %v13506_v13 }
 0x30a   : > { %v10784_v56 = vpack.c.bf16 %v4938_v59, %v4937_v38  ;;  %v5032_v30 = vmul.f32 %v14064_v5, %v4938_v59  ;;  %v4942_v24 = vadd.f32 %v14066_v6, %v4835_v8  ;;  %v4882_v48 = vpop.f32.mrb[0].mxu1 }
 0x30b   : > { %v5084_v31 = vmul.f32 %v5031_v46, %v4937_v38  ;;  %v5035_v27 = vmul.f32 %v14056_v4, %v4941_v26  ;;  %v4939_v7 = vadd.f32 %v14049_v60, %v4882_v48  ;;  %v4884_v28 = vpop.f32.mrb[1].mxu1  ;;  %10591 = vmatmul.mubr.msk.bf16.gmra.mrb[12].mxu0 %vm397_vm2, %v11779_v22  ;;  %v14112_v48 = vpop.permute.xlu1 %4929 }
 0x30c   : > { %5001 = vst [vmem:[%s14084_s17] sm:$0xff] %v10784_v56  ;;  %v5051_v32 = vadd.f32 %v5032_v30, %v5031_v46  ;;  %v5085_v13 = vmul.f32 %v5032_v30, %v4938_v59  ;;  %v10786_v29 = vpack.c.bf16 %v4942_v24, %v4941_v26  ;;  %v5036_v20 = vmul.f32 %v14064_v5, %v4942_v24  ;;  %v4886_v12 = vpop.f32.mrb[2].mxu1 }
 0x30d   : > { %7374 = vmatprep.mubr.bf16.mxu0 %v14598_v0  ;;  %v5088_v38 = vmul.f32 %v5035_v27, %v4941_v26  ;;  %v5033_v15 = vmul.f32 %v14089_v33, %v4939_v7  ;;  %v4940_v16 = vadd.f32 %v14049_v60, %v4884_v28  ;;  %v4943_v41 = vadd.f32 %v14066_v6, %v4886_v12  ;;  %v4888_v8 = vpop.f32.mrb[3].mxu1  ;;  %v14120_v26 = vpop.permute.xlu0 %4934 }
 0x30e   : > { %v14114_v1 = vadd.f32 %v5085_v13, %v5084_v31  ;;  %5003 = vst [vmem:[%s14084_s17 + $0x20] sm:$0xff] %v10786_v29  ;;  %v14117_v59 = vadd.f32 %v5036_v20, %v5035_v27  ;;  %v5089_v46 = vmul.f32 %v5036_v20, %v4942_v24  ;;  %v4944_v56 = vadd.f32 %v14066_v6, %v4888_v8  ;;  %v4839_v30 = vpop.f32.mrb[4].mxu0  ;;  %v11780_v24 = vld [vmem:[%s14574_s2 + $0xd0] sm:$0xff]  }
 0x30f   : > { %v14122_v49 = vmul.f32 %v5033_v15, %v4939_v7  ;;  %v10785_v28 = vpack.c.bf16 %v4940_v16, %v4939_v7  ;;  %v5034_v12 = vmul.f32 %v14103_v3, %v4940_v16  ;;  %v5037_v54 = vmul.f32 %v14089_v33, %v4943_v41  ;;  %v4841_v31 = vpop.f32.mrb[5].mxu0  ;;  %10594 = vmatmul.mubr.msk.bf16.gmra.mrb[12].mxu1 %vm397_vm2, %v11779_v22 }
 0x310   : > { %v5105_v27 = vadd.f32 %v5089_v46, %v5088_v38  ;;  %v10787_v13 = vpack.c.bf16 %v4944_v56, %v4943_v41  ;;  %v5038_v29 = vmul.f32 %v14103_v3, %v4944_v56  ;;  %v4945_v20 = vadd.f32 %v14112_v48, %v4839_v30  ;;  %v4843_v8 = vpop.f32.mrb[6].mxu0  ;;  %7427 = vmatprep.mubr.bf16.mxu1 %v14598_v0 }
 0x311   : > { %5002 = vst [vmem:[%s14084_s17 + $0x8] sm:$0xff] %v10785_v28  ;;  %v5087_v7 = vmul.f32 %v5034_v12, %v4940_v16  ;;  %v5090_v58 = vmul.f32 %v5037_v54, %v4943_v41  ;;  %v4946_v6 = vadd.f32 %v14112_v48, %v4841_v31  ;;  %v4949_v22 = vadd.f32 %v14120_v26, %v4843_v8  ;;  %v4845_v60 = vpop.f32.mrb[7].mxu0 }
 0x312   : > { %5004 = vst [vmem:[%s14084_s17 + $0x28] sm:$0xff] %v10787_v13  ;;  %v5091_v47 = vmul.f32 %v5038_v29, %v4944_v56  ;;  %v5039_v38 = vmul.f32 %v14056_v4, %v4945_v20  ;;  %v4950_v46 = vadd.f32 %v14120_v26, %v4845_v60  ;;  %v4892_v37 = vpop.f32.mrb[4].mxu1  ;;  %v5052_v30 = vadd.f32 %v5051_v32, %v5033_v15 }
 0x313   : > { %v10788_v35 = vpack.c.bf16 %v4946_v6, %v4945_v20  ;;  %v5040_v0 = vmul.f32 %v14064_v5, %v4946_v6  ;;  %v5043_v16 = vmul.f32 %v14056_v4, %v4949_v22  ;;  %v4947_v41 = vadd.f32 %v14112_v48, %v4892_v37  ;;  %v4894_v28 = vpop.f32.mrb[5].mxu1  ;;  %10602 = vmatmul.mubr.msk.bf16.vlgmr.msra.gmra.mrb[8].mxu0 %vm397_vm2, %v11780_v24 }
 0x314   : > { %v5092_v31 = vmul.f32 %v5039_v38, %v4945_v20  ;;  %v10790_v56 = vpack.c.bf16 %v4950_v46, %v4949_v22  ;;  %v5044_v13 = vmul.f32 %v14064_v5, %v4950_v46  ;;  %v4948_v8 = vadd.f32 %v14112_v48, %v4894_v28  ;;  %7511 = vmatpush1.bf16.msra.mxu0 %v14078_v19  ;;  %v4896_v60 = vpop.f32.mrb[6].mxu1 }
 0x315   : > { %5005 = vst [vmem:[%s14084_s17 + $0x40] sm:$0xff] %v10788_v35  ;;  %v5061_v32 = vadd.f32 %v5040_v0, %v5039_v38  ;;  %v5093_v15 = vmul.f32 %v5040_v0, %v4946_v6  ;;  %v5096_v53 = vmul.f32 %v5043_v16, %v4949_v22  ;;  %v5041_v4 = vmul.f32 %v14089_v33, %v4947_v41  ;;  %v4898_v37 = vpop.f32.mrb[7].mxu1  ;;  %v11781_v6 = vld [vmem:[%s14574_s2 + $0xd8] sm:$0xff]  }
 0x316   : > { %7384 = vmatprep.mubr.bf16.mxu0 %v14661_v44  ;;  %5007 = vst [vmem:[%s14084_s17 + $0x60] sm:$0xff] %v10790_v56  ;;  %v5066_v20 = vadd.f32 %v5044_v13, %v5043_v16  ;;  %v5097_v25 = vmul.f32 %v5044_v13, %v4950_v46  ;;  %v10789_v40 = vpack.c.bf16 %v4948_v8, %v4947_v41  ;;  %v7673_v56 = vsel %vm404_vm1, %v13526_v2, 0  ;;  %v11783_v13 = vld [vmem:[%s14574_s2 + $0xe8] sm:$0xff]   ;;  %v11784_v2 = vld [vmem:[%s14574_s2 + $0xf0] sm:$0xff]  }
 0x317   : > { %v5042_v5 = vmul.f32 %v14103_v3, %v4948_v8  ;;  %10625 = vmatprep.subr.msk.bf16.mxu0 %vm404_vm1, %v13523_v61  ;;  %v5110_v19 = vadd.f32 %v5093_v15, %v5092_v31  ;;  %v5094_v35 = vmul.f32 %v5041_v4, %v4947_v41  ;;  %v5053_v38 = vadd.f32 %v5052_v30, %v5034_v12 }
 0x318   : > { %v4951_v0 = vadd.f32 %v14120_v26, %v4896_v60  ;;  %10605 = vmatmul.mubr.msk.bf16.vlgmr.msra.gmra.mrb[8].mxu1 %vm397_vm2, %v11780_v24  ;;  %v5115_v22 = vadd.f32 %v5097_v25, %v5096_v53  ;;  %5006 = vst [vmem:[%s14084_s17 + $0x48] sm:$0xff] %v10789_v40  ;;  %v4952_v16 = vadd.f32 %v14120_v26, %v4898_v37  ;;  %v11785_v60 = vld [vmem:[%s14574_s2 + $0xf8] sm:$0xff]   ;;  %v8137_v37 = vld [vmem:[%s11921_s8 + $0x20] sm:$0xff] }
 0x319   : > { %v5095_v46 = vmul.f32 %v5042_v5, %v4948_v8  ;;  %v5057_v28 = vadd.f32 %v14117_v59, %v5037_v54  ;;  %7564 = vmatpush1.bf16.msra.mxu1 %v14095_v17  ;;  %5054 = vadd.xlane.f32.xlu1 %v5053_v38  ;;  %v5106_v12 = vadd.f32 %v5105_v27, %v5090_v58 }
 0x31a   : > { %v5045_v61 = vmul.f32 %v14089_v33, %v4951_v0  ;;  %v5101_v24 = vadd.f32 %v14114_v1, %v14122_v49  ;;  %v5062_v30 = vadd.f32 %v5061_v32, %v5041_v4  ;;  %v10791_v41 = vpack.c.bf16 %v4952_v16, %v4951_v0  ;;  %7437 = vmatprep.mubr.bf16.mxu1 %v14661_v44  ;;  %v14664_v32 = vld [vmem:[#allocation24_spill] sm:$0xff] }
 0x31b   : > { %v5046_v25 = vmul.f32 %v14103_v3, %v4952_v16  ;;  %v5058_v40 = vadd.f32 %v5057_v28, %v5038_v29  ;;  %v5111_v53 = vadd.f32 %v5110_v19, %v5094_v35  ;;  %v5107_v54 = vadd.f32 %v5106_v12, %v5091_v47  ;;  %10603 = vmatmul.mubr.msk.bf16.gmra.mrb[12].mxu0 %vm397_vm2, %v11781_v6  ;;  %v11782_v3 = vld [vmem:[%s14574_s2 + $0xe0] sm:$0xff]   ;;  %v14667_v28 = vld [vmem:[#allocation26_spill] sm:$0xff]  ;;  %v14668_v12 = vld [vmem:[#allocation29_spill] sm:$0xff] }
 0x31c   : > { %v5098_v31 = vmul.f32 %v5045_v61, %v4951_v0  ;;  %v5102_v59 = vadd.f32 %v5101_v24, %v5087_v7  ;;  %v5063_v17 = vadd.f32 %v5062_v30, %v5042_v5  ;;  %5008 = vst [vmem:[%s14084_s17 + $0x68] sm:$0xff] %v10791_v41  ;;  %v5067_v58 = vadd.f32 %v5066_v20, %v5045_v61  ;;  %v11787_v5 = vld [vmem:[%s14574_s2 + $0x108] sm:$0xff]   ;;  %v11797_v24 = vld [vmem:[%s14574_s2 + $0x138] sm:$0xff]   ;;  %v11798_v30 = vld [vmem:[%s14574_s2 + $0x140] sm:$0xff]  }
 0x31d   : > { %v5099_v33 = vmul.f32 %v5046_v25, %v4952_v16  ;;  %5059 = vadd.xlane.f32.xlu0 %v5058_v40  ;;  %v5112_v27 = vadd.f32 %v5111_v53, %v5095_v46  ;;  %7542 = vmatprep.mubr.bf16.mxu0 %v14661_v44  ;;  %v11853_v29 = vmov 0.0   ;;  %v8003_v15 = vsel %vm404_vm1, %v14664_v32, 0  ;;  %v11795_v46 = vld [vmem:[%s14574_s2 + $0x128] sm:$0xff]   ;;  %v14669_v41 = vld [vmem:[#allocation28_spill] sm:$0xff] }
 0x31e   : > { %5108 = vadd.xlane.f32.xlu1 %v5107_v54  ;;  %v5116_v49 = vadd.f32 %v5115_v22, %v5098_v31  ;;  %10628 = vmatprep.subr.msk.bf16.mxu1 %vm404_vm1, %v13538_v10  ;;  %v5068_v1 = vadd.f32 %v5067_v58, %v5046_v25  ;;  %335 = vst.msk [vmem:[#allocation2] sm:$0xff] %vm334_vm10, %v11853_v29  ;;  %336 = vst.msk [vmem:[#allocation2 + $0x8] sm:$0xff] %vm334_vm10, %v11853_v29  ;;  %v14662_v10 = vld [vmem:[#allocation22_spill] sm:$0xff]  ;;  %v8353_v22 = vsel %vm404_vm1, %v13610_v42, 0  ;;  %v14665_v42 = vld [vmem:[#allocation27_spill] sm:$0xff] }
 0x31f   : > { %337 = vst.msk [vmem:[#allocation2 + $0x10] sm:$0xff] %vm334_vm10, %v11853_v29  ;;  %338 = vst.msk [vmem:[#allocation2 + $0x18] sm:$0xff] %vm334_vm10, %v11853_v29  ;;  %v7667_v7 = vsel %vm404_vm1, %v14662_v10, 0  ;;  %v10664_v20 = vcombine.high %v8137_v37, %v8137_v37  ;;  %v10663_v38 = vcombine.low %v8137_v37, %v8137_v37  ;;  %v8527_v61 = vsel %vm404_vm1, %v14667_v28, 0  ;;  %v14670_v40 = vld [vmem:[#allocation5_spill] sm:$0xff]  ;;  %v14671_v31 = vld [vmem:[#allocation6_spill] sm:$0xff] }
 0x320   : > { %10606 = vmatmul.mubr.msk.bf16.gmra.mrb[12].mxu1 %vm397_vm2, %v11781_v6  ;;  %v5117_v47 = vadd.f32 %v5116_v49, %v5099_v33  ;;  %339 = vst.msk [vmem:[#allocation3] sm:$0xff] %vm334_vm10, %v11853_v29  ;;  %340 = vst.msk [vmem:[#allocation3 + $0x8] sm:$0xff] %vm334_vm10, %v11853_v29  ;;  %v11793_v6 = vld [vmem:[%s14574_s2 + $0x118] sm:$0xff]   ;;  %v8689_v25 = vsel %vm404_vm1, %v14669_v41, 0  ;;  %v11799_v53 = vld [vmem:[%s14574_s2 + $0x148] sm:$0xff]   ;;  %v8857_v54 = vsel %vm404_vm1, %v14671_v31, 0 }
 0x321   : > { %5103 = vadd.xlane.f32.xlu0 %v5102_v59  ;;  %7595 = vmatprep.mubr.bf16.mxu1 %v14661_v44  ;;  %341 = vst.msk [vmem:[#allocation3 + $0x10] sm:$0xff] %vm334_vm10, %v11853_v29  ;;  %342 = vst.msk [vmem:[#allocation3 + $0x18] sm:$0xff] %vm334_vm10, %v11853_v29  ;;  %v8175_v0 = vsel %vm404_vm1, %v10663_v38, 0  ;;  %v9025_v33 = vsel %vm404_vm1, %v13724_v34, 0  ;;  %v11803_v34 = vld [vmem:[%s14574_s2 + $0x168] sm:$0xff]   ;;  %v11808_v28 = vld [vmem:[%s14574_s2 + $0x190] sm:$0xff]  }
 0x322   : > { %5069 = vadd.xlane.f32.xlu1 %v5068_v1  ;;  %v11809_v41 = vld [vmem:[%s14574_s2 + $0x198] sm:$0xff]  }
 0x323   : > { %10614 = vmatmul.mubr.msk.bf16.vlgmr.msra.gmra.mrb[8].mxu0 %vm397_vm2, %v11782_v3 }
 0x324   : > { %7679 = vmatpush1.bf16.msra.mxu0 %v7667_v7  ;;  %7552 = vmatprep.mubr.bf16.mxu0 %v14661_v44 }
 0x325   : > { %5064 = vadd.xlane.f32.xlu0 %v5063_v17  ;;  %10637 = vmatprep.subr.msk.bf16.mxu0 %vm404_vm1, %v13554_v39  ;;  %v7835_v39 = vsel %vm404_vm1, %v13551_v18, 0  ;;  %v8136_v18 = vld [vmem:[%s11921_s8 + $0x18] sm:$0xff]  ;;  %v5047_v58 = vld [vmem:[#allocation2] sm:$0xff]  ;;  %s11854_s8 = smov 1  }
 0x326   : > { %5118 = vadd.xlane.f32.xlu1 %v5117_v47  ;;  %v10662_v4 = vcombine.high %v8136_v18, %v8136_v18  ;;  %v10661_v19 = vcombine.low %v8136_v18, %v8136_v18  ;;  %v11801_v17 = vld [vmem:[%s14574_s2 + $0x158] sm:$0xff]   ;;  %v5048_v47 = vld [vmem:[#allocation2 + $0x8] sm:$0xff] }
 0x328   : > { %10617 = vmatmul.mubr.msk.bf16.vlgmr.msra.gmra.mrb[8].mxu1 %vm397_vm2, %v11782_v3  ;;  %v8169_v35 = vsel %vm404_vm1, %v10661_v19, 0  ;;  %v5081_v3 = vld [vmem:[#allocation3 + $0x8] sm:$0xff]  ;;  %v5083_v18 = vld [vmem:[#allocation3 + $0x18] sm:$0xff] }
 0x329   : > { %5113 = vadd.xlane.f32.xlu0 %v5112_v27  ;;  %7732 = vmatpush1.bf16.msra.mxu1 %v7673_v56  ;;  %v14673_v27 = vld [vmem:[#allocation31_spill] sm:$0xff]  ;;  %v5080_v56 = vld [vmem:[#allocation3] sm:$0xff] }
 0x32a   : > { %7605 = vmatprep.mubr.bf16.mxu1 %v14661_v44  ;;  %10640 = vmatprep.subr.msk.bf16.mxu1 %vm404_vm1, %v13569_v23  ;;  %v14663_v23 = vld [vmem:[#allocation23_spill] sm:$0xff] }
 0x32b   : > { %10615 = vmatmul.mubr.msk.bf16.gmra.mrb[12].mxu0 %vm397_vm2, %v11783_v13  ;;  %v7841_v8 = vsel %vm404_vm1, %v14663_v23, 0 }
 0x32c   : > { %7710 = vmatprep.mubr.bf16.mxu0 %v14661_v44 }
 0x330   : > { %10618 = vmatmul.mubr.msk.bf16.gmra.mrb[12].mxu1 %vm397_vm2, %v11783_v13  ;;  %v5050_v13 = vld [vmem:[#allocation2 + $0x18] sm:$0xff] }
 0x331   : > { %7763 = vmatprep.mubr.bf16.mxu1 %v14661_v44 }
 0x333   : > { %10626 = vmatmul.mubr.msk.bf16.vlgmr.msra.gmra.mrb[8].mxu0 %vm397_vm2, %v11784_v2 }
 0x334   : > { %7847 = vmatpush1.bf16.msra.mxu0 %v7835_v39  ;;  %7720 = vmatprep.mubr.bf16.mxu0 %v14661_v44 }
 0x335   : > { %10649 = vmatprep.subr.msk.bf16.mxu0 %vm404_vm1, %v13586_v55  ;;  %v11786_v55 = vld [vmem:[%s14574_s2 + $0x100] sm:$0xff]  }
 0x338   : > { %10629 = vmatmul.mubr.msk.bf16.vlgmr.msra.gmra.mrb[8].mxu1 %vm397_vm2, %v11784_v2 }
 0x339   : > { %7900 = vmatpush1.bf16.msra.mxu1 %v7841_v8  ;;  %7773 = vmatprep.mubr.bf16.mxu1 %v14661_v44  ;;  %v5049_v8 = vld [vmem:[#allocation2 + $0x10] sm:$0xff] }
 0x33a   : > { %10652 = vmatprep.subr.msk.bf16.mxu1 %vm404_vm1, %v13600_v43  ;;  %v8009_v43 = vsel %vm404_vm1, %v13589_v57, 0  ;;  %v11788_v57 = vld [vmem:[%s14574_s2 + $0x110] sm:$0xff]  }
 0x33b   : > { %10627 = vmatmul.mubr.msk.bf16.gmra.mrb[12].mxu0 %vm397_vm2, %v11785_v60 }
 0x33c   : > { %7878 = vmatprep.mubr.bf16.mxu0 %v14661_v44 }
 0x340   : > { %10630 = vmatmul.mubr.msk.bf16.gmra.mrb[12].mxu1 %vm397_vm2, %v11785_v60 }
 0x341   : > { %7931 = vmatprep.mubr.bf16.mxu1 %v14661_v44 }
 0x343   : > { %10638 = vmatmul.mubr.msk.bf16.vlgmr.msra.gmra.mrb[8].mxu0 %vm397_vm2, %v11786_v55 }
 0x344   : > { %8015 = vmatpush1.bf16.msra.mxu0 %v8003_v15  ;;  %7888 = vmatprep.mubr.bf16.mxu0 %v14661_v44 }
 0x345   : > { %10665 = vmatprep.subr.msk.bf16.mxu0 %vm404_vm1, %v10662_v4 }
 0x348   : > { %10641 = vmatmul.mubr.msk.bf16.vlgmr.msra.gmra.mrb[8].mxu1 %vm397_vm2, %v11786_v55  ;;  %v14674_v55 = vld [vmem:[#allocation4_spill] sm:$0xff] }
 0x349   : > { %8068 = vmatpush1.bf16.msra.mxu1 %v8009_v43  ;;  %7941 = vmatprep.mubr.bf16.mxu1 %v14661_v44  ;;  %v9193_v32 = vsel %vm404_vm1, %v14674_v55, 0  ;;  %v5082_v43 = vld [vmem:[#allocation3 + $0x10] sm:$0xff] }
 0x34a   : > { %10668 = vmatprep.subr.msk.bf16.mxu1 %vm404_vm1, %v10664_v20 }
 0x34b   : > { %10639 = vmatmul.mubr.msk.bf16.gmra.mrb[12].mxu0 %vm397_vm2, %v11787_v5 }
 0x34c   : > { %8046 = vmatprep.mubr.bf16.mxu0 %v14661_v44 }
 0x350   : > { %10642 = vmatmul.mubr.msk.bf16.gmra.mrb[12].mxu1 %vm397_vm2, %v11787_v5  ;;  %v14675_v5 = vld [vmem:[#allocation32_spill] sm:$0xff] }
 0x351   : > { %8099 = vmatprep.mubr.bf16.mxu1 %v14661_v44  ;;  %v9199_v19 = vsel %vm404_vm1, %v14675_v5, 0 }
 0x353   : > { %10650 = vmatmul.mubr.msk.bf16.vlgmr.msra.gmra.mrb[8].mxu0 %vm397_vm2, %v11788_v57 }
 0x354   : > { %8181 = vmatpush1.bf16.msra.mxu0 %v8169_v35  ;;  %8056 = vmatprep.mubr.bf16.mxu0 %v14661_v44  ;;  %v14676_v35 = vld [vmem:[#allocation9_spill] sm:$0xff] }
 0x355   : > { %10682 = vmatprep.subr.msk.bf16.mxu0 %vm404_vm1, %v13613_v14  ;;  %v11794_v14 = vld [vmem:[%s14574_s2 + $0x120] sm:$0xff]  }
 0x358   : > { %10653 = vmatmul.mubr.msk.bf16.vlgmr.msra.gmra.mrb[8].mxu1 %vm397_vm2, %v11788_v57 }
 0x359   : > { %8234 = vmatpush1.bf16.msra.mxu1 %v8175_v0  ;;  %8109 = vmatprep.mubr.bf16.mxu1 %v14661_v44  ;;  %v11805_v0 = vld [vmem:[%s14574_s2 + $0x178] sm:$0xff]  }
 0x35a   : > { %10685 = vmatprep.subr.msk.bf16.mxu1 %vm404_vm1, %v13621_v63  ;;  %v8359_v63 = vsel %vm404_vm1, %v13618_v21, 0  ;;  %v11796_v21 = vld [vmem:[%s14574_s2 + $0x130] sm:$0xff]  }
 0x35b   : > { %10651 = vmatmul.mubr.msk.bf16.gmra.mrb[12].mxu0 %vm397_vm2, %v11793_v6 }
 0x35c   : > { %8212 = vmatprep.mubr.bf16.mxu0 %v14661_v44 }
 0x360   : > { %10654 = vmatmul.mubr.msk.bf16.gmra.mrb[12].mxu1 %vm397_vm2, %v11793_v6  ;;  %v14677_v6 = vld [vmem:[#allocation34_spill] sm:$0xff] }
 0x361   : > { %8265 = vmatprep.mubr.bf16.mxu1 %v14661_v44 }
 0x363   : > { %10666 = vmatmul.mubr.msk.bf16.vlgmr.msra.gmra.mrb[8].mxu0 %vm397_vm2, %v11794_v14 }
 0x364   : > { %8365 = vmatpush1.bf16.msra.mxu0 %v8353_v22  ;;  %8222 = vmatprep.mubr.bf16.mxu0 %v14661_v44  ;;  %v14678_v22 = vld [vmem:[#allocation7_spill] sm:$0xff] }
 0x365   : > { %10694 = vmatprep.subr.msk.bf16.mxu0 %vm404_vm1, %v13641_v11  ;;  %v14666_v11 = vld [vmem:[#allocation25_spill] sm:$0xff] }
 0x366   : > { %v8521_v16 = vsel %vm404_vm1, %v14666_v11, 0  ;;  %v11807_v11 = vld [vmem:[%s14574_s2 + $0x188] sm:$0xff]  }
 0x368   : > { %10669 = vmatmul.mubr.msk.bf16.vlgmr.msra.gmra.mrb[8].mxu1 %vm397_vm2, %v11794_v14  ;;  %v11806_v14 = vld [vmem:[%s14574_s2 + $0x180] sm:$0xff]  }
 0x369   : > { %8418 = vmatpush1.bf16.msra.mxu1 %v8359_v63  ;;  %8275 = vmatprep.mubr.bf16.mxu1 %v14661_v44  ;;  %v9361_v63 = vsel %vm404_vm1, %v14678_v22, 0 }
 0x36a   : > { %10697 = vmatprep.subr.msk.bf16.mxu1 %vm404_vm1, %v14665_v42 }
 0x36b   : > { %10667 = vmatmul.mubr.msk.bf16.gmra.mrb[12].mxu0 %vm397_vm2, %v11795_v46 }
 0x36c   : > { %8396 = vmatprep.mubr.bf16.mxu0 %v14661_v44 }
 0x370   : > { %10670 = vmatmul.mubr.msk.bf16.gmra.mrb[12].mxu1 %vm397_vm2, %v11795_v46  ;;  %v14679_v46 = vld [vmem:[#allocation33_spill] sm:$0xff] }
 0x371   : > { %8449 = vmatprep.mubr.bf16.mxu1 %v14661_v44  ;;  %v9367_v42 = vsel %vm404_vm1, %v14679_v46, 0 }
 0x373   : > { %10683 = vmatmul.mubr.msk.bf16.vlgmr.msra.gmra.mrb[8].mxu0 %vm397_vm2, %v11796_v21 }
 0x374   : > { %8533 = vmatpush1.bf16.msra.mxu0 %v8521_v16  ;;  %8406 = vmatprep.mubr.bf16.mxu0 %v14661_v44  ;;  %v14681_v16 = vld [vmem:[#allocation37_spill] sm:$0xff] }
 0x375   : > { %10706 = vmatprep.subr.msk.bf16.mxu0 %vm404_vm1, %v14668_v12 }
 0x378   : > { %10686 = vmatmul.mubr.msk.bf16.vlgmr.msra.gmra.mrb[8].mxu1 %vm397_vm2, %v11796_v21  ;;  %v14680_v21 = vld [vmem:[#allocation8_spill] sm:$0xff] }
 0x379   : > { %8586 = vmatpush1.bf16.msra.mxu1 %v8527_v61  ;;  %8459 = vmatprep.mubr.bf16.mxu1 %v14661_v44  ;;  %v14682_v61 = vld [vmem:[#allocation35_spill] sm:$0xff] }
 0x37a   : > { %10709 = vmatprep.subr.msk.bf16.mxu1 %vm404_vm1, %v13679_v9  ;;  %v8695_v9 = vsel %vm404_vm1, %v13676_v52, 0  ;;  %v11800_v52 = vld [vmem:[%s14574_s2 + $0x150] sm:$0xff]   ;;  %v9529_v12 = vsel %vm404_vm1, %v14682_v61, 0 }
 0x37b   : > { %10684 = vmatmul.mubr.msk.bf16.gmra.mrb[12].mxu0 %vm397_vm2, %v11797_v24 }
 0x37c   : > { %8564 = vmatprep.mubr.bf16.mxu0 %v14661_v44 }
 0x380   : > { %10687 = vmatmul.mubr.msk.bf16.gmra.mrb[12].mxu1 %vm397_vm2, %v11797_v24  ;;  %v14683_v24 = vld [vmem:[#allocation36_spill] sm:$0xff] }
 0x381   : > { %8617 = vmatprep.mubr.bf16.mxu1 %v14661_v44 }
 0x383   : > { %10695 = vmatmul.mubr.msk.bf16.vlgmr.msra.gmra.mrb[8].mxu0 %vm397_vm2, %v11798_v30 }
 0x384   : > { %8701 = vmatpush1.bf16.msra.mxu0 %v8689_v25  ;;  %8574 = vmatprep.mubr.bf16.mxu0 %v14661_v44  ;;  %v11810_v25 = vld [vmem:[%s14574_s2 + $0x1a0] sm:$0xff]  }
 0x385   : > { %10718 = vmatprep.subr.msk.bf16.mxu0 %vm404_vm1, %v14670_v40  ;;  %v9734_v40 = vld [vmem:[%s14572_s0 + $0x4] sm:$0xf] }
 0x388   : > { %10698 = vmatmul.mubr.msk.bf16.vlgmr.msra.gmra.mrb[8].mxu1 %vm397_vm2, %v11798_v30  ;;  %v9535_v30 = vsel %vm404_vm1, %v14683_v24, 0 }
 0x389   : > { %8754 = vmatpush1.bf16.msra.mxu1 %v8695_v9  ;;  %8627 = vmatprep.mubr.bf16.mxu1 %v14661_v44  ;;  %v11811_v9 = vld [vmem:[%s14574_s2 + $0x1a8] sm:$0xff]  }
 0x38a   : > { %10721 = vmatprep.subr.msk.bf16.mxu1 %vm404_vm1, %v13712_v62  ;;  %v14672_v62 = vld [vmem:[#allocation30_spill] sm:$0xff] }
 0x38b   : > { %10696 = vmatmul.mubr.msk.bf16.gmra.mrb[12].mxu0 %vm397_vm2, %v11799_v53  ;;  %v8863_v59 = vsel %vm404_vm1, %v14672_v62, 0 }
 0x38c   : > { %8732 = vmatprep.mubr.bf16.mxu0 %v14661_v44 }
 0x390   : > { %10699 = vmatmul.mubr.msk.bf16.gmra.mrb[12].mxu1 %vm397_vm2, %v11799_v53  ;;  %v14684_v53 = vld [vmem:[#allocation11_spill] sm:$0xff] }
 0x391   : > { %8785 = vmatprep.mubr.bf16.mxu1 %v14661_v44  ;;  %v14686_v62 = vsub.s32 1, %v14684_v53 }
 0x393   : > { %10707 = vmatmul.mubr.msk.bf16.vlgmr.msra.gmra.mrb[8].mxu0 %vm397_vm2, %v11800_v52 }
 0x394   : > { %8869 = vmatpush1.bf16.msra.mxu0 %v8857_v54  ;;  %8742 = vmatprep.mubr.bf16.mxu0 %v14661_v44 }
 0x395   : > { %10730 = vmatprep.subr.msk.bf16.mxu0 %vm404_vm1, %v13727_v51  ;;  %v11802_v51 = vld [vmem:[%s14574_s2 + $0x160] sm:$0xff]  }
 0x398   : > { %10710 = vmatmul.mubr.msk.bf16.vlgmr.msra.gmra.mrb[8].mxu1 %vm397_vm2, %v11800_v52  ;;  %v14685_v52 = vsub.s32 0, %v14684_v53 }
 0x399   : > { %8922 = vmatpush1.bf16.msra.mxu1 %v8863_v59  ;;  %8795 = vmatprep.mubr.bf16.mxu1 %v14661_v44  ;;  %v14467_v59 = vrot.slane %v9734_v40, %v14686_v62 }
 0x39a   : > { %10733 = vmatprep.subr.msk.bf16.mxu1 %vm404_vm1, %v13743_v36  ;;  %v9031_v36 = vsel %vm404_vm1, %v13740_v50, 0  ;;  %v9739_v31 = vrot.slane %v9734_v40, %v14685_v52 }
 0x39b   : > { %10708 = vmatmul.mubr.msk.bf16.gmra.mrb[12].mxu0 %vm397_vm2, %v11801_v17 }
 0x39c   : > { %8900 = vmatprep.mubr.bf16.mxu0 %v14661_v44 }
 0x3a0   : > { %10711 = vmatmul.mubr.msk.bf16.gmra.mrb[12].mxu1 %vm397_vm2, %v11801_v17  ;;  %v14687_v17 = vld [vmem:[#allocation10_spill] sm:$0xff] }
 0x3a1   : > { %8953 = vmatprep.mubr.bf16.mxu1 %v14661_v44 }
 0x3a3   : > { %10719 = vmatmul.mubr.msk.bf16.vlgmr.msra.gmra.mrb[8].mxu0 %vm397_vm2, %v11802_v51 }
 0x3a4   : > { %9037 = vmatpush1.bf16.msra.mxu0 %v9025_v33  ;;  %8910 = vmatprep.mubr.bf16.mxu0 %v14661_v44 }
 0x3a5   : > { %10742 = vmatprep.subr.msk.bf16.mxu0 %vm404_vm1, %v14673_v27  ;;  %v14688_v27 = vld [vmem:[#allocation12_spill] sm:$0xff] }
 0x3a6   : > { %v5055_v49 = vpop.xlane.xlu1 %5054 }
 0x3a7   : > { %v5071_v1 = vadd.f32 %v5055_v49, %v5047_v58 }
 0x3a8   : > { %10722 = vmatmul.mubr.msk.bf16.vlgmr.msra.gmra.mrb[8].mxu1 %vm397_vm2, %v11802_v51 }
 0x3a9   : > { %9090 = vmatpush1.bf16.msra.mxu1 %v9031_v36  ;;  %8963 = vmatprep.mubr.bf16.mxu1 %v14661_v44  ;;  %5076 = vst.msk [vmem:[#allocation2] sm:$0xff] %vm334_vm10, %v5071_v1 }
 0x3aa   : > { %v5060_v29 = vpop.xlane.xlu0 %5059  ;;  %10745 = vmatprep.subr.msk.bf16.mxu1 %vm404_vm1, %v13775_v45  ;;  %v11804_v45 = vld [vmem:[%s14574_s2 + $0x170] sm:$0xff]  }
 0x3ab   : > { %v5072_v50 = vadd.f32 %v5060_v29, %v5048_v47  ;;  %v5109_v10 = vpop.xlane.xlu1 %5108  ;;  %10720 = vmatmul.mubr.msk.bf16.gmra.mrb[12].mxu0 %vm397_vm2, %v11803_v34  ;;  %v14689_v47 = vsub.s32 2, %v14684_v53 }
 0x3ac   : > { %v5121_v7 = vadd.f32 %v5109_v10, %v5081_v3  ;;  %9068 = vmatprep.mubr.bf16.mxu0 %v14661_v44 }
 0x3ad   : > { %5077 = vst.msk [vmem:[#allocation2 + $0x8] sm:$0xff] %vm334_vm10, %v5072_v50 }
 0x3ae   : > { %5125 = vst.msk [vmem:[#allocation3 + $0x8] sm:$0xff] %vm334_vm10, %v5121_v7  ;;  %v5104_v2 = vpop.xlane.xlu0 %5103 }
 0x3af   : > { %v5120_v39 = vadd.f32 %v5104_v2, %v5080_v56  ;;  %v5070_v23 = vpop.xlane.xlu1 %5069 }
 0x3b0   : > { %v5074_v60 = vadd.f32 %v5070_v23, %v5050_v13  ;;  %10723 = vmatmul.mubr.msk.bf16.gmra.mrb[12].mxu1 %vm397_vm2, %v11803_v34  ;;  %v14474_v34 = vrot.slane %v9734_v40, %v14689_v47 }
 0x3b1   : > { %5124 = vst.msk [vmem:[#allocation3] sm:$0xff] %vm334_vm10, %v5120_v39  ;;  %9121 = vmatprep.mubr.bf16.mxu1 %v14661_v44  ;;  %v14690_v39 = vsub.s32 3, %v14684_v53 }
 0x3b2   : > { %v5065_v15 = vpop.xlane.xlu0 %5064  ;;  %5079 = vst.msk [vmem:[#allocation2 + $0x18] sm:$0xff] %vm334_vm10, %v5074_v60 }
 0x3b3   : > { %v5073_v4 = vadd.f32 %v5065_v15, %v5049_v8  ;;  %v5119_v37 = vpop.xlane.xlu1 %5118  ;;  %10731 = vmatmul.mubr.msk.bf16.vlgmr.msra.gmra.mrb[8].mxu0 %vm397_vm2, %v11804_v45  ;;  %v14481_v23 = vrot.slane %v9734_v40, %v14690_v39 }
 0x3b4   : > { %v5123_v20 = vadd.f32 %v5119_v37, %v5083_v18  ;;  %9205 = vmatpush1.bf16.msra.mxu0 %v9193_v32  ;;  %9078 = vmatprep.mubr.bf16.mxu0 %v14661_v44 }
 0x3b5   : > { %5078 = vst.msk [vmem:[#allocation2 + $0x10] sm:$0xff] %vm334_vm10, %v5073_v4  ;;  %10754 = vmatprep.subr.msk.bf16.mxu0 %vm404_vm1, %v14676_v35 }
 0x3b6   : > { %v5114_v57 = vpop.xlane.xlu0 %5113  ;;  %5127 = vst.msk [vmem:[#allocation3 + $0x18] sm:$0xff] %vm334_vm10, %v5123_v20 }
 0x3b7   : > { %v5122_v38 = vadd.f32 %v5114_v57, %v5082_v43 }
 0x3b8   : > { %10734 = vmatmul.mubr.msk.bf16.vlgmr.msra.gmra.mrb[8].mxu1 %vm397_vm2, %v11804_v45 }
 0x3b9   : > { %5126 = vst.msk [vmem:[#allocation3 + $0x10] sm:$0xff] %vm334_vm10, %v5122_v38  ;;  %9258 = vmatpush1.bf16.msra.mxu1 %v9199_v19  ;;  %9131 = vmatprep.mubr.bf16.mxu1 %v14661_v44 }
 0x3ba   : > { %10757 = vmatprep.subr.msk.bf16.mxu1 %vm404_vm1, %v14677_v6 }
 0x3bb   : > { %10732 = vmatmul.mubr.msk.bf16.gmra.mrb[12].mxu0 %vm397_vm2, %v11805_v0 }
 0x3bc   : > { %9236 = vmatprep.mubr.bf16.mxu0 %v14661_v44 }
 0x3c0   : > { %10735 = vmatmul.mubr.msk.bf16.gmra.mrb[12].mxu1 %vm397_vm2, %v11805_v0 }
 0x3c1   : > { %9289 = vmatprep.mubr.bf16.mxu1 %v14661_v44 }
 0x3c3   : > { %10743 = vmatmul.mubr.msk.bf16.vlgmr.msra.gmra.mrb[8].mxu0 %vm397_vm2, %v11806_v14 }
 0x3c4   : > { %9373 = vmatpush1.bf16.msra.mxu0 %v9361_v63  ;;  %9246 = vmatprep.mubr.bf16.mxu0 %v14661_v44 }
 0x3c5   : > { %10766 = vmatprep.subr.msk.bf16.mxu0 %vm404_vm1, %v14680_v21 }
 0x3c8   : > { %10746 = vmatmul.mubr.msk.bf16.vlgmr.msra.gmra.mrb[8].mxu1 %vm397_vm2, %v11806_v14 }
 0x3c9   : > { %9426 = vmatpush1.bf16.msra.mxu1 %v9367_v42  ;;  %9299 = vmatprep.mubr.bf16.mxu1 %v14661_v44 }
 0x3ca   : > { %10769 = vmatprep.subr.msk.bf16.mxu1 %vm404_vm1, %v14681_v16 }
 0x3cb   : > { %10744 = vmatmul.mubr.msk.bf16.gmra.mrb[12].mxu0 %vm397_vm2, %v11807_v11 }
 0x3cc   : > { %9404 = vmatprep.mubr.bf16.mxu0 %v14661_v44 }
 0x3d0   : > { %10747 = vmatmul.mubr.msk.bf16.gmra.mrb[12].mxu1 %vm397_vm2, %v11807_v11 }
 0x3d1   : > { %9457 = vmatprep.mubr.bf16.mxu1 %v14661_v44 }
 0x3d3   : > { %10755 = vmatmul.mubr.msk.bf16.vlgmr.msra.gmra.mrb[8].mxu0 %vm397_vm2, %v11808_v28 }
 0x3d4   : > { %9541 = vmatpush1.bf16.msra.mxu0 %v9529_v12  ;;  %9414 = vmatprep.mubr.bf16.mxu0 %v14661_v44 }
 0x3d8   : > { %10758 = vmatmul.mubr.msk.bf16.vlgmr.msra.gmra.mrb[8].mxu1 %vm397_vm2, %v11808_v28 }
 0x3d9   : > { %9594 = vmatpush1.bf16.msra.mxu1 %v9535_v30  ;;  %9467 = vmatprep.mubr.bf16.mxu1 %v14661_v44 }
 0x3db   : > { %10756 = vmatmul.mubr.msk.bf16.gmra.mrb[12].mxu0 %vm397_vm2, %v11809_v41 }
 0x3dc   : > { %9572 = vmatprep.mubr.bf16.mxu0 %v14661_v44 }
 0x3e0   : > { %10759 = vmatmul.mubr.msk.bf16.gmra.mrb[12].mxu1 %vm397_vm2, %v11809_v41 }
 0x3e1   : > { %9625 = vmatprep.mubr.bf16.mxu1 %v14661_v44 }
 0x3e3   : > { %10767 = vmatmul.mubr.msk.bf16.vlgmr.msra.gmra.mrb[8].mxu0 %vm397_vm2, %v11810_v25 }
 0x3e4   : > { %9582 = vmatprep.mubr.bf16.mxu0 %v14661_v44 }
 0x3e8   : > { %10770 = vmatmul.mubr.msk.bf16.vlgmr.msra.gmra.mrb[8].mxu1 %vm397_vm2, %v11810_v25 }
 0x3e9   : > { %9635 = vmatprep.mubr.bf16.mxu1 %v14661_v44 }
 0x3eb   : > { %10768 = vmatmul.mubr.msk.bf16.gmra.mrb[12].mxu0 %vm397_vm2, %v11811_v9 }
 0x3f0   : > { %10771 = vmatmul.mubr.msk.bf16.gmra.mrb[12].mxu1 %vm397_vm2, %v11811_v9 }
 0x4b6   : > { %v9574_v54 = vpop.f32.mrb[8].mxu0 }
 0x4b7   : > { %v9662_v51 = vadd.f32 %v9574_v54, %v14687_v17  ;;  %v9576_v33 = vpop.f32.mrb[9].mxu0 }
 0x4b8   : > { %v9663_v44 = vadd.f32 %v9576_v33, %v14687_v17  ;;  %v9578_v58 = vpop.f32.mrb[10].mxu0 }
 0x4b9   : > { %v9756_v36 = vmul.f32 %v9739_v31, %v9662_v51  ;;  %v9666_v49 = vadd.f32 %v9578_v58, %v14688_v27  ;;  %v9580_v1 = vpop.f32.mrb[11].mxu0 }
 0x4ba   : > { %v10792_v3 = vpack.c.bf16 %v9663_v44, %v9662_v51  ;;  %v9757_v29 = vmul.f32 %v14467_v59, %v9663_v44  ;;  %v9667_v50 = vadd.f32 %v9580_v1, %v14688_v27 }
 0x4bb   : > { %v9627_v10 = vpop.f32.mrb[8].mxu1  ;;  %v9808_v7 = vmul.f32 %v9756_v36, %v9662_v51  ;;  %v9760_v56 = vmul.f32 %v9739_v31, %v9666_v49 }
 0x4bc   : > { %v9664_v13 = vadd.f32 %v9627_v10, %v14687_v17  ;;  %v9629_v2 = vpop.f32.mrb[9].mxu1  ;;  %9726 = vst [vmem:[%s14084_s17 + $0x10] sm:$0xff] %v10792_v3  ;;  %v9776_v8 = vadd.f32 %v9757_v29, %v9756_v36  ;;  %v9809_v60 = vmul.f32 %v9757_v29, %v9663_v44  ;;  %v10794_v45 = vpack.c.bf16 %v9667_v50, %v9666_v49 }
 0x4bd   : > { %v9761_v18 = vmul.f32 %v14467_v59, %v9667_v50  ;;  %v9631_v55 = vpop.f32.mrb[10].mxu1  ;;  %v9812_v32 = vmul.f32 %v9760_v56, %v9666_v49  ;;  %v9665_v4 = vadd.f32 %v9629_v2, %v14687_v17 }
 0x4be   : > { %v9758_v15 = vmul.f32 %v14474_v34, %v9664_v13  ;;  %v9668_v37 = vadd.f32 %v9631_v55, %v14688_v27  ;;  %v9633_v43 = vpop.f32.mrb[11].mxu1  ;;  %v9824_v20 = vadd.f32 %v9809_v60, %v9808_v7  ;;  %9728 = vst [vmem:[%s14084_s17 + $0x30] sm:$0xff] %v10794_v45  ;;  %v9584_v35 = vpop.f32.mrb[12].mxu0 }
 0x4bf   : > { %v9781_v5 = vadd.f32 %v9761_v18, %v9760_v56  ;;  %v9813_v19 = vmul.f32 %v9761_v18, %v9667_v50  ;;  %v9669_v57 = vadd.f32 %v9633_v43, %v14688_v27  ;;  %v10793_v0 = vpack.c.bf16 %v9665_v4, %v9664_v13  ;;  %v9586_v22 = vpop.f32.mrb[13].mxu0 }
 0x4c0   : > { %v9810_v38 = vmul.f32 %v9758_v15, %v9664_v13  ;;  %v9759_v6 = vmul.f32 %v14481_v23, %v9665_v4  ;;  %v9762_v14 = vmul.f32 %v14474_v34, %v9668_v37  ;;  %v9670_v21 = vadd.f32 %v9584_v35, %v14112_v48  ;;  %v9588_v11 = vpop.f32.mrb[14].mxu0 }
 0x4c1   : > { %v9829_v63 = vadd.f32 %v9813_v19, %v9812_v32  ;;  %v10795_v46 = vpack.c.bf16 %v9669_v57, %v9668_v37  ;;  %v9763_v42 = vmul.f32 %v14481_v23, %v9669_v57  ;;  %9727 = vst [vmem:[%s14084_s17 + $0x18] sm:$0xff] %v10793_v0  ;;  %v9671_v61 = vadd.f32 %v9586_v22, %v14112_v48  ;;  %v9590_v24 = vpop.f32.mrb[15].mxu0  ;;  %v9773_v22 = vld [vmem:[#allocation2 + $0x8] sm:$0xff] }
 0x4c2   : > { %v9811_v16 = vmul.f32 %v9759_v6, %v9665_v4  ;;  %v9814_v28 = vmul.f32 %v9762_v14, %v9668_v37  ;;  %v9674_v12 = vadd.f32 %v9588_v11, %v14120_v26  ;;  %v9764_v41 = vmul.f32 %v9739_v31, %v9670_v21 }
 0x4c3   : > { %9729 = vst [vmem:[%s14084_s17 + $0x38] sm:$0xff] %v10795_v46  ;;  %v9815_v30 = vmul.f32 %v9763_v42, %v9669_v57  ;;  %v9675_v25 = vadd.f32 %v9590_v24, %v14120_v26  ;;  %v9637_v9 = vpop.f32.mrb[12].mxu1  ;;  %v9777_v40 = vadd.f32 %v9776_v8, %v9758_v15  ;;  %v10796_v53 = vpack.c.bf16 %v9671_v61, %v9670_v21 }
 0x4c4   : > { %v9765_v52 = vmul.f32 %v14467_v59, %v9671_v61  ;;  %v9768_v54 = vmul.f32 %v9739_v31, %v9674_v12  ;;  %v9672_v62 = vadd.f32 %v9637_v9, %v14112_v48  ;;  %v9639_v17 = vpop.f32.mrb[13].mxu1  ;;  %v9816_v51 = vmul.f32 %v9764_v41, %v9670_v21 }
 0x4c5   : > { %v10798_v33 = vpack.c.bf16 %v9675_v25, %v9674_v12  ;;  %v9769_v44 = vmul.f32 %v14467_v59, %v9675_v25  ;;  %v9673_v58 = vadd.f32 %v9639_v17, %v14112_v48  ;;  %v9641_v36 = vpop.f32.mrb[14].mxu1  ;;  %9730 = vst [vmem:[%s14084_s17 + $0x50] sm:$0xff] %v10796_v53  ;;  %v9778_v59 = vadd.f32 %v9777_v40, %v9759_v6 }
 0x4c6   : > { %v9786_v27 = vadd.f32 %v9765_v52, %v9764_v41  ;;  %v9817_v49 = vmul.f32 %v9765_v52, %v9671_v61  ;;  %v9820_v1 = vmul.f32 %v9768_v54, %v9674_v12  ;;  %v9766_v47 = vmul.f32 %v14474_v34, %v9672_v62  ;;  %v9643_v3 = vpop.f32.mrb[15].mxu1  ;;  %v9774_v12 = vld [vmem:[#allocation2 + $0x10] sm:$0xff] }
 0x4c7   : > { %9732 = vst [vmem:[%s14084_s17 + $0x70] sm:$0xff] %v10798_v33  ;;  %v9791_v31 = vadd.f32 %v9769_v44, %v9768_v54  ;;  %v9821_v29 = vmul.f32 %v9769_v44, %v9675_v25  ;;  %v10797_v50 = vpack.c.bf16 %v9673_v58, %v9672_v62  ;;  %v9767_v10 = vmul.f32 %v14481_v23, %v9673_v58  ;;  %v9775_v25 = vld [vmem:[#allocation2 + $0x18] sm:$0xff]  ;;  %v9806_v52 = vld [vmem:[#allocation3 + $0x10] sm:$0xff] }
 0x4c8   : > { %v9834_v7 = vadd.f32 %v9817_v49, %v9816_v51  ;;  %v9818_v56 = vmul.f32 %v9766_v47, %v9672_v62  ;;  %v9676_v48 = vadd.f32 %v9641_v36, %v14120_v26  ;;  %v9677_v39 = vadd.f32 %v9643_v3, %v14120_v26  ;;  %9779 = vadd.xlane.f32.xlu0 %v9778_v59  ;;  %v9807_v44 = vld [vmem:[#allocation3 + $0x18] sm:$0xff] }
 0x4c9   : > { %v9839_v13 = vadd.f32 %v9821_v29, %v9820_v1  ;;  %9731 = vst [vmem:[%s14084_s17 + $0x58] sm:$0xff] %v10797_v50  ;;  %v9819_v2 = vmul.f32 %v9767_v10, %v9673_v58  ;;  %v9782_v8 = vadd.f32 %v9781_v5, %v9762_v14  ;;  %v9825_v45 = vadd.f32 %v9824_v20, %v9810_v38 }
 0x4ca   : > { %v9770_v60 = vmul.f32 %v14474_v34, %v9676_v48  ;;  %v9830_v18 = vadd.f32 %v9829_v63, %v9814_v28  ;;  %v9787_v55 = vadd.f32 %v9786_v27, %v9766_v47  ;;  %v10799_v32 = vpack.c.bf16 %v9677_v39, %v9676_v48 }
 0x4cb   : > { %v9771_v15 = vmul.f32 %v14481_v23, %v9677_v39  ;;  %v9783_v4 = vadd.f32 %v9782_v8, %v9763_v42  ;;  %v9835_v37 = vadd.f32 %v9834_v7, %v9818_v56  ;;  %v9826_v19 = vadd.f32 %v9825_v45, %v9811_v16  ;;  %v9772_v23 = vld [vmem:[#allocation2] sm:$0xff]  ;;  %v9805_v16 = vld [vmem:[#allocation3 + $0x8] sm:$0xff] }
 0x4cc   : > { %v9822_v43 = vmul.f32 %v9770_v60, %v9676_v48  ;;  %v9831_v57 = vadd.f32 %v9830_v18, %v9815_v30  ;;  %v9788_v35 = vadd.f32 %v9787_v55, %v9767_v10  ;;  %9733 = vst [vmem:[%s14084_s17 + $0x78] sm:$0xff] %v10799_v32  ;;  %v9792_v26 = vadd.f32 %v9791_v31, %v9770_v60  ;;  %v9804_v42 = vld [vmem:[#allocation3] sm:$0xff]  ;;  %s10783_s17 = sshll.u32 %s14696_s24, 5 }
 0x4cd   : > { %v9823_v0 = vmul.f32 %v9771_v15, %v9677_v39  ;;  %9784 = vadd.xlane.f32.xlu1 %v9783_v4  ;;  %v9836_v5 = vadd.f32 %v9835_v37, %v9819_v2  ;;  %9827 = vadd.xlane.f32.xlu0 %v9826_v19  ;;  %v9900_v19 = vld [vmem:[%s14576_s4] sm:$0xff]  ;;  %s14528_s15 = scalar_lea.vmem %s14579_s7, %s10783_s17 }
 0x4ce   : > { %v9840_v6 = vadd.f32 %v9839_v13, %v9822_v43  ;;  %v9793_v34 = vadd.f32 %v9792_v26, %v9771_v15  ;;  %v9901_v26 = vld [vmem:[%s14576_s4 + $0x8] sm:$0xff] }
 0x4d0   : > { %v9841_v20 = vadd.f32 %v9840_v6, %v9823_v0 }
 0x4d1   : > { %9832 = vadd.xlane.f32.xlu1 %v9831_v57  ;;  %9789 = vadd.xlane.f32.xlu0 %v9788_v35 }
 0x4d5   : > { %9794 = vadd.xlane.f32.xlu1 %v9793_v34  ;;  %9837 = vadd.xlane.f32.xlu0 %v9836_v5  ;;  %v9908_v5 = vld [vmem:[%s14577_s5] sm:$0xff] }
 0x4d9   : > { %9842 = vadd.xlane.f32.xlu1 %v9841_v20 }
 0x555   : > { %v9780_v38 = vpop.xlane.xlu0 %9779 }
 0x556   : > { %v9796_v14 = vadd.f32 %v9780_v38, %v9772_v23  ;;  %v9909_v38 = vld [vmem:[%s14577_s5 + $0x8] sm:$0xff] }
 0x558   : > { %9800 = vst.msk [vmem:[#allocation2] sm:$0xff] %vm334_vm10, %v9796_v14 }
 0x55a   : > { %v9785_v63 = vpop.xlane.xlu1 %9784  ;;  %v9828_v21 = vpop.xlane.xlu0 %9827 }
 0x55b   : > { %v9797_v46 = vadd.f32 %v9785_v63, %v9773_v22  ;;  %v9844_v11 = vadd.f32 %v9828_v21, %v9804_v42  ;;  %v9902_v22 = vld [vmem:[%s14576_s4 + $0x10] sm:$0xff]  ;;  %v9903_v21 = vld [vmem:[%s14576_s4 + $0x18] sm:$0xff] }
 0x55d   : > { %9801 = vst.msk [vmem:[#allocation2 + $0x8] sm:$0xff] %vm334_vm10, %v9797_v46  ;;  %9848 = vst.msk [vmem:[#allocation3] sm:$0xff] %vm334_vm10, %v9844_v11  ;;  %v9910_v11 = vld [vmem:[%s14577_s5 + $0x10] sm:$0xff] }
 0x55e   : > { %v9833_v28 = vpop.xlane.xlu1 %9832  ;;  %v9790_v24 = vpop.xlane.xlu0 %9789 }
 0x55f   : > { %v9845_v61 = vadd.f32 %v9833_v28, %v9805_v16  ;;  %v9798_v30 = vadd.f32 %v9790_v24, %v9774_v12  ;;  %v9855_v41 = vld [vmem:[#allocation2] sm:$0xff]  ;;  %v9911_v24 = vld [vmem:[%s14577_s5 + $0x18] sm:$0xff] }
 0x560   : > { %v9872_v40 = vmul.f32 0.001953125, %v9855_v41 }
 0x561   : > { %9849 = vst.msk [vmem:[#allocation3 + $0x8] sm:$0xff] %vm334_vm10, %v9845_v61  ;;  %9802 = vst.msk [vmem:[#allocation2 + $0x10] sm:$0xff] %vm334_vm10, %v9798_v30 }
 0x562   : > { %v9795_v9 = vpop.xlane.xlu1 %9794  ;;  %v9838_v54 = vpop.xlane.xlu0 %9837  ;;  %v9880_v27 = vmul.f32 %v9872_v40, %v9872_v40 }
 0x563   : > { %v9799_v53 = vadd.f32 %v9795_v9, %v9775_v25  ;;  %v9846_v62 = vadd.f32 %v9838_v54, %v9806_v52 }
 0x564   : > { %v9856_v17 = vld [vmem:[#allocation2 + $0x8] sm:$0xff]  ;;  %v9863_v51 = vld [vmem:[#allocation3] sm:$0xff] }
 0x565   : > { %9803 = vst.msk [vmem:[#allocation2 + $0x18] sm:$0xff] %vm334_vm10, %v9799_v53  ;;  %v9873_v33 = vmul.f32 0.001953125, %v9856_v17  ;;  %9850 = vst.msk [vmem:[#allocation3 + $0x10] sm:$0xff] %vm334_vm10, %v9846_v62  ;;  %v9876_v36 = vmul.f32 0.001953125, %v9863_v51 }
 0x566   : > { %v9843_v58 = vpop.xlane.xlu1 %9842 }
 0x567   : > { %v9847_v49 = vadd.f32 %v9843_v58, %v9807_v44  ;;  %v9884_v1 = vsub.f32 %v9876_v36, %v9880_v27  ;;  %v9881_v31 = vmul.f32 %v9873_v33, %v9873_v33 }
 0x568   : > { %v9864_v47 = vld [vmem:[#allocation3 + $0x8] sm:$0xff]  ;;  %v9857_v29 = vld [vmem:[#allocation2 + $0x10] sm:$0xff] }
 0x569   : > { %9851 = vst.msk [vmem:[#allocation3 + $0x18] sm:$0xff] %vm334_vm10, %v9847_v49  ;;  %v9877_v3 = vmul.f32 0.001953125, %v9864_v47  ;;  %v9888_v50 = vmax.f32 %v9884_v1, 0.0  ;;  %v9874_v10 = vmul.f32 0.001953125, %v9857_v29 }
 0x56b   : > { %v9885_v7 = vsub.f32 %v9877_v3, %v9881_v31  ;;  %v9892_v56 = vadd.f32 1e-05, %v9888_v50  ;;  %v9882_v8 = vmul.f32 %v9874_v10, %v9874_v10 }
 0x56c   : > { %v9858_v59 = vld [vmem:[#allocation2 + $0x18] sm:$0xff]  ;;  %v9865_v13 = vld [vmem:[#allocation3 + $0x10] sm:$0xff] }
 0x56d   : > { %v9889_v48 = vmax.f32 %v9885_v7, 0.0  ;;  %v9875_v2 = vmul.f32 0.001953125, %v9858_v59  ;;  %11812 = vrsqrt.f32 %v9892_v56  ;;  %v9878_v39 = vmul.f32 0.001953125, %v9865_v13 }
 0x56f   : > { %v9893_v60 = vadd.f32 1e-05, %v9889_v48  ;;  %v9886_v45 = vsub.f32 %v9878_v39, %v9882_v8  ;;  %v9883_v32 = vmul.f32 %v9875_v2, %v9875_v2 }
 0x570   : > { %v9866_v18 = vld [vmem:[#allocation3 + $0x18] sm:$0xff] }
 0x571   : > { %11814 = vrsqrt.f32 %v9893_v60  ;;  %v9879_v55 = vmul.f32 0.001953125, %v9866_v18  ;;  %v9890_v15 = vmax.f32 %v9886_v45, 0.0 }
 0x573   : > { %v9887_v4 = vsub.f32 %v9879_v55, %v9883_v32  ;;  %v9894_v37 = vadd.f32 1e-05, %v9890_v15 }
 0x575   : > { %v9891_v43 = vmax.f32 %v9887_v4, 0.0  ;;  %11816 = vrsqrt.f32 %v9894_v37 }
 0x577   : > { %v9895_v57 = vadd.f32 1e-05, %v9891_v43  ;;  %v11813_v35 = vpop.eup %11812 }
 0x578   : > { %v9904_v0 = vmul.f32 %v11813_v35, %v9900_v19 }
 0x579   : > { %11818 = vrsqrt.f32 %v9895_v57 }
 0x57a   : > { %v9912_v34 = vmul.f32 %v9904_v0, %v9872_v40  ;;  %9920 = vst.msk [vmem:[%s14528_s15] sm:$0xff] %vm334_vm10, %v9904_v0 }
 0x57b   : > { %v11815_v6 = vpop.eup %11814 }
 0x57c   : > { %v9905_v20 = vmul.f32 %v11815_v6, %v9901_v26  ;;  %v9916_v23 = vsub.f32 %v9908_v5, %v9912_v34 }
 0x57e   : > { %v9913_v14 = vmul.f32 %v9905_v20, %v9873_v33  ;;  %9921 = vst.msk [vmem:[%s14528_s15 + $0x8] sm:$0xff] %vm334_vm10, %v9905_v20  ;;  %9928 = vrot.lane.b32.xlu0 %v9916_v23, %s11854_s8 }
 0x57f   : > { %v11817_v63 = vpop.eup %11816 }
 0x580   : > { %v9917_v46 = vsub.f32 %v9909_v38, %v9913_v14  ;;  %v9906_v42 = vmul.f32 %v11817_v63, %v9902_v22 }
 0x582   : > { %9930 = vrot.lane.b32.xlu1 %v9917_v46, %s11854_s8  ;;  %v9914_v28 = vmul.f32 %v9906_v42, %v9874_v10  ;;  %9922 = vst.msk [vmem:[%s14528_s15 + $0x10] sm:$0xff] %vm334_vm10, %v9906_v42 }
 0x583   : > { %v11819_v16 = vpop.eup %11818 }
 0x584   : > { %v9907_v61 = vmul.f32 %v11819_v16, %v9903_v21  ;;  %v9918_v12 = vsub.f32 %v9910_v11, %v9914_v28 }
 0x586   : > { %v9915_v30 = vmul.f32 %v9907_v61, %v9875_v2  ;;  %9923 = vst.msk [vmem:[%s14528_s15 + $0x18] sm:$0xff] %vm334_vm10, %v9907_v61  ;;  %9932 = vrot.lane.b32.xlu1 %v9918_v12, %s11854_s8 }
 0x588   : > { %v9919_v41 = vsub.f32 %v9911_v24, %v9915_v30 }
 0x58a   : > { %9934 = vrot.lane.b32.xlu0 %v9919_v41, %s11854_s8 }
 0x5f0   : > { %v9929_v25 = vpop.permute.xlu0 %9928 }
 0x5f1   : > { %9941 = vst.msk [vmem:[%s14528_s15] sm:$0xff] %vm9940_vm11, %v9929_v25 }
 0x5f4   : > { %v9931_v9 = vpop.permute.xlu1 %9930 }
 0x5f5   : > { %9942 = vst.msk [vmem:[%s14528_s15 + $0x8] sm:$0xff] %vm9940_vm11, %v9931_v9 }
 0x5f8   : > { %v9933_v40 = vpop.permute.xlu1 %9932 }
 0x5f9   : > { %9943 = vst.msk [vmem:[%s14528_s15 + $0x10] sm:$0xff] %vm9940_vm11, %v9933_v40 }
 0x5fc   : > { %v9935_v53 = vpop.permute.xlu0 %9934 }
 0x5fd   : > { %9944 = vst.msk [vmem:[%s14528_s15 + $0x18] sm:$0xff] %vm9940_vm11, %v9935_v53 }
 0x5fe PF: > { %s18_s26 = sadd.s32 1, %s11842_s26   ;;  %s14691_s24 = smov %s11838_s25 }
 0x5ff   : > { %p15_p5 = scmp.ge.s32.totalorder %s18_s26, 4   ;;  %s14692_s25 = smov %s14694_s27 }
 0x601   :  { %17 = sbr.rel (!%p15_p5) target bundleno = 2 (0x2), region = 120 }

</bundles_post_ra>
